<compile_context>
chip_gen: v5e
topology: v5e:2x2
jax: 0.10.0
libtpu: 0.0.40
codegen_flags: <defaults>
</compile_context>

<pallas_src>
import math

import jax
import jax.numpy as jnp
import numpy as np
from jax.experimental import pallas as pl
from jax.experimental.pallas import tpu as pltpu

_EPS = 1e-5
_NEG_SLOPE = 0.2
_INV_SQRT2 = 1.0 / math.sqrt(2.0)
_LANE = 128

# Tap 'a' (0..3) of the fused 4x4/stride-2 conv maps, in space-to-depth coords, to
# (start row in the halo-padded buffer, sub-pixel index):
#   a=0 -> block row i-1, sub 1 ; a=1 -> i, sub 0 ; a=2 -> i, sub 1 ; a=3 -> i+1, sub 0
_TAP_START = (0, 1, 1, 2)
_TAP_SUB = (1, 0, 1, 0)


def _round_up(x, m):
    return (x + m - 1) // m * m


def _lrelu(h):
    return jnp.where(h >= 0, h, _NEG_SLOPE * h)


def _zero_halo(pad_ref):
    """Zero the 1-pixel halo (and lane-alignment columns) with unmasked stores.

    Done every grid step (4 aligned strips, cheap) so correctness never depends on
    scratch state from another grid step / another core.  The interior is fully
    overwritten afterwards, so over-zeroing interior columns is harmless.
    """
    hp, wp, c = pad_ref.shape
    zrow = jnp.zeros((1, wp, c), pad_ref.dtype)
    pad_ref[0:1, :, :] = zrow
    pad_ref[hp - 1:hp, :, :] = zrow
    zcol = jnp.zeros((hp, 8, c), pad_ref.dtype)
    pad_ref[:, 0:8, :] = zcol
    pad_ref[:, wp - 8:wp, :] = zcol


def resblk_kernel(x_ref, g1_ref, b1_ref, g2_ref, b2_ref,
                  w1_ref, cb1_ref, w2_ref, cb2_ref, wsc_ref,
                  out_ref, pad1_ref, pad2_ref):
    ho, wo, c4 = x_ref.shape            # space-to-depth block: (H/2, W/2, 4*Cp)
    cp = c4 // 4
    n_pix = 4 * ho * wo                 # original H*W (norm1 statistics)

    x = x_ref[...]                      # (Ho, Wo, 4*Cp) f32
    blocks = [x[:, :, q * cp:(q + 1) * cp] for q in range(4)]
    xs = blocks[0] + blocks[1] + blocks[2] + blocks[3]     # == 4 * avg_pool2(x)

    # ---- shortcut: pool (already in xs) then 1x1 conv; 0.25/sqrt(2) folded in wsc
    acc = jnp.dot(xs.reshape(ho * wo, cp).astype(jnp.bfloat16), wsc_ref[...],
                  preferred_element_type=jnp.float32)       # (Ho*Wo, Cout_pad) f32

    # ---- instance norm 1 (stats over full H x W) + leaky relu -----------------
    mean1 = jnp.sum(xs, axis=(0, 1), keepdims=True) * (1.0 / n_pix)          # (1,1,Cp)
    var1 = (sum(jnp.sum((xb - mean1) ** 2, axis=(0, 1), keepdims=True) for xb in blocks)
            * (1.0 / n_pix))
    scale1 = jax.lax.rsqrt(var1 + _EPS) * g1_ref[...]
    shift1 = b1_ref[...] - mean1 * scale1
    scale1 = jnp.concatenate([scale1] * 4, axis=-1)          # (1,1,4*Cp)
    shift1 = jnp.concatenate([shift1] * 4, axis=-1)
    h = _lrelu(x * scale1 + shift1)

    # ---- fused conv1(3x3, SAME) + avg_pool2  == 4x4 stride-2 conv --------------
    # Space-to-depth turns the stride-2 taps into 16 contiguous slices of a
    # zero-halo buffer; one K=Cp per-tap accumulating matmul each (no im2col).
    _zero_halo(pad1_ref)
    pad1_ref[1:ho + 1, 1:wo + 1, :] = h.astype(jnp.bfloat16)
    acc1 = jnp.zeros((ho * wo, cp), jnp.float32)
    for a in range(4):
        for b in range(4):
            t = a * 4 + b
            blk = _TAP_SUB[a] * 2 + _TAP_SUB[b]
            lhs = pad1_ref[_TAP_START[a]:_TAP_START[a] + ho,
                           _TAP_START[b]:_TAP_START[b] + wo,
                           blk * cp:(blk + 1) * cp]
            acc1 = acc1 + jnp.dot(lhs.reshape(ho * wo, cp),
                                  w1_ref[t * cp:(t + 1) * cp, :],
                                  preferred_element_type=jnp.float32)
    h1 = acc1 + cb1_ref[...]                                  # (Ho*Wo, Cp)

    # ---- instance norm 2 (stats over Ho x Wo) + leaky relu ---------------------
    mean2 = jnp.mean(h1, axis=0, keepdims=True)               # (1, Cp)
    var2 = jnp.mean((h1 - mean2) ** 2, axis=0, keepdims=True)
    scale2 = jax.lax.rsqrt(var2 + _EPS) * g2_ref[...]
    shift2 = b2_ref[...] - mean2 * scale2
    h2 = _lrelu(h1 * scale2 + shift2)

    # ---- conv2: 3x3 SAME, 9 per-tap matmuls; 1/sqrt(2) folded into w2/cb2 ------
    _zero_halo(pad2_ref)
    pad2_ref[1:ho + 1, 1:wo + 1, :] = h2.reshape(ho, wo, cp).astype(jnp.bfloat16)
    for kh in range(3):
        for kw in range(3):
            t = kh * 3 + kw
            lhs = pad2_ref[kh:kh + ho, kw:kw + wo, :]
            acc = acc + jnp.dot(lhs.reshape(ho * wo, cp),
                                w2_ref[t * cp:(t + 1) * cp, :],
                                preferred_element_type=jnp.float32)

    # lane-dense (Ho*Wo, Cout_pad) store; wrapper un-pads / reshapes to NCHW.
    out_ref[...] = (acc + cb2_ref[...]).astype(out_ref.dtype)


def _pick_vmem_limit_bytes():
    """Per-generation VMEM budget (v7x: 64 MiB physical; v5e/v6e: 128 MiB)."""
    try:
        cap = pltpu.get_tpu_info().vmem_capacity_bytes
        return int(min(cap * 7 // 8, 112 * 1024 * 1024))
    except Exception:
        return 48 * 1024 * 1024          # conservative: fits every generation


def resblk_forward(x_nchw, params):
    """Pallas ResBlk forward.  x_nchw: (N, Cin, H, W) f32 -> (N, Cout, H/2, W/2)."""
    N, Cin, H, W = x_nchw.shape
    Cout = params["w2"].shape[-1]
    Ho, Wo = H // 2, W // 2
    Cp = _round_up(Cin, _LANE)           # lane-padded channel counts
    Cop = _round_up(Cout, _LANE)
    Wp = _round_up(Wo + 2, 8)            # halo-buffer sublane dim, (8,128)-aligned

    # ---- input: NCHW -> NHWC, zero-pad channels, space-to-depth ---------------
    x = jnp.transpose(x_nchw, (0, 2, 3, 1)).astype(jnp.float32)
    x = jnp.pad(x, ((0, 0), (0, 0), (0, 0), (0, Cp - Cin)))
    # x2[n,i,j,(dp*2+dq)*Cp + c] = x[n, 2i+dp, 2j+dq, c]
    x = (x.reshape(N, Ho, 2, Wo, 2, Cp)
          .transpose(0, 1, 3, 2, 4, 5)
          .reshape(N, Ho, Wo, 4 * Cp))

    # ---- parameter plumbing (one-time XLA work) --------------------------------
    # Fold avg_pool2 into conv1: pool(conv3x3(h)) == stride-2 conv with
    #   w4[a,b] = 0.25 * sum_{di,dj in {0,1}} w1[a-di, b-dj]   (zero outside [0,3)).
    w1 = params["w1"].astype(jnp.float32)                    # (3,3,Cin,Cin) HWIO
    w4 = jnp.zeros((4, 4, Cin, Cin), jnp.float32)
    for di in (0, 1):
        for dj in (0, 1):
            w4 = w4.at[di:di + 3, dj:dj + 3, :, :].add(w1)
    w4 = 0.25 * w4
    w1f = jnp.zeros((4, 4, Cp, Cp), jnp.float32).at[:, :, :Cin, :Cin].set(w4)
    w1f = w1f.reshape(16 * Cp, Cp).astype(jnp.bfloat16)      # tap-major (a,b,cin)

    w2 = params["w2"].astype(jnp.float32) * _INV_SQRT2       # fold final 1/sqrt(2)
    w2f = jnp.zeros((3, 3, Cp, Cop), jnp.float32).at[:, :, :Cin, :Cout].set(w2)
    w2f = w2f.reshape(9 * Cp, Cop).astype(jnp.bfloat16)      # tap-major (kh,kw,cin)

    wsc = params["wsc"].astype(jnp.float32) * (0.25 * _INV_SQRT2)  # fold pool + 1/sqrt2
    wscf = jnp.zeros((Cp, Cop), jnp.float32).at[:Cin, :Cout].set(wsc).astype(jnp.bfloat16)

    def pad_vec(v, n):
        return jnp.pad(v.astype(jnp.float32), (0, n - v.shape[0])).reshape(1, n)

    g1 = pad_vec(params["g1"], Cp)
    b1 = pad_vec(params["b1"], Cp)
    g2 = pad_vec(params["g2"], Cp)
    b2 = pad_vec(params["b2"], Cp)
    cb1 = pad_vec(params["cb1"], Cp)
    cb2 = pad_vec(params["cb2"], Cop) * _INV_SQRT2

    out = pl.pallas_call(
        resblk_kernel,
        out_shape=jax.ShapeDtypeStruct((N, Ho * Wo, Cop), jnp.float32),
        grid=(N,),
        in_specs=[
            pl.BlockSpec((None, Ho, Wo, 4 * Cp), lambda n: (n, 0, 0, 0)),  # x (s2d)
            pl.BlockSpec((1, Cp), lambda n: (0, 0)),          # g1
            pl.BlockSpec((1, Cp), lambda n: (0, 0)),          # b1
            pl.BlockSpec((1, Cp), lambda n: (0, 0)),          # g2
            pl.BlockSpec((1, Cp), lambda n: (0, 0)),          # b2
            pl.BlockSpec((16 * Cp, Cp), lambda n: (0, 0)),    # fused conv1 weights (bf16)
            pl.BlockSpec((1, Cp), lambda n: (0, 0)),          # cb1
            pl.BlockSpec((9 * Cp, Cop), lambda n: (0, 0)),    # conv2 weights (bf16)
            pl.BlockSpec((1, Cop), lambda n: (0, 0)),         # cb2 (pre-scaled)
            pl.BlockSpec((Cp, Cop), lambda n: (0, 0)),        # 1x1 shortcut weights
        ],
        out_specs=pl.BlockSpec((None, Ho * Wo, Cop), lambda n: (n, 0, 0)),
        scratch_shapes=[
            pltpu.VMEM((Ho + 2, Wp, 4 * Cp), jnp.bfloat16),   # conv1 halo buffer
            pltpu.VMEM((Ho + 2, Wp, Cp), jnp.bfloat16),       # conv2 halo buffer
        ],
        compiler_params=pltpu.CompilerParams(
            dimension_semantics=("parallel",),   # batch elements are independent
            vmem_limit_bytes=_pick_vmem_limit_bytes(),
        ),
    )(x, g1, b1, g2, b2, w1f, cb1, w2f, cb2, wscf)

    out = out.reshape(N, Ho, Wo, Cop)[:, :, :, :Cout]         # drop channel padding
    return jnp.transpose(out, (0, 3, 1, 2))                   # back to NCHW


# ------------------------- pure-JAX f32 reference -------------------------
def resblk_ref_nhwc(x, p):
    def inorm(h, g, b):
        m = jnp.mean(h, axis=(1, 2), keepdims=True)
        v = jnp.mean((h - m) ** 2, axis=(1, 2), keepdims=True)
        return (h - m) / jnp.sqrt(v + _EPS) * g.reshape(1, 1, 1, -1) + b.reshape(1, 1, 1, -1)

    def lrelu(h):
        return jnp.where(h >= 0, h, _NEG_SLOPE * h)

    def conv3(h, w, b):
        y = jax.lax.conv_general_dilated(h, w, (1, 1), "SAME",
                                         dimension_numbers=("NHWC", "HWIO", "NHWC"))
        return y + b.reshape(1, 1, 1, -1)

    def pool(h):
        return jax.lax.reduce_window(h, 0.0, jax.lax.add,
                                     (1, 2, 2, 1), (1, 2, 2, 1), "VALID") * 0.25

    sc = pool(jnp.einsum("nhwi,io->nhwo", x, p["wsc"]))
    r = lrelu(inorm(x, p["g1"], p["b1"]))
    r = conv3(r, p["w1"], p["cb1"])
    r = pool(r)
    r = lrelu(inorm(r, p["g2"], p["b2"]))
    r = conv3(r, p["w2"], p["cb2"])
    return (sc + r) * _INV_SQRT2


if __name__ == "__main__":
    N, Cin, Cout, H, W = 2, 4, 8, 16, 16

    key = jax.random.PRNGKey(0)
    kx, k1, k2, k3, k4, k5, k6, k7, k8, k9 = jax.random.split(key, 10)

    x_nchw = jax.random.normal(kx, (N, Cin, H, W), jnp.float32)

    params = dict(
        g1=1.0 + 0.1 * jax.random.normal(k1, (Cin,), jnp.float32),
        b1=0.1 * jax.random.normal(k2, (Cin,), jnp.float32),
        g2=1.0 + 0.1 * jax.random.normal(k3, (Cin,), jnp.float32),
        b2=0.1 * jax.random.normal(k4, (Cin,), jnp.float32),
        w1=jax.random.normal(k5, (3, 3, Cin, Cin), jnp.float32) / math.sqrt(9 * Cin),
        cb1=0.1 * jax.random.normal(k6, (Cin,), jnp.float32),
        w2=jax.random.normal(k7, (3, 3, Cin, Cout), jnp.float32) / math.sqrt(9 * Cin),
        cb2=0.1 * jax.random.normal(k8, (Cout,), jnp.float32),
        wsc=jax.random.normal(k9, (Cin, Cout), jnp.float32) / math.sqrt(Cin),
    )

    out = jax.block_until_ready(resblk_forward(x_nchw, params))
    assert out.shape == (N, Cout, H // 2, W // 2)

    x_nhwc = jnp.transpose(x_nchw, (0, 2, 3, 1))
    ref = jnp.transpose(resblk_ref_nhwc(x_nhwc, params), (0, 3, 1, 2))
    # Tolerance reflects bf16 MXU inputs (f32 accumulate) in the kernel vs. f32 ref.
    np.testing.assert_allclose(np.asarray(out), np.asarray(ref), rtol=3e-2, atol=3e-2)

    print("KERNEL_OK")
</pallas_src>

<mosaic_0001>
module attributes {stable_mosaic.version = 11 : i64} {
  func.func @resblk_kernel(%arg0: i32, %arg1: memref<1x8x8x512xf32, #tpu.memory_space<vmem>>, %arg2: memref<1x128xf32, #tpu.memory_space<vmem>>, %arg3: memref<1x128xf32, #tpu.memory_space<vmem>>, %arg4: memref<1x128xf32, #tpu.memory_space<vmem>>, %arg5: memref<1x128xf32, #tpu.memory_space<vmem>>, %arg6: memref<2048x128xbf16, #tpu.memory_space<vmem>>, %arg7: memref<1x128xf32, #tpu.memory_space<vmem>>, %arg8: memref<1152x128xbf16, #tpu.memory_space<vmem>>, %arg9: memref<1x128xf32, #tpu.memory_space<vmem>>, %arg10: memref<128x128xbf16, #tpu.memory_space<vmem>>, %arg11: memref<1x64x128xf32, #tpu.memory_space<vmem>>, %arg12: memref<10x16x512xbf16, #tpu.memory_space<vmem>>, %arg13: memref<10x16x128xbf16, #tpu.memory_space<vmem>>) attributes {dimension_semantics = [#tpu.dimension_semantics<parallel>], iteration_bounds = array<i64: 2>, scalar_prefetch = 0 : i64, scratch_operands = 2 : i64, tpu.core_type = #tpu.core_type<tc>, window_params = [{transform_indices = @transform_0, window_bounds = array<i64: 1, 8, 8, 512>}, {pipeline_mode = #tpu.pipeline_mode<synchronous>, transform_indices = @transform_1, window_bounds = array<i64: 1, 128>}, {pipeline_mode = #tpu.pipeline_mode<synchronous>, transform_indices = @transform_2, window_bounds = array<i64: 1, 128>}, {pipeline_mode = #tpu.pipeline_mode<synchronous>, transform_indices = @transform_3, window_bounds = array<i64: 1, 128>}, {pipeline_mode = #tpu.pipeline_mode<synchronous>, transform_indices = @transform_4, window_bounds = array<i64: 1, 128>}, {pipeline_mode = #tpu.pipeline_mode<synchronous>, transform_indices = @transform_5, window_bounds = array<i64: 2048, 128>}, {pipeline_mode = #tpu.pipeline_mode<synchronous>, transform_indices = @transform_6, window_bounds = array<i64: 1, 128>}, {pipeline_mode = #tpu.pipeline_mode<synchronous>, transform_indices = @transform_7, window_bounds = array<i64: 1152, 128>}, {pipeline_mode = #tpu.pipeline_mode<synchronous>, transform_indices = @transform_8, window_bounds = array<i64: 1, 128>}, {pipeline_mode = #tpu.pipeline_mode<synchronous>, transform_indices = @transform_9, window_bounds = array<i64: 128, 128>}, {transform_indices = @transform_10, window_bounds = array<i64: 1, 64, 128>}]} {
    %c0 = arith.constant 0 : index
    %c0_0 = arith.constant 0 : index
    %c0_1 = arith.constant 0 : index
    %c0_2 = arith.constant 0 : index
    %0 = vector.load %arg1[%c0, %c0_0, %c0_1, %c0_2] : memref<1x8x8x512xf32, #tpu.memory_space<vmem>>, vector<1x8x8x512xf32>
    %1 = vector.shape_cast %0 : vector<1x8x8x512xf32> to vector<8x8x512xf32>
    %2 = vector.extract_strided_slice %1 {offsets = [0, 0, 0], sizes = [8, 8, 128], strides = [1, 1, 1]} : vector<8x8x512xf32> to vector<8x8x128xf32>
    %3 = vector.extract_strided_slice %1 {offsets = [0, 0, 128], sizes = [8, 8, 128], strides = [1, 1, 1]} : vector<8x8x512xf32> to vector<8x8x128xf32>
    %4 = vector.extract_strided_slice %1 {offsets = [0, 0, 256], sizes = [8, 8, 128], strides = [1, 1, 1]} : vector<8x8x512xf32> to vector<8x8x128xf32>
    %5 = vector.extract_strided_slice %1 {offsets = [0, 0, 384], sizes = [8, 8, 128], strides = [1, 1, 1]} : vector<8x8x512xf32> to vector<8x8x128xf32>
    %6 = arith.addf %2, %3 : vector<8x8x128xf32>
    %7 = arith.addf %6, %4 : vector<8x8x128xf32>
    %8 = arith.addf %7, %5 : vector<8x8x128xf32>
    %9 = vector.shape_cast %8 : vector<8x8x128xf32> to vector<64x128xf32>
    %10 = arith.truncf %9 : vector<64x128xf32> to vector<64x128xbf16>
    %c0_3 = arith.constant 0 : index
    %c0_4 = arith.constant 0 : index
    %11 = vector.load %arg10[%c0_3, %c0_4] : memref<128x128xbf16, #tpu.memory_space<vmem>>, vector<128x128xbf16>
    %cst = arith.constant dense<0.000000e+00> : vector<64x128xf32>
    %12 = tpu.matmul %10, %11, %cst {dimension_numbers = #tpu.dot_dimension_numbers<[1], [0], [0], [1], [0, 0, 1, 1], [], []>} : vector<64x128xbf16>, vector<128x128xbf16>, vector<64x128xf32> -> vector<64x128xf32>
    %cst_5 = arith.constant dense<0.000000e+00> : vector<128xf32>
    %13 = vector.multi_reduction <add>, %8, %cst_5 [0, 1] : vector<8x8x128xf32> to vector<128xf32>
    %14 = vector.shape_cast %13 : vector<128xf32> to vector<1x1x128xf32>
    %cst_6 = arith.constant 3.906250e-03 : f32
    %15 = vector.broadcast %cst_6 : f32 to vector<1x1x128xf32>
    %16 = arith.mulf %14, %15 : vector<1x1x128xf32>
    %17 = vector.broadcast %16 : vector<1x1x128xf32> to vector<8x8x128xf32>
    %18 = arith.subf %2, %17 : vector<8x8x128xf32>
    %19 = arith.mulf %18, %18 : vector<8x8x128xf32>
    %cst_7 = arith.constant dense<0.000000e+00> : vector<128xf32>
    %20 = vector.multi_reduction <add>, %19, %cst_7 [0, 1] : vector<8x8x128xf32> to vector<128xf32>
    %21 = vector.shape_cast %20 : vector<128xf32> to vector<1x1x128xf32>
    %cst_8 = arith.constant 0.000000e+00 : f32
    %22 = vector.broadcast %cst_8 : f32 to vector<1x1x128xf32>
    %23 = arith.addf %22, %21 : vector<1x1x128xf32>
    %24 = vector.broadcast %16 : vector<1x1x128xf32> to vector<8x8x128xf32>
    %25 = arith.subf %3, %24 : vector<8x8x128xf32>
    %26 = arith.mulf %25, %25 : vector<8x8x128xf32>
    %cst_9 = arith.constant dense<0.000000e+00> : vector<128xf32>
    %27 = vector.multi_reduction <add>, %26, %cst_9 [0, 1] : vector<8x8x128xf32> to vector<128xf32>
    %28 = vector.shape_cast %27 : vector<128xf32> to vector<1x1x128xf32>
    %29 = arith.addf %23, %28 : vector<1x1x128xf32>
    %30 = vector.broadcast %16 : vector<1x1x128xf32> to vector<8x8x128xf32>
    %31 = arith.subf %4, %30 : vector<8x8x128xf32>
    %32 = arith.mulf %31, %31 : vector<8x8x128xf32>
    %cst_10 = arith.constant dense<0.000000e+00> : vector<128xf32>
    %33 = vector.multi_reduction <add>, %32, %cst_10 [0, 1] : vector<8x8x128xf32> to vector<128xf32>
    %34 = vector.shape_cast %33 : vector<128xf32> to vector<1x1x128xf32>
    %35 = arith.addf %29, %34 : vector<1x1x128xf32>
    %36 = vector.broadcast %16 : vector<1x1x128xf32> to vector<8x8x128xf32>
    %37 = arith.subf %5, %36 : vector<8x8x128xf32>
    %38 = arith.mulf %37, %37 : vector<8x8x128xf32>
    %cst_11 = arith.constant dense<0.000000e+00> : vector<128xf32>
    %39 = vector.multi_reduction <add>, %38, %cst_11 [0, 1] : vector<8x8x128xf32> to vector<128xf32>
    %40 = vector.shape_cast %39 : vector<128xf32> to vector<1x1x128xf32>
    %41 = arith.addf %35, %40 : vector<1x1x128xf32>
    %cst_12 = arith.constant 3.906250e-03 : f32
    %42 = vector.broadcast %cst_12 : f32 to vector<1x1x128xf32>
    %43 = arith.mulf %41, %42 : vector<1x1x128xf32>
    %cst_13 = arith.constant 9.99999974E-6 : f32
    %44 = vector.broadcast %cst_13 : f32 to vector<1x1x128xf32>
    %45 = arith.addf %43, %44 : vector<1x1x128xf32>
    %46 = math.rsqrt %45 : vector<1x1x128xf32>
    %c0_14 = arith.constant 0 : index
    %c0_15 = arith.constant 0 : index
    %47 = vector.load %arg2[%c0_14, %c0_15] : memref<1x128xf32, #tpu.memory_space<vmem>>, vector<1x128xf32>
    %48 = vector.shape_cast %47 : vector<1x128xf32> to vector<1x1x128xf32>
    %49 = arith.mulf %46, %48 : vector<1x1x128xf32>
    %c0_16 = arith.constant 0 : index
    %c0_17 = arith.constant 0 : index
    %50 = vector.load %arg3[%c0_16, %c0_17] : memref<1x128xf32, #tpu.memory_space<vmem>>, vector<1x128xf32>
    %51 = arith.mulf %16, %49 : vector<1x1x128xf32>
    %52 = vector.shape_cast %50 : vector<1x128xf32> to vector<1x1x128xf32>
    %53 = arith.subf %52, %51 : vector<1x1x128xf32>
    %54 = tpu.concatenate %49, %49, %49, %49 in 2 : vector<1x1x128xf32>, vector<1x1x128xf32>, vector<1x1x128xf32>, vector<1x1x128xf32> -> vector<1x1x512xf32>
    %55 = tpu.concatenate %53, %53, %53, %53 in 2 : vector<1x1x128xf32>, vector<1x1x128xf32>, vector<1x1x128xf32>, vector<1x1x128xf32> -> vector<1x1x512xf32>
    %56 = vector.broadcast %54 : vector<1x1x512xf32> to vector<8x8x512xf32>
    %57 = arith.mulf %1, %56 : vector<8x8x512xf32>
    %58 = vector.broadcast %55 : vector<1x1x512xf32> to vector<8x8x512xf32>
    %59 = arith.addf %57, %58 : vector<8x8x512xf32>
    %cst_18 = arith.constant 0.000000e+00 : f32
    %60 = vector.broadcast %cst_18 : f32 to vector<8x8x512xf32>
    %61 = arith.cmpf oge, %59, %60 : vector<8x8x512xf32>
    %cst_19 = arith.constant 2.000000e-01 : f32
    %62 = vector.broadcast %cst_19 : f32 to vector<8x8x512xf32>
    %63 = arith.mulf %62, %59 : vector<8x8x512xf32>
    %64 = arith.select %61, %59, %63 : vector<8x8x512xi1>, vector<8x8x512xf32>
    %cst_20 = arith.constant 0.000000e+00 : bf16
    %65 = vector.broadcast %cst_20 : bf16 to vector<1x16x512xbf16>
    %c0_21 = arith.constant 0 : index
    %c0_22 = arith.constant 0 : index
    %c0_23 = arith.constant 0 : index
    %66 = vector.load %arg12[%c0_21, %c0_22, %c0_23] : memref<10x16x512xbf16, #tpu.memory_space<vmem>>, vector<1x16x512xbf16>
    tpu.vector_store %arg12[%c0_21, %c0_22, %c0_23], %65 {strides = array<i32>} : memref<10x16x512xbf16, #tpu.memory_space<vmem>>, vector<1x16x512xbf16>,
    %c9 = arith.constant 9 : index
    %c0_24 = arith.constant 0 : index
    %c0_25 = arith.constant 0 : index
    %67 = vector.load %arg12[%c9, %c0_24, %c0_25] : memref<10x16x512xbf16, #tpu.memory_space<vmem>>, vector<1x16x512xbf16>
    tpu.vector_store %arg12[%c9, %c0_24, %c0_25], %65 {strides = array<i32>} : memref<10x16x512xbf16, #tpu.memory_space<vmem>>, vector<1x16x512xbf16>,
    %cst_26 = arith.constant 0.000000e+00 : bf16
    %68 = vector.broadcast %cst_26 : bf16 to vector<10x8x512xbf16>
    %c0_27 = arith.constant 0 : index
    %c0_28 = arith.constant 0 : index
    %c0_29 = arith.constant 0 : index
    %69 = vector.load %arg12[%c0_27, %c0_28, %c0_29] : memref<10x16x512xbf16, #tpu.memory_space<vmem>>, vector<10x8x512xbf16>
    tpu.vector_store %arg12[%c0_27, %c0_28, %c0_29], %68 {strides = array<i32>} : memref<10x16x512xbf16, #tpu.memory_space<vmem>>, vector<10x8x512xbf16>,
    %c0_30 = arith.constant 0 : index
    %c8 = arith.constant 8 : index
    %c0_31 = arith.constant 0 : index
    %70 = vector.load %arg12[%c0_30, %c8, %c0_31] : memref<10x16x512xbf16, #tpu.memory_space<vmem>>, vector<10x8x512xbf16>
    tpu.vector_store %arg12[%c0_30, %c8, %c0_31], %68 {strides = array<i32>} : memref<10x16x512xbf16, #tpu.memory_space<vmem>>, vector<10x8x512xbf16>,
    %71 = arith.truncf %64 : vector<8x8x512xf32> to vector<8x8x512xbf16>
    %c1 = arith.constant 1 : index
    %c1_32 = arith.constant 1 : index
    %c0_33 = arith.constant 0 : index
    %72 = vector.load %arg12[%c1, %c1_32, %c0_33] : memref<10x16x512xbf16, #tpu.memory_space<vmem>>, vector<8x8x512xbf16>
    tpu.vector_store %arg12[%c1, %c1_32, %c0_33], %71 {strides = array<i32>} : memref<10x16x512xbf16, #tpu.memory_space<vmem>>, vector<8x8x512xbf16>,
    %cst_34 = arith.constant 0.000000e+00 : f32
    %73 = vector.broadcast %cst_34 : f32 to vector<64x128xf32>
    %c0_35 = arith.constant 0 : index
    %c0_36 = arith.constant 0 : index
    %c384 = arith.constant 384 : index
    %74 = vector.load %arg12[%c0_35, %c0_36, %c384] : memref<10x16x512xbf16, #tpu.memory_space<vmem>>, vector<8x8x128xbf16>
    %75 = vector.shape_cast %74 : vector<8x8x128xbf16> to vector<64x128xbf16>
    %c0_37 = arith.constant 0 : index
    %c0_38 = arith.constant 0 : index
    %76 = vector.load %arg6[%c0_37, %c0_38] : memref<2048x128xbf16, #tpu.memory_space<vmem>>, vector<128x128xbf16>
    %cst_39 = arith.constant dense<0.000000e+00> : vector<64x128xf32>
    %77 = tpu.matmul %75, %76, %cst_39 {dimension_numbers = #tpu.dot_dimension_numbers<[1], [0], [0], [1], [0, 0, 1, 1], [], []>} : vector<64x128xbf16>, vector<128x128xbf16>, vector<64x128xf32> -> vector<64x128xf32>
    %78 = arith.addf %73, %77 : vector<64x128xf32>
    %c0_40 = arith.constant 0 : index
    %c1_41 = arith.constant 1 : index
    %c256 = arith.constant 256 : index
    %79 = vector.load %arg12[%c0_40, %c1_41, %c256] : memref<10x16x512xbf16, #tpu.memory_space<vmem>>, vector<8x8x128xbf16>
    %80 = vector.shape_cast %79 : vector<8x8x128xbf16> to vector<64x128xbf16>
    %c128 = arith.constant 128 : index
    %c0_42 = arith.constant 0 : index
    %81 = vector.load %arg6[%c128, %c0_42] : memref<2048x128xbf16, #tpu.memory_space<vmem>>, vector<128x128xbf16>
    %cst_43 = arith.constant dense<0.000000e+00> : vector<64x128xf32>
    %82 = tpu.matmul %80, %81, %cst_43 {dimension_numbers = #tpu.dot_dimension_numbers<[1], [0], [0], [1], [0, 0, 1, 1], [], []>} : vector<64x128xbf16>, vector<128x128xbf16>, vector<64x128xf32> -> vector<64x128xf32>
    %83 = arith.addf %78, %82 : vector<64x128xf32>
    %c0_44 = arith.constant 0 : index
    %c1_45 = arith.constant 1 : index
    %c384_46 = arith.constant 384 : index
    %84 = vector.load %arg12[%c0_44, %c1_45, %c384_46] : memref<10x16x512xbf16, #tpu.memory_space<vmem>>, vector<8x8x128xbf16>
    %85 = vector.shape_cast %84 : vector<8x8x128xbf16> to vector<64x128xbf16>
    %c256_47 = arith.constant 256 : index
    %c0_48 = arith.constant 0 : index
    %86 = vector.load %arg6[%c256_47, %c0_48] : memref<2048x128xbf16, #tpu.memory_space<vmem>>, vector<128x128xbf16>
    %cst_49 = arith.constant dense<0.000000e+00> : vector<64x128xf32>
    %87 = tpu.matmul %85, %86, %cst_49 {dimension_numbers = #tpu.dot_dimension_numbers<[1], [0], [0], [1], [0, 0, 1, 1], [], []>} : vector<64x128xbf16>, vector<128x128xbf16>, vector<64x128xf32> -> vector<64x128xf32>
    %88 = arith.addf %83, %87 : vector<64x128xf32>
    %c0_50 = arith.constant 0 : index
    %c2 = arith.constant 2 : index
    %c256_51 = arith.constant 256 : index
    %89 = vector.load %arg12[%c0_50, %c2, %c256_51] : memref<10x16x512xbf16, #tpu.memory_space<vmem>>, vector<8x8x128xbf16>
    %90 = vector.shape_cast %89 : vector<8x8x128xbf16> to vector<64x128xbf16>
    %c384_52 = arith.constant 384 : index
    %c0_53 = arith.constant 0 : index
    %91 = vector.load %arg6[%c384_52, %c0_53] : memref<2048x128xbf16, #tpu.memory_space<vmem>>, vector<128x128xbf16>
    %cst_54 = arith.constant dense<0.000000e+00> : vector<64x128xf32>
    %92 = tpu.matmul %90, %91, %cst_54 {dimension_numbers = #tpu.dot_dimension_numbers<[1], [0], [0], [1], [0, 0, 1, 1], [], []>} : vector<64x128xbf16>, vector<128x128xbf16>, vector<64x128xf32> -> vector<64x128xf32>
    %93 = arith.addf %88, %92 : vector<64x128xf32>
    %c1_55 = arith.constant 1 : index
    %c0_56 = arith.constant 0 : index
    %c128_57 = arith.constant 128 : index
    %94 = vector.load %arg12[%c1_55, %c0_56, %c128_57] : memref<10x16x512xbf16, #tpu.memory_space<vmem>>, vector<8x8x128xbf16>
    %95 = vector.shape_cast %94 : vector<8x8x128xbf16> to vector<64x128xbf16>
    %c512 = arith.constant 512 : index
    %c0_58 = arith.constant 0 : index
    %96 = vector.load %arg6[%c512, %c0_58] : memref<2048x128xbf16, #tpu.memory_space<vmem>>, vector<128x128xbf16>
    %cst_59 = arith.constant dense<0.000000e+00> : vector<64x128xf32>
    %97 = tpu.matmul %95, %96, %cst_59 {dimension_numbers = #tpu.dot_dimension_numbers<[1], [0], [0], [1], [0, 0, 1, 1], [], []>} : vector<64x128xbf16>, vector<128x128xbf16>, vector<64x128xf32> -> vector<64x128xf32>
    %98 = arith.addf %93, %97 : vector<64x128xf32>
    %c1_60 = arith.constant 1 : index
    %c1_61 = arith.constant 1 : index
    %c0_62 = arith.constant 0 : index
    %99 = vector.load %arg12[%c1_60, %c1_61, %c0_62] : memref<10x16x512xbf16, #tpu.memory_space<vmem>>, vector<8x8x128xbf16>
    %100 = vector.shape_cast %99 : vector<8x8x128xbf16> to vector<64x128xbf16>
    %c640 = arith.constant 640 : index
    %c0_63 = arith.constant 0 : index
    %101 = vector.load %arg6[%c640, %c0_63] : memref<2048x128xbf16, #tpu.memory_space<vmem>>, vector<128x128xbf16>
    %cst_64 = arith.constant dense<0.000000e+00> : vector<64x128xf32>
    %102 = tpu.matmul %100, %101, %cst_64 {dimension_numbers = #tpu.dot_dimension_numbers<[1], [0], [0], [1], [0, 0, 1, 1], [], []>} : vector<64x128xbf16>, vector<128x128xbf16>, vector<64x128xf32> -> vector<64x128xf32>
    %103 = arith.addf %98, %102 : vector<64x128xf32>
    %c1_65 = arith.constant 1 : index
    %c1_66 = arith.constant 1 : index
    %c128_67 = arith.constant 128 : index
    %104 = vector.load %arg12[%c1_65, %c1_66, %c128_67] : memref<10x16x512xbf16, #tpu.memory_space<vmem>>, vector<8x8x128xbf16>
    %105 = vector.shape_cast %104 : vector<8x8x128xbf16> to vector<64x128xbf16>
    %c768 = arith.constant 768 : index
    %c0_68 = arith.constant 0 : index
    %106 = vector.load %arg6[%c768, %c0_68] : memref<2048x128xbf16, #tpu.memory_space<vmem>>, vector<128x128xbf16>
    %cst_69 = arith.constant dense<0.000000e+00> : vector<64x128xf32>
    %107 = tpu.matmul %105, %106, %cst_69 {dimension_numbers = #tpu.dot_dimension_numbers<[1], [0], [0], [1], [0, 0, 1, 1], [], []>} : vector<64x128xbf16>, vector<128x128xbf16>, vector<64x128xf32> -> vector<64x128xf32>
    %108 = arith.addf %103, %107 : vector<64x128xf32>
    %c1_70 = arith.constant 1 : index
    %c2_71 = arith.constant 2 : index
    %c0_72 = arith.constant 0 : index
    %109 = vector.load %arg12[%c1_70, %c2_71, %c0_72] : memref<10x16x512xbf16, #tpu.memory_space<vmem>>, vector<8x8x128xbf16>
    %110 = vector.shape_cast %109 : vector<8x8x128xbf16> to vector<64x128xbf16>
    %c896 = arith.constant 896 : index
    %c0_73 = arith.constant 0 : index
    %111 = vector.load %arg6[%c896, %c0_73] : memref<2048x128xbf16, #tpu.memory_space<vmem>>, vector<128x128xbf16>
    %cst_74 = arith.constant dense<0.000000e+00> : vector<64x128xf32>
    %112 = tpu.matmul %110, %111, %cst_74 {dimension_numbers = #tpu.dot_dimension_numbers<[1], [0], [0], [1], [0, 0, 1, 1], [], []>} : vector<64x128xbf16>, vector<128x128xbf16>, vector<64x128xf32> -> vector<64x128xf32>
    %113 = arith.addf %108, %112 : vector<64x128xf32>
    %c1_75 = arith.constant 1 : index
    %c0_76 = arith.constant 0 : index
    %c384_77 = arith.constant 384 : index
    %114 = vector.load %arg12[%c1_75, %c0_76, %c384_77] : memref<10x16x512xbf16, #tpu.memory_space<vmem>>, vector<8x8x128xbf16>
    %115 = vector.shape_cast %114 : vector<8x8x128xbf16> to vector<64x128xbf16>
    %c1024 = arith.constant 1024 : index
    %c0_78 = arith.constant 0 : index
    %116 = vector.load %arg6[%c1024, %c0_78] : memref<2048x128xbf16, #tpu.memory_space<vmem>>, vector<128x128xbf16>
    %cst_79 = arith.constant dense<0.000000e+00> : vector<64x128xf32>
    %117 = tpu.matmul %115, %116, %cst_79 {dimension_numbers = #tpu.dot_dimension_numbers<[1], [0], [0], [1], [0, 0, 1, 1], [], []>} : vector<64x128xbf16>, vector<128x128xbf16>, vector<64x128xf32> -> vector<64x128xf32>
    %118 = arith.addf %113, %117 : vector<64x128xf32>
    %c1_80 = arith.constant 1 : index
    %c1_81 = arith.constant 1 : index
    %c256_82 = arith.constant 256 : index
    %119 = vector.load %arg12[%c1_80, %c1_81, %c256_82] : memref<10x16x512xbf16, #tpu.memory_space<vmem>>, vector<8x8x128xbf16>
    %120 = vector.shape_cast %119 : vector<8x8x128xbf16> to vector<64x128xbf16>
    %c1152 = arith.constant 1152 : index
    %c0_83 = arith.constant 0 : index
    %121 = vector.load %arg6[%c1152, %c0_83] : memref<2048x128xbf16, #tpu.memory_space<vmem>>, vector<128x128xbf16>
    %cst_84 = arith.constant dense<0.000000e+00> : vector<64x128xf32>
    %122 = tpu.matmul %120, %121, %cst_84 {dimension_numbers = #tpu.dot_dimension_numbers<[1], [0], [0], [1], [0, 0, 1, 1], [], []>} : vector<64x128xbf16>, vector<128x128xbf16>, vector<64x128xf32> -> vector<64x128xf32>
    %123 = arith.addf %118, %122 : vector<64x128xf32>
    %c1_85 = arith.constant 1 : index
    %c1_86 = arith.constant 1 : index
    %c384_87 = arith.constant 384 : index
    %124 = vector.load %arg12[%c1_85, %c1_86, %c384_87] : memref<10x16x512xbf16, #tpu.memory_space<vmem>>, vector<8x8x128xbf16>
    %125 = vector.shape_cast %124 : vector<8x8x128xbf16> to vector<64x128xbf16>
    %c1280 = arith.constant 1280 : index
    %c0_88 = arith.constant 0 : index
    %126 = vector.load %arg6[%c1280, %c0_88] : memref<2048x128xbf16, #tpu.memory_space<vmem>>, vector<128x128xbf16>
    %cst_89 = arith.constant dense<0.000000e+00> : vector<64x128xf32>
    %127 = tpu.matmul %125, %126, %cst_89 {dimension_numbers = #tpu.dot_dimension_numbers<[1], [0], [0], [1], [0, 0, 1, 1], [], []>} : vector<64x128xbf16>, vector<128x128xbf16>, vector<64x128xf32> -> vector<64x128xf32>
    %128 = arith.addf %123, %127 : vector<64x128xf32>
    %c1_90 = arith.constant 1 : index
    %c2_91 = arith.constant 2 : index
    %c256_92 = arith.constant 256 : index
    %129 = vector.load %arg12[%c1_90, %c2_91, %c256_92] : memref<10x16x512xbf16, #tpu.memory_space<vmem>>, vector<8x8x128xbf16>
    %130 = vector.shape_cast %129 : vector<8x8x128xbf16> to vector<64x128xbf16>
    %c1408 = arith.constant 1408 : index
    %c0_93 = arith.constant 0 : index
    %131 = vector.load %arg6[%c1408, %c0_93] : memref<2048x128xbf16, #tpu.memory_space<vmem>>, vector<128x128xbf16>
    %cst_94 = arith.constant dense<0.000000e+00> : vector<64x128xf32>
    %132 = tpu.matmul %130, %131, %cst_94 {dimension_numbers = #tpu.dot_dimension_numbers<[1], [0], [0], [1], [0, 0, 1, 1], [], []>} : vector<64x128xbf16>, vector<128x128xbf16>, vector<64x128xf32> -> vector<64x128xf32>
    %133 = arith.addf %128, %132 : vector<64x128xf32>
    %c2_95 = arith.constant 2 : index
    %c0_96 = arith.constant 0 : index
    %c128_97 = arith.constant 128 : index
    %134 = vector.load %arg12[%c2_95, %c0_96, %c128_97] : memref<10x16x512xbf16, #tpu.memory_space<vmem>>, vector<8x8x128xbf16>
    %135 = vector.shape_cast %134 : vector<8x8x128xbf16> to vector<64x128xbf16>
    %c1536 = arith.constant 1536 : index
    %c0_98 = arith.constant 0 : index
    %136 = vector.load %arg6[%c1536, %c0_98] : memref<2048x128xbf16, #tpu.memory_space<vmem>>, vector<128x128xbf16>
    %cst_99 = arith.constant dense<0.000000e+00> : vector<64x128xf32>
    %137 = tpu.matmul %135, %136, %cst_99 {dimension_numbers = #tpu.dot_dimension_numbers<[1], [0], [0], [1], [0, 0, 1, 1], [], []>} : vector<64x128xbf16>, vector<128x128xbf16>, vector<64x128xf32> -> vector<64x128xf32>
    %138 = arith.addf %133, %137 : vector<64x128xf32>
    %c2_100 = arith.constant 2 : index
    %c1_101 = arith.constant 1 : index
    %c0_102 = arith.constant 0 : index
    %139 = vector.load %arg12[%c2_100, %c1_101, %c0_102] : memref<10x16x512xbf16, #tpu.memory_space<vmem>>, vector<8x8x128xbf16>
    %140 = vector.shape_cast %139 : vector<8x8x128xbf16> to vector<64x128xbf16>
    %c1664 = arith.constant 1664 : index
    %c0_103 = arith.constant 0 : index
    %141 = vector.load %arg6[%c1664, %c0_103] : memref<2048x128xbf16, #tpu.memory_space<vmem>>, vector<128x128xbf16>
    %cst_104 = arith.constant dense<0.000000e+00> : vector<64x128xf32>
    %142 = tpu.matmul %140, %141, %cst_104 {dimension_numbers = #tpu.dot_dimension_numbers<[1], [0], [0], [1], [0, 0, 1, 1], [], []>} : vector<64x128xbf16>, vector<128x128xbf16>, vector<64x128xf32> -> vector<64x128xf32>
    %143 = arith.addf %138, %142 : vector<64x128xf32>
    %c2_105 = arith.constant 2 : index
    %c1_106 = arith.constant 1 : index
    %c128_107 = arith.constant 128 : index
    %144 = vector.load %arg12[%c2_105, %c1_106, %c128_107] : memref<10x16x512xbf16, #tpu.memory_space<vmem>>, vector<8x8x128xbf16>
    %145 = vector.shape_cast %144 : vector<8x8x128xbf16> to vector<64x128xbf16>
    %c1792 = arith.constant 1792 : index
    %c0_108 = arith.constant 0 : index
    %146 = vector.load %arg6[%c1792, %c0_108] : memref<2048x128xbf16, #tpu.memory_space<vmem>>, vector<128x128xbf16>
    %cst_109 = arith.constant dense<0.000000e+00> : vector<64x128xf32>
    %147 = tpu.matmul %145, %146, %cst_109 {dimension_numbers = #tpu.dot_dimension_numbers<[1], [0], [0], [1], [0, 0, 1, 1], [], []>} : vector<64x128xbf16>, vector<128x128xbf16>, vector<64x128xf32> -> vector<64x128xf32>
    %148 = arith.addf %143, %147 : vector<64x128xf32>
    %c2_110 = arith.constant 2 : index
    %c2_111 = arith.constant 2 : index
    %c0_112 = arith.constant 0 : index
    %149 = vector.load %arg12[%c2_110, %c2_111, %c0_112] : memref<10x16x512xbf16, #tpu.memory_space<vmem>>, vector<8x8x128xbf16>
    %150 = vector.shape_cast %149 : vector<8x8x128xbf16> to vector<64x128xbf16>
    %c1920 = arith.constant 1920 : index
    %c0_113 = arith.constant 0 : index
    %151 = vector.load %arg6[%c1920, %c0_113] : memref<2048x128xbf16, #tpu.memory_space<vmem>>, vector<128x128xbf16>
    %cst_114 = arith.constant dense<0.000000e+00> : vector<64x128xf32>
    %152 = tpu.matmul %150, %151, %cst_114 {dimension_numbers = #tpu.dot_dimension_numbers<[1], [0], [0], [1], [0, 0, 1, 1], [], []>} : vector<64x128xbf16>, vector<128x128xbf16>, vector<64x128xf32> -> vector<64x128xf32>
    %153 = arith.addf %148, %152 : vector<64x128xf32>
    %c0_115 = arith.constant 0 : index
    %c0_116 = arith.constant 0 : index
    %154 = vector.load %arg7[%c0_115, %c0_116] : memref<1x128xf32, #tpu.memory_space<vmem>>, vector<1x128xf32>
    %155 = vector.broadcast %154 : vector<1x128xf32> to vector<64x128xf32>
    %156 = arith.addf %153, %155 : vector<64x128xf32>
    %cst_117 = arith.constant dense<0.000000e+00> : vector<128xf32>
    %157 = vector.multi_reduction <add>, %156, %cst_117 [0] : vector<64x128xf32> to vector<128xf32>
    %158 = vector.shape_cast %157 : vector<128xf32> to vector<1x128xf32>
    %cst_118 = arith.constant 6.400000e+01 : f32
    %159 = vector.broadcast %cst_118 : f32 to vector<1x128xf32>
    %160 = arith.divf %158, %159 : vector<1x128xf32>
    %161 = vector.broadcast %160 : vector<1x128xf32> to vector<64x128xf32>
    %162 = arith.subf %156, %161 : vector<64x128xf32>
    %163 = arith.mulf %162, %162 : vector<64x128xf32>
    %cst_119 = arith.constant dense<0.000000e+00> : vector<128xf32>
    %164 = vector.multi_reduction <add>, %163, %cst_119 [0] : vector<64x128xf32> to vector<128xf32>
    %165 = vector.shape_cast %164 : vector<128xf32> to vector<1x128xf32>
    %cst_120 = arith.constant 6.400000e+01 : f32
    %166 = vector.broadcast %cst_120 : f32 to vector<1x128xf32>
    %167 = arith.divf %165, %166 : vector<1x128xf32>
    %cst_121 = arith.constant 9.99999974E-6 : f32
    %168 = vector.broadcast %cst_121 : f32 to vector<1x128xf32>
    %169 = arith.addf %167, %168 : vector<1x128xf32>
    %170 = math.rsqrt %169 : vector<1x128xf32>
    %c0_122 = arith.constant 0 : index
    %c0_123 = arith.constant 0 : index
    %171 = vector.load %arg4[%c0_122, %c0_123] : memref<1x128xf32, #tpu.memory_space<vmem>>, vector<1x128xf32>
    %172 = arith.mulf %170, %171 : vector<1x128xf32>
    %c0_124 = arith.constant 0 : index
    %c0_125 = arith.constant 0 : index
    %173 = vector.load %arg5[%c0_124, %c0_125] : memref<1x128xf32, #tpu.memory_space<vmem>>, vector<1x128xf32>
    %174 = arith.mulf %160, %172 : vector<1x128xf32>
    %175 = arith.subf %173, %174 : vector<1x128xf32>
    %176 = vector.broadcast %172 : vector<1x128xf32> to vector<64x128xf32>
    %177 = arith.mulf %156, %176 : vector<64x128xf32>
    %178 = vector.broadcast %175 : vector<1x128xf32> to vector<64x128xf32>
    %179 = arith.addf %177, %178 : vector<64x128xf32>
    %cst_126 = arith.constant 0.000000e+00 : f32
    %180 = vector.broadcast %cst_126 : f32 to vector<64x128xf32>
    %181 = arith.cmpf oge, %179, %180 : vector<64x128xf32>
    %cst_127 = arith.constant 2.000000e-01 : f32
    %182 = vector.broadcast %cst_127 : f32 to vector<64x128xf32>
    %183 = arith.mulf %182, %179 : vector<64x128xf32>
    %184 = arith.select %181, %179, %183 : vector<64x128xi1>, vector<64x128xf32>
    %cst_128 = arith.constant 0.000000e+00 : bf16
    %185 = vector.broadcast %cst_128 : bf16 to vector<1x16x128xbf16>
    %c0_129 = arith.constant 0 : index
    %c0_130 = arith.constant 0 : index
    %c0_131 = arith.constant 0 : index
    %186 = vector.load %arg13[%c0_129, %c0_130, %c0_131] : memref<10x16x128xbf16, #tpu.memory_space<vmem>>, vector<1x16x128xbf16>
    tpu.vector_store %arg13[%c0_129, %c0_130, %c0_131], %185 {strides = array<i32>} : memref<10x16x128xbf16, #tpu.memory_space<vmem>>, vector<1x16x128xbf16>,
    %c9_132 = arith.constant 9 : index
    %c0_133 = arith.constant 0 : index
    %c0_134 = arith.constant 0 : index
    %187 = vector.load %arg13[%c9_132, %c0_133, %c0_134] : memref<10x16x128xbf16, #tpu.memory_space<vmem>>, vector<1x16x128xbf16>
    tpu.vector_store %arg13[%c9_132, %c0_133, %c0_134], %185 {strides = array<i32>} : memref<10x16x128xbf16, #tpu.memory_space<vmem>>, vector<1x16x128xbf16>,
    %cst_135 = arith.constant 0.000000e+00 : bf16
    %188 = vector.broadcast %cst_135 : bf16 to vector<10x8x128xbf16>
    %c0_136 = arith.constant 0 : index
    %c0_137 = arith.constant 0 : index
    %c0_138 = arith.constant 0 : index
    %189 = vector.load %arg13[%c0_136, %c0_137, %c0_138] : memref<10x16x128xbf16, #tpu.memory_space<vmem>>, vector<10x8x128xbf16>
    tpu.vector_store %arg13[%c0_136, %c0_137, %c0_138], %188 {strides = array<i32>} : memref<10x16x128xbf16, #tpu.memory_space<vmem>>, vector<10x8x128xbf16>,
    %c0_139 = arith.constant 0 : index
    %c8_140 = arith.constant 8 : index
    %c0_141 = arith.constant 0 : index
    %190 = vector.load %arg13[%c0_139, %c8_140, %c0_141] : memref<10x16x128xbf16, #tpu.memory_space<vmem>>, vector<10x8x128xbf16>
    tpu.vector_store %arg13[%c0_139, %c8_140, %c0_141], %188 {strides = array<i32>} : memref<10x16x128xbf16, #tpu.memory_space<vmem>>, vector<10x8x128xbf16>,
    %191 = vector.shape_cast %184 : vector<64x128xf32> to vector<8x8x128xf32>
    %192 = arith.truncf %191 : vector<8x8x128xf32> to vector<8x8x128xbf16>
    %c1_142 = arith.constant 1 : index
    %c1_143 = arith.constant 1 : index
    %c0_144 = arith.constant 0 : index
    %193 = vector.load %arg13[%c1_142, %c1_143, %c0_144] : memref<10x16x128xbf16, #tpu.memory_space<vmem>>, vector<8x8x128xbf16>
    tpu.vector_store %arg13[%c1_142, %c1_143, %c0_144], %192 {strides = array<i32>} : memref<10x16x128xbf16, #tpu.memory_space<vmem>>, vector<8x8x128xbf16>,
    %c0_145 = arith.constant 0 : index
    %c0_146 = arith.constant 0 : index
    %c0_147 = arith.constant 0 : index
    %194 = vector.load %arg13[%c0_145, %c0_146, %c0_147] : memref<10x16x128xbf16, #tpu.memory_space<vmem>>, vector<8x8x128xbf16>
    %195 = vector.shape_cast %194 : vector<8x8x128xbf16> to vector<64x128xbf16>
    %c0_148 = arith.constant 0 : index
    %c0_149 = arith.constant 0 : index
    %196 = vector.load %arg8[%c0_148, %c0_149] : memref<1152x128xbf16, #tpu.memory_space<vmem>>, vector<128x128xbf16>
    %cst_150 = arith.constant dense<0.000000e+00> : vector<64x128xf32>
    %197 = tpu.matmul %195, %196, %cst_150 {dimension_numbers = #tpu.dot_dimension_numbers<[1], [0], [0], [1], [0, 0, 1, 1], [], []>} : vector<64x128xbf16>, vector<128x128xbf16>, vector<64x128xf32> -> vector<64x128xf32>
    %198 = arith.addf %12, %197 : vector<64x128xf32>
    %c0_151 = arith.constant 0 : index
    %c1_152 = arith.constant 1 : index
    %c0_153 = arith.constant 0 : index
    %199 = vector.load %arg13[%c0_151, %c1_152, %c0_153] : memref<10x16x128xbf16, #tpu.memory_space<vmem>>, vector<8x8x128xbf16>
    %200 = vector.shape_cast %199 : vector<8x8x128xbf16> to vector<64x128xbf16>
    %c128_154 = arith.constant 128 : index
    %c0_155 = arith.constant 0 : index
    %201 = vector.load %arg8[%c128_154, %c0_155] : memref<1152x128xbf16, #tpu.memory_space<vmem>>, vector<128x128xbf16>
    %cst_156 = arith.constant dense<0.000000e+00> : vector<64x128xf32>
    %202 = tpu.matmul %200, %201, %cst_156 {dimension_numbers = #tpu.dot_dimension_numbers<[1], [0], [0], [1], [0, 0, 1, 1], [], []>} : vector<64x128xbf16>, vector<128x128xbf16>, vector<64x128xf32> -> vector<64x128xf32>
    %203 = arith.addf %198, %202 : vector<64x128xf32>
    %c0_157 = arith.constant 0 : index
    %c2_158 = arith.constant 2 : index
    %c0_159 = arith.constant 0 : index
    %204 = vector.load %arg13[%c0_157, %c2_158, %c0_159] : memref<10x16x128xbf16, #tpu.memory_space<vmem>>, vector<8x8x128xbf16>
    %205 = vector.shape_cast %204 : vector<8x8x128xbf16> to vector<64x128xbf16>
    %c256_160 = arith.constant 256 : index
    %c0_161 = arith.constant 0 : index
    %206 = vector.load %arg8[%c256_160, %c0_161] : memref<1152x128xbf16, #tpu.memory_space<vmem>>, vector<128x128xbf16>
    %cst_162 = arith.constant dense<0.000000e+00> : vector<64x128xf32>
    %207 = tpu.matmul %205, %206, %cst_162 {dimension_numbers = #tpu.dot_dimension_numbers<[1], [0], [0], [1], [0, 0, 1, 1], [], []>} : vector<64x128xbf16>, vector<128x128xbf16>, vector<64x128xf32> -> vector<64x128xf32>
    %208 = arith.addf %203, %207 : vector<64x128xf32>
    %c1_163 = arith.constant 1 : index
    %c0_164 = arith.constant 0 : index
    %c0_165 = arith.constant 0 : index
    %209 = vector.load %arg13[%c1_163, %c0_164, %c0_165] : memref<10x16x128xbf16, #tpu.memory_space<vmem>>, vector<8x8x128xbf16>
    %210 = vector.shape_cast %209 : vector<8x8x128xbf16> to vector<64x128xbf16>
    %c384_166 = arith.constant 384 : index
    %c0_167 = arith.constant 0 : index
    %211 = vector.load %arg8[%c384_166, %c0_167] : memref<1152x128xbf16, #tpu.memory_space<vmem>>, vector<128x128xbf16>
    %cst_168 = arith.constant dense<0.000000e+00> : vector<64x128xf32>
    %212 = tpu.matmul %210, %211, %cst_168 {dimension_numbers = #tpu.dot_dimension_numbers<[1], [0], [0], [1], [0, 0, 1, 1], [], []>} : vector<64x128xbf16>, vector<128x128xbf16>, vector<64x128xf32> -> vector<64x128xf32>
    %213 = arith.addf %208, %212 : vector<64x128xf32>
    %c1_169 = arith.constant 1 : index
    %c1_170 = arith.constant 1 : index
    %c0_171 = arith.constant 0 : index
    %214 = vector.load %arg13[%c1_169, %c1_170, %c0_171] : memref<10x16x128xbf16, #tpu.memory_space<vmem>>, vector<8x8x128xbf16>
    %215 = vector.shape_cast %214 : vector<8x8x128xbf16> to vector<64x128xbf16>
    %c512_172 = arith.constant 512 : index
    %c0_173 = arith.constant 0 : index
    %216 = vector.load %arg8[%c512_172, %c0_173] : memref<1152x128xbf16, #tpu.memory_space<vmem>>, vector<128x128xbf16>
    %cst_174 = arith.constant dense<0.000000e+00> : vector<64x128xf32>
    %217 = tpu.matmul %215, %216, %cst_174 {dimension_numbers = #tpu.dot_dimension_numbers<[1], [0], [0], [1], [0, 0, 1, 1], [], []>} : vector<64x128xbf16>, vector<128x128xbf16>, vector<64x128xf32> -> vector<64x128xf32>
    %218 = arith.addf %213, %217 : vector<64x128xf32>
    %c1_175 = arith.constant 1 : index
    %c2_176 = arith.constant 2 : index
    %c0_177 = arith.constant 0 : index
    %219 = vector.load %arg13[%c1_175, %c2_176, %c0_177] : memref<10x16x128xbf16, #tpu.memory_space<vmem>>, vector<8x8x128xbf16>
    %220 = vector.shape_cast %219 : vector<8x8x128xbf16> to vector<64x128xbf16>
    %c640_178 = arith.constant 640 : index
    %c0_179 = arith.constant 0 : index
    %221 = vector.load %arg8[%c640_178, %c0_179] : memref<1152x128xbf16, #tpu.memory_space<vmem>>, vector<128x128xbf16>
    %cst_180 = arith.constant dense<0.000000e+00> : vector<64x128xf32>
    %222 = tpu.matmul %220, %221, %cst_180 {dimension_numbers = #tpu.dot_dimension_numbers<[1], [0], [0], [1], [0, 0, 1, 1], [], []>} : vector<64x128xbf16>, vector<128x128xbf16>, vector<64x128xf32> -> vector<64x128xf32>
    %223 = arith.addf %218, %222 : vector<64x128xf32>
    %c2_181 = arith.constant 2 : index
    %c0_182 = arith.constant 0 : index
    %c0_183 = arith.constant 0 : index
    %224 = vector.load %arg13[%c2_181, %c0_182, %c0_183] : memref<10x16x128xbf16, #tpu.memory_space<vmem>>, vector<8x8x128xbf16>
    %225 = vector.shape_cast %224 : vector<8x8x128xbf16> to vector<64x128xbf16>
    %c768_184 = arith.constant 768 : index
    %c0_185 = arith.constant 0 : index
    %226 = vector.load %arg8[%c768_184, %c0_185] : memref<1152x128xbf16, #tpu.memory_space<vmem>>, vector<128x128xbf16>
    %cst_186 = arith.constant dense<0.000000e+00> : vector<64x128xf32>
    %227 = tpu.matmul %225, %226, %cst_186 {dimension_numbers = #tpu.dot_dimension_numbers<[1], [0], [0], [1], [0, 0, 1, 1], [], []>} : vector<64x128xbf16>, vector<128x128xbf16>, vector<64x128xf32> -> vector<64x128xf32>
    %228 = arith.addf %223, %227 : vector<64x128xf32>
    %c2_187 = arith.constant 2 : index
    %c1_188 = arith.constant 1 : index
    %c0_189 = arith.constant 0 : index
    %229 = vector.load %arg13[%c2_187, %c1_188, %c0_189] : memref<10x16x128xbf16, #tpu.memory_space<vmem>>, vector<8x8x128xbf16>
    %230 = vector.shape_cast %229 : vector<8x8x128xbf16> to vector<64x128xbf16>
    %c896_190 = arith.constant 896 : index
    %c0_191 = arith.constant 0 : index
    %231 = vector.load %arg8[%c896_190, %c0_191] : memref<1152x128xbf16, #tpu.memory_space<vmem>>, vector<128x128xbf16>
    %cst_192 = arith.constant dense<0.000000e+00> : vector<64x128xf32>
    %232 = tpu.matmul %230, %231, %cst_192 {dimension_numbers = #tpu.dot_dimension_numbers<[1], [0], [0], [1], [0, 0, 1, 1], [], []>} : vector<64x128xbf16>, vector<128x128xbf16>, vector<64x128xf32> -> vector<64x128xf32>
    %233 = arith.addf %228, %232 : vector<64x128xf32>
    %c2_193 = arith.constant 2 : index
    %c2_194 = arith.constant 2 : index
    %c0_195 = arith.constant 0 : index
    %234 = vector.load %arg13[%c2_193, %c2_194, %c0_195] : memref<10x16x128xbf16, #tpu.memory_space<vmem>>, vector<8x8x128xbf16>
    %235 = vector.shape_cast %234 : vector<8x8x128xbf16> to vector<64x128xbf16>
    %c1024_196 = arith.constant 1024 : index
    %c0_197 = arith.constant 0 : index
    %236 = vector.load %arg8[%c1024_196, %c0_197] : memref<1152x128xbf16, #tpu.memory_space<vmem>>, vector<128x128xbf16>
    %cst_198 = arith.constant dense<0.000000e+00> : vector<64x128xf32>
    %237 = tpu.matmul %235, %236, %cst_198 {dimension_numbers = #tpu.dot_dimension_numbers<[1], [0], [0], [1], [0, 0, 1, 1], [], []>} : vector<64x128xbf16>, vector<128x128xbf16>, vector<64x128xf32> -> vector<64x128xf32>
    %238 = arith.addf %233, %237 : vector<64x128xf32>
    %c0_199 = arith.constant 0 : index
    %c0_200 = arith.constant 0 : index
    %239 = vector.load %arg9[%c0_199, %c0_200] : memref<1x128xf32, #tpu.memory_space<vmem>>, vector<1x128xf32>
    %240 = vector.broadcast %239 : vector<1x128xf32> to vector<64x128xf32>
    %241 = arith.addf %238, %240 : vector<64x128xf32>
    %c0_201 = arith.constant 0 : index
    %c0_202 = arith.constant 0 : index
    %c0_203 = arith.constant 0 : index
    %242 = vector.load %arg11[%c0_201, %c0_202, %c0_203] : memref<1x64x128xf32, #tpu.memory_space<vmem>>, vector<1x64x128xf32>
    %243 = vector.shape_cast %242 : vector<1x64x128xf32> to vector<64x128xf32>
    %244 = vector.shape_cast %241 : vector<64x128xf32> to vector<1x64x128xf32>
    tpu.vector_store %arg11[%c0_201, %c0_202, %c0_203], %244 {strides = array<i32>} : memref<1x64x128xf32, #tpu.memory_space<vmem>>, vector<1x64x128xf32>,
    return
  }
  func.func @transform_0(%arg0: i32) -> (i32, i32, i32, i32) {
    %c0_i32 = arith.constant 0 : i32
    %c0_i32_0 = arith.constant 0 : i32
    %c0_i32_1 = arith.constant 0 : i32
    %c0_i32_2 = arith.constant 0 : i32
    return %arg0, %c0_i32, %c0_i32_0, %c0_i32_1 : i32, i32, i32, i32
  }
  func.func @transform_1(%arg0: i32) -> (i32, i32) {
    %c0_i32 = arith.constant 0 : i32
    %c0_i32_0 = arith.constant 0 : i32
    %c0_i32_1 = arith.constant 0 : i32
    return %c0_i32, %c0_i32_0 : i32, i32
  }
  func.func @transform_2(%arg0: i32) -> (i32, i32) {
    %c0_i32 = arith.constant 0 : i32
    %c0_i32_0 = arith.constant 0 : i32
    %c0_i32_1 = arith.constant 0 : i32
    return %c0_i32, %c0_i32_0 : i32, i32
  }
  func.func @transform_3(%arg0: i32) -> (i32, i32) {
    %c0_i32 = arith.constant 0 : i32
    %c0_i32_0 = arith.constant 0 : i32
    %c0_i32_1 = arith.constant 0 : i32
    return %c0_i32, %c0_i32_0 : i32, i32
  }
  func.func @transform_4(%arg0: i32) -> (i32, i32) {
    %c0_i32 = arith.constant 0 : i32
    %c0_i32_0 = arith.constant 0 : i32
    %c0_i32_1 = arith.constant 0 : i32
    return %c0_i32, %c0_i32_0 : i32, i32
  }
  func.func @transform_5(%arg0: i32) -> (i32, i32) {
    %c0_i32 = arith.constant 0 : i32
    %c0_i32_0 = arith.constant 0 : i32
    %c0_i32_1 = arith.constant 0 : i32
    return %c0_i32, %c0_i32_0 : i32, i32
  }
  func.func @transform_6(%arg0: i32) -> (i32, i32) {
    %c0_i32 = arith.constant 0 : i32
    %c0_i32_0 = arith.constant 0 : i32
    %c0_i32_1 = arith.constant 0 : i32
    return %c0_i32, %c0_i32_0 : i32, i32
  }
  func.func @transform_7(%arg0: i32) -> (i32, i32) {
    %c0_i32 = arith.constant 0 : i32
    %c0_i32_0 = arith.constant 0 : i32
    %c0_i32_1 = arith.constant 0 : i32
    return %c0_i32, %c0_i32_0 : i32, i32
  }
  func.func @transform_8(%arg0: i32) -> (i32, i32) {
    %c0_i32 = arith.constant 0 : i32
    %c0_i32_0 = arith.constant 0 : i32
    %c0_i32_1 = arith.constant 0 : i32
    return %c0_i32, %c0_i32_0 : i32, i32
  }
  func.func @transform_9(%arg0: i32) -> (i32, i32) {
    %c0_i32 = arith.constant 0 : i32
    %c0_i32_0 = arith.constant 0 : i32
    %c0_i32_1 = arith.constant 0 : i32
    return %c0_i32, %c0_i32_0 : i32, i32
  }
  func.func @transform_10(%arg0: i32) -> (i32, i32, i32) {
    %c0_i32 = arith.constant 0 : i32
    %c0_i32_0 = arith.constant 0 : i32
    %c0_i32_1 = arith.constant 0 : i32
    return %arg0, %c0_i32, %c0_i32_0 : i32, i32, i32
  }
}

</mosaic_0001>

<bundles_post_ra>
// kernel: tpu_custom_call.1
= control target key start
LH: loop header
LB: loop body
LE: loop exit
PB: predicated region body
PF: predicated region fallthrough
CT: control target
= control target key end

     0   :  { %s10145_s0 = inlined_call_operand.hbm [shape: f32[2,8,8,512], index: 0, kind: input, shape index: {}]   ;;  %s10146_s1 = inlined_call_operand.hbm [shape: f32[1,128], index: 1, kind: input, shape index: {}]   ;;  %s10147_s2 = inlined_call_operand.vmem [shape: f32[1,128], index: 2, kind: input, shape index: {}]   ;;  %s10148_s3 = inlined_call_operand.vmem [shape: f32[1,128], index: 3, kind: input, shape index: {}]   ;;  %s10149_s4 = inlined_call_operand.vmem [shape: f32[1,128], index: 4, kind: input, shape index: {}]   ;;  %s10150_s5 = inlined_call_operand.hbm [shape: bf16[2048,128], index: 5, kind: input, shape index: {}]   ;;  %s10151_s6 = inlined_call_operand.vmem [shape: f32[1,128], index: 6, kind: input, shape index: {}]   ;;  %s10152_s7 = inlined_call_operand.hbm [shape: bf16[1152,128], index: 7, kind: input, shape index: {}]   ;;  %s10153_s8 = inlined_call_operand.vmem [shape: f32[1,128], index: 8, kind: input, shape index: {}]   ;;  %s10154_s9 = inlined_call_operand.hbm [shape: bf16[128,128], index: 9, kind: input, shape index: {}]   ;;  %s10155_s10 = inlined_call_operand.hbm [shape: f32[2,64,128], index: 10, kind: output, shape index: {}]  }
   0x1   :  { %10172 = sst [smem:[#allocation33_spill]] %s10146_s1 }
   0x2   :  { %10173 = sst [smem:[#allocation34_spill]] %s10150_s5 }
   0x3   :  { %10174 = sst [smem:[#allocation35_spill]] %s10152_s7 }
   0x4   :  { %10175 = sst [smem:[#allocation36_spill]] %s10154_s9 }
   0x5   :  { %15 = vsyncpa [#allocation5], 0 }
   0x6   :  { %17 = vsyncpa [#allocation5 + $0x1], 0 }
   0x7   :  { %18 = vsyncpa [#allocation8], 0 }
   0x8   :  { %19 = vsyncpa [#allocation11], 0 }
   0x9   :  { %20 = vsyncpa [#allocation6], 0 }
   0xa   :  { %22 = vsyncpa [#allocation6 + $0x1], 0  ;;  %s8190_s13 = smov 0   ;;  %s8192_s14 = smov 0  }
   0xb   :  { %s8194_s15 = smov 0   ;;  %s8196_s16 = smov 0  }
   0xc LB: > { %s8211_s17 = sadd.s32 4294967295, %s8121_s16   ;;  %s6500_s18 = sadd.s32 4294967294, %s8121_s16   ;;  %s8121_s16 = sphi %s8196_s16, %s10240_s16   ;;  %s8117_s15 = sphi %s8194_s15, %s10239_s15   ;;  %s8113_s14 = sphi %s8192_s14, %s10238_s14   ;;  %s8109_s13 = sphi %s8190_s13, %s10237_s13  }
   0xd   : > { %p48_p0 = scmp.ne.s32.totalorder %s8113_s14, %s8109_s13  ;;  %p49_p1 = scmp.eq.s32.totalorder %s8211_s17, 0 }
   0xe   : > { %p261_p2 = scmp.eq.s32.totalorder %s8211_s17, 1  ;;  %p267_p3 = scmp.eq.s32.totalorder %s6500_s18, 1 }
   0xf   : > { %p8220_p4 = por %p49_p1, %p48_p0  ;;  %p6501_p5 = scmp.ge.s32.totalorder %s8121_s16, 1 }
  0x10   : > { %p8225_p6 = por %p267_p3, %p48_p0  ;;  %p274_p7 = scmp.lt.s32.totalorder %s8121_s16, 3 }
  0x11   : > { %s10178_s1 = sld [smem:[#allocation33_spill]]  ;;  %s8123_s25 = smov [#allocation7]  }
  0x12   : > { %p8233_p8 = pnand %p6501_p5, %p274_p7  ;;  %s288_s26 = sshll.u32 %s8123_s25, 4  ;;  %s289_s26 = int_to_ptr.vmem [resolvable:$true] %s288_s26 }
  0x13   : > { %s10181_s7 = sld [smem:[#allocation35_spill]]  ;;  %s8124_s11 = smov [#allocation10]  }
  0x14   : > { %p7796_p10 = pneg %p8233_p8  ;;  %s325_s12 = sshll.u32 %s8124_s11, 4  ;;  %s326_s12 = int_to_ptr.vmem [resolvable:$true] %s325_s12 }
  0x15   : > { %s10182_s5 = sld [smem:[#allocation34_spill]]  ;;  %s8125_s25 = smov 64  }
  0x16   : > { %p8242_p11 = pnand %p7796_p10, %p49_p1  ;;  %s8126_s28 = smov 4  }
  0x17   : > { %s286_s23 = sshll.u32 %s10178_s1, 4  ;;  %s10183_s9 = sld [smem:[#allocation36_spill]]  ;;  %s287_s23 = int_to_ptr.hbm [resolvable:$true] %s286_s23 }
  0x18   : > { %7799 = dma.hbm_to_vmem [thread:$0]  (!%p8242_p11), %s287_s23, 16, %s289_s26, [#allocation8]  }
  0x19   : > { %s323_s30 = sshll.u32 %s10181_s7, 4  ;;  %s8127_s11 = smov [#allocation9]   ;;  %s324_s30 = int_to_ptr.hbm [resolvable:$true] %s323_s30 }
  0x1a   : > { %7805 = dma.hbm_to_vmem [thread:$0]  (!%p8242_p11), %s324_s30, 9216, %s326_s12, [#allocation11], %s8125_s25, %s8125_s25, %s8126_s28  }
  0x1b   : > { %s306_s22 = sshll.u32 %s10182_s5, 4  ;;  %s308_s18 = sshll.u32 %s8127_s11, 4  ;;  %s307_s22 = int_to_ptr.hbm [resolvable:$true] %s306_s22  ;;  %s309_s18 = int_to_ptr.vmem [resolvable:$true] %s308_s18 }
  0x1c   : > { %7802 = dma.hbm_to_vmem [thread:$0]  (!%p8242_p11), %s307_s22, 16384, %s309_s18, [#allocation8], %s8125_s25, %s8125_s25, %s8126_s28  }
  0x1d   : > { %s340_s26 = sshll.u32 %s10183_s9, 4  ;;  %s8128_s21 = smov [#allocation12]   ;;  %s341_s26 = int_to_ptr.hbm [resolvable:$true] %s340_s26 }
  0x1e   : > { %s342_s1 = sshll.u32 %s8128_s21, 4  ;;  %s8264_s30 = sadd.s32 1, %s8121_s16   ;;  %s343_s1 = int_to_ptr.vmem [resolvable:$true] %s342_s1 }
  0x1f   : > { %7808 = dma.hbm_to_vmem [thread:$0]  (!%p8242_p11), %s341_s26, 1024, %s343_s1, [#allocation11], %s8125_s25, %s8125_s25, %s8126_s28  }
  0x20   : > { %s35_s12 = sadd.s32 1, %s8117_s15  ;;  %s32_s29 = ssub.s32 %s8121_s16, %s8264_s30 }
  0x21   : > { %p42_p12 = scmp.ne.s32.totalorder %s8117_s15, %s8113_s14  ;;  %p33_p13 = scmp.eq.s32.totalorder %s32_s29, 0 }
  0x22   : > { %p43_p0 = scmp.eq.s32.totalorder %s8121_s16, 0  ;;  %p7821_p5 = scmp.lt.s32.totalorder %s8121_s16, 2 }
  0x23   : > { %p8274_p3 = por %p261_p2, %p42_p12  ;;  %s356_s11 = sand.u32 1, %s8117_s15  }
  0x24   : > { %s8280_s22 = scalar_select %p33_p13, %s8117_s15, %s35_s12  }
  0x25   : > { %p44_p7 = por %p43_p0, %p42_p12  ;;  %s6507_s27 = sshll.u32 %s356_s11, 8 }
  0x26   : > { %s7522_s1 = sshll.u32 %s8121_s16, 8  ;;  %s360_s18 = scalar_lea.vmem [#allocation4], %s6507_s27 }
  0x27   : > { %s365_s26 = scalar_lea.hbm %s10145_s0, %s7522_s1  ;;  %s368_s21 = sshll.u32 %s360_s18, 4  ;;  %s369_s21 = int_to_ptr.vmem [resolvable:$true] %s368_s21 }
  0x28   : > { %s366_s29 = sshll.u32 %s365_s26, 4  ;;  %p8287_p2 = pnand %p7821_p5, %p44_p7  ;;  %s367_s29 = int_to_ptr.hbm [resolvable:$true] %s366_s29 }
  0x29   : > { %s357_s12 = scalar_lea.sflag [#allocation5], %s356_s11  ;;  %s8017_s7 = sshra.s32 %s367_s29, 4  ;;  %s8018_s7 = int_to_ptr.hbm [resolvable:$true] %s8017_s7 }
  0x2a   : > { %s8019_s9 = scalar_lea.hbm %s8018_s7, 256  ;;  %p8021_p11 = pneg %p8287_p2 }
  0x2b   : > { %p8020_p10 = scmp.ne.s32.totalorder %s8018_s7, %s8019_s9  ;;  %s8024_s25 = scalar_lea.hbm %s10145_s0, 512 }
  0x2c   : > { %p8025_p0 = scmp.lt.s32.totalorder %s8018_s7, %s10145_s0  ;;  %p8026_p5 = scmp.lt.s32.totalorder %s8024_s25, %s8019_s9 }
  0x2d   : > { %p8022_p12 = pnand %p8021_p11, %p8020_p10 }
  0x2e   : > { %p8027_p7 = por %p8026_p5, %p8025_p0 }
  0x2f   : > { %p8023_p13 = pneg %p8022_p12 }
  0x31   : > { %p8028_p9 = pnand %p8027_p7, %p8023_p13 }
  0x33   : > { %8031 = shalt.err (!%p8028_p9)
}
  0x34   : > { %s8129_s11 = smov 512   ;;  %s8130_s18 = smov 32  }
  0x35   : > { %7812 = dma.hbm_to_vmem [thread:$0]  (!%p8287_p2), %s367_s29, 4096, %s369_s21, %s357_s12, %s8129_s11, %s8129_s11, %s8130_s18  }
  0x36   : > { %380 = sbr.rel (%p8233_p8) target bundleno = 1081 (0x439), region = 60 }
  0x3b   : > { %s8304_s1 = sand.u32 1, %s8113_s14  }
  0x3c   : > { %s6511_s27 = sshll.u32 %s8304_s1, 8  ;;  %s383_s7 = scalar_lea.sflag [#allocation5], %s8304_s1 }
  0x3d   : > { %s8308_s9 = scalar_lea.vmem [#allocation4], %s6511_s27 }
  0x3e   : > { %8092 = dma.done.wait (%p8220_p4), %s383_s7, 4096  }
  0x3f   : > { %8094 = vsyncadd (%p8220_p4), %s383_s7, 4294963200 }
  0x40   : > { %8096 = dma.done.wait (%p49_p1), [#allocation8], 16400  }
  0x41   : > { %8098 = vsyncadd (%p49_p1), [#allocation8], 4294950896 }
  0x42   : > { %8100 = dma.done.wait (%p49_p1), [#allocation11], 10240  }
  0x43   : > { %8102 = vsyncadd (%p49_p1), [#allocation11], 4294957056  ;;  %v8131_v0 = vmov 0   ;;  %v8327_v1 = vld [vmem:[%s8308_s9] sm:$0xff]  ;;  %v8330_v2 = vld [vmem:[%s8308_s9 + $0x8] sm:$0xff]  ;;  %vm1060_vm3 = vcmask 1043456  }
  0x44   : > { %843 = vst [vmem:[#allocation2] sm:$0xff] %v8131_v0  ;;  %v8333_v3 = vld [vmem:[%s8308_s9 + $0x10] sm:$0xff]  ;;  %v7542_v4 = vld [vmem:[#allocation9 + $0x38] sm:$0xff]  ;;  %v477_v6 = vadd.f32 %v8330_v2, %v8327_v1  ;;  %v8346_v8 = vld [vmem:[%s8308_s9 + $0x28] sm:$0xff]  ;;  %vm1061_vm4 = vsmask.f32 7938 }
  0x45   : > { %865 = vst [vmem:[#allocation2 + $0x30] sm:$0xff] %v8131_v0  ;;  %v8337_v5 = vld [vmem:[%s8308_s9 + $0x20] sm:$0xff]  ;;  %v8343_v7 = vld [vmem:[%s8308_s9 + $0x18] sm:$0xff]  ;;  %v8349_v9 = vld [vmem:[%s8308_s9 + $0x30] sm:$0xff]  ;;  %7768 = vmatpush.bf16.msra.mxu3 %v7542_v4  ;;  %1506 = vmatpush.bf16.msra.mxu1 %v7542_v4  ;;  %vm1063_vm5 = vcmask 1047556   ;;  %vm1073_vm7 = vcmask 1040384  }
  0x46   : > { %866 = vst [vmem:[#allocation2 + $0x38] sm:$0xff] %v8131_v0  ;;  %v8353_v10 = vld [vmem:[%s8308_s9 + $0x40] sm:$0xff]  ;;  %v8356_v11 = vld [vmem:[%s8308_s9 + $0x48] sm:$0xff]  ;;  %v8359_v12 = vld [vmem:[%s8308_s9 + $0x50] sm:$0xff]  ;;  %v478_v13 = vadd.f32 %v8346_v8, %v8337_v5  ;;  %v485_v14 = vadd.f32 %v477_v6, %v8333_v3  ;;  %vm1064_vm6 = vsmask.f32 7954 }
  0x47   : > { %867 = vst [vmem:[#allocation2 + $0x50] sm:$0xff] %v8131_v0  ;;  %v8366_v15 = vld [vmem:[%s8308_s9 + $0x38] sm:$0xff]  ;;  %v8369_v16 = vld [vmem:[%s8308_s9 + $0x60] sm:$0xff]  ;;  %v8372_v17 = vld [vmem:[%s8308_s9 + $0x68] sm:$0xff]  ;;  %v479_v18 = vadd.f32 %v8356_v11, %v8353_v10  ;;  %vm1074_vm8 = vsmask.f32 256 }
  0x48   : > { %868 = vst [vmem:[#allocation2 + $0x58] sm:$0xff] %v8131_v0  ;;  %v8378_v19 = vld [vmem:[%s8308_s9 + $0x58] sm:$0xff]  ;;  %v8381_v20 = vld [vmem:[%s8308_s9 + $0x70] sm:$0xff]  ;;  %v8384_v21 = vld [vmem:[%s8308_s9 + $0x80] sm:$0xff]  ;;  %v480_v22 = vadd.f32 %v8372_v17, %v8369_v16  ;;  %v486_v23 = vadd.f32 %v478_v13, %v8349_v9  ;;  %v8390_v24 = vadd.f32 %v485_v14, %v8343_v7  ;;  %vm1077_vm10 = vsmask.f32 4352 }
  0x49   : > { %869 = vst [vmem:[#allocation2 + $0x70] sm:$0xff] %v8131_v0  ;;  %v8394_v25 = vld [vmem:[%s8308_s9 + $0x78] sm:$0xff]  ;;  %v8397_v26 = vld [vmem:[%s8308_s9 + $0x88] sm:$0xff]  ;;  %v8400_v27 = vld [vmem:[%s8308_s9 + $0x90] sm:$0xff]  ;;  %v487_v28 = vadd.f32 %v479_v18, %v8359_v12  ;;  %vm1211_vm9 = vsmask.f32 7440 }
  0x4a   : > { %870 = vst [vmem:[#allocation2 + $0x78] sm:$0xff] %v8131_v0  ;;  %v8405_v29 = vld [vmem:[%s8308_s9 + $0xa0] sm:$0xff]  ;;  %v8408_v30 = vld [vmem:[%s8308_s9 + $0xa8] sm:$0xff]  ;;  %v8411_v31 = vld [vmem:[%s8308_s9 + $0xb0] sm:$0xff]  ;;  %v481_v32 = vadd.f32 %v8397_v26, %v8384_v21  ;;  %v488_v33 = vadd.f32 %v480_v22, %v8381_v20  ;;  %v8417_v34 = vadd.f32 %v486_v23, %v8366_v15  ;;  %s6516_s26 = sshll.u32 %s8304_s1, 6  ;;  %s7759_s7 = sshll.u32 %s8211_s17, 6 }
  0x4b   : > { %871 = vst [vmem:[#allocation2 + $0x90] sm:$0xff] %v8131_v0  ;;  %v8421_v35 = vld [vmem:[%s8308_s9 + $0x98] sm:$0xff]  ;;  %v8424_v36 = vld [vmem:[%s8308_s9 + $0xc0] sm:$0xff]  ;;  %v8427_v37 = vld [vmem:[%s8308_s9 + $0xc8] sm:$0xff]  ;;  %v482_v38 = vadd.f32 %v8408_v30, %v8405_v29  ;;  %v8432_v39 = vadd.f32 %v487_v28, %v8378_v19  ;;  %s10068_s27 = scalar_lea.vmem [#allocation13], %s6516_s26  ;;  %s6385_s19 = scalar_lea.hbm %s10155_s10, %s7759_s7 }
  0x4c   : > { %872 = vst [vmem:[#allocation2 + $0x98] sm:$0xff] %v8131_v0  ;;  %v7541_v40 = vld [vmem:[#allocation9 + $0x30] sm:$0xff]  ;;  %v7550_v41 = vld [vmem:[#allocation9 + $0x78] sm:$0xff]  ;;  %v489_v42 = vadd.f32 %v481_v32, %v8400_v27  ;;  %v8437_v43 = vadd.f32 %v488_v33, %v8394_v25  ;;  %v521_v44 = vadd.f32 %v8417_v34, %v8390_v24  ;;  %v483_v46 = vadd.f32 %v8427_v37, %v8424_v36  ;;  %v7540_v48 = vld [vmem:[#allocation9 + $0x28] sm:$0xff]  ;;  %s6386_s24 = sshll.u32 %s10068_s27, 4  ;;  %s6388_s21 = sshll.u32 %s6385_s19, 4  ;;  %s6387_s24 = int_to_ptr.vmem [resolvable:$true] %s6386_s24  ;;  %s6389_s21 = int_to_ptr.hbm [resolvable:$true] %s6388_s21 }
  0x4d   : > { %10186 = vst [vmem:[#allocation18_spill] sm:$0xff] %v8390_v24  ;;  %v8443_v45 = vld [vmem:[%s8308_s9 + $0xb8] sm:$0xff]  ;;  %v490_v47 = vadd.f32 %v482_v38, %v8411_v31  ;;  %7769 = vmatpush.bf16.msra.mxu3 %v7541_v40  ;;  %7760 = vmatpush.bf16.msra.mxu2 %v7550_v41  ;;  %v7539_v52 = vld [vmem:[#allocation9 + $0x20] sm:$0xff]  ;;  %v8456_v53 = vld [vmem:[%s8308_s9 + $0xd0] sm:$0xff]  ;;  %s6374_s17 = scalar_lea.sflag [#allocation6], %s8304_s1  ;;  %s8061_s29 = sshra.s32 %s6389_s21, 4  ;;  %s8062_s29 = int_to_ptr.hbm [resolvable:$true] %s8061_s29 }
  0x4e   : > { %873 = vst [vmem:[#allocation2 + $0xb0] sm:$0xff] %v8131_v0  ;;  %v7549_v49 = vld [vmem:[#allocation9 + $0x70] sm:$0xff]  ;;  %v8450_v50 = vadd.f32 %v489_v42, %v8421_v35  ;;  %v522_v51 = vadd.f32 %v521_v44, %v8432_v39  ;;  %1405 = vmatpush.bf16.msra.mxu0 %v7550_v41  ;;  %1507 = vmatpush.bf16.msra.mxu1 %v7541_v40  ;;  %v8467_v57 = vld [vmem:[%s8308_s9 + $0xe0] sm:$0xff]  ;;  %v8470_v58 = vld [vmem:[%s8308_s9 + $0xe8] sm:$0xff]  ;;  %s8063_s12 = scalar_lea.hbm %s8062_s29, 64  ;;  %s8067_s26 = scalar_lea.hbm %s10155_s10, 128 }
  0x4f   : > { %874 = vst [vmem:[#allocation2 + $0xb8] sm:$0xff] %v8131_v0  ;;  %v8459_v54 = vadd.f32 %v490_v47, %v8443_v45  ;;  %v8464_v56 = vld [vmem:[%s8308_s9 + $0xd8] sm:$0xff]  ;;  %v491_v59 = vadd.f32 %v483_v46, %v8456_v53  ;;  %v7548_v60 = vld [vmem:[#allocation9 + $0x68] sm:$0xff]  ;;  %v484_v62 = vadd.f32 %v8470_v58, %v8467_v57  ;;  %v7547_v22 = vld [vmem:[#allocation9 + $0x60] sm:$0xff]  ;;  %p8064_p1 = scmp.ne.s32.totalorder %s8062_s29, %s8063_s12  ;;  %p8068_p9 = scmp.lt.s32.totalorder %s8062_s29, %s10155_s10 }
  0x50   : > { %10187 = vst [vmem:[#allocation19_spill] sm:$0xff] %v8417_v34  ;;  %v523_v55 = vadd.f32 %v522_v51, %v8437_v43  ;;  %v8475_v61 = vld [vmem:[%s8308_s9 + $0xf0] sm:$0xff]  ;;  %v8482_v4 = vld [vmem:[%s8308_s9 + $0xf8] sm:$0xff]  ;;  %p8069_p2 = scmp.lt.s32.totalorder %s8067_s26, %s8063_s12 }
  0x51   : > { %875 = vst [vmem:[#allocation2 + $0xd0] sm:$0xff] %v8131_v0  ;;  %7770 = vmatpush.bf16.msra.mxu3 %v7540_v48  ;;  %7761 = vmatpush.bf16.msra.mxu2 %v7549_v49  ;;  %v8485_v6 = vadd.f32 %v491_v59, %v8464_v56  ;;  %v492_v13 = vadd.f32 %v484_v62, %v8475_v61  ;;  %v7538_v18 = vld [vmem:[#allocation9 + $0x18] sm:$0xff]  ;;  %v7537_v33 = vld [vmem:[#allocation9 + $0x10] sm:$0xff]  ;;  %v7536_v42 = vld [vmem:[#allocation9 + $0x8] sm:$0xff]  ;;  %p8065_p4 = pnand %p8064_p1, %p8274_p3 }
  0x52   : > { %10188 = vst [vmem:[#allocation20_spill] sm:$0xff] %v8432_v39  ;;  %v524_v63 = vadd.f32 %v523_v55, %v8450_v50  ;;  %1406 = vmatpush.bf16.msra.mxu0 %v7549_v49  ;;  %1508 = vmatpush.bf16.msra.mxu1 %v7540_v48  ;;  %v7546_v38 = vld [vmem:[#allocation9 + $0x58] sm:$0xff]  ;;  %v7545_v44 = vld [vmem:[#allocation9 + $0x50] sm:$0xff]  ;;  %v7535_v48 = vld [vmem:[#allocation9] sm:$0xff]  ;;  %p8070_p10 = por %p8069_p2, %p8068_p9 }
  0x53   : > { %876 = vst [vmem:[#allocation2 + $0xd8] sm:$0xff] %v8131_v0  ;;  %v8493_v23 = vadd.f32 %v492_v13, %v8482_v4  ;;  %v7544_v49 = vld [vmem:[#allocation9 + $0x48] sm:$0xff]  ;;  %p8066_p8 = pneg %p8065_p4 }
  0x54   : > { %10189 = vst [vmem:[#allocation21_spill] sm:$0xff] %v8437_v43  ;;  %v525_v14 = vadd.f32 %v524_v63, %v8459_v54 }
  0x55   : > { %877 = vst [vmem:[#allocation2 + $0xf0] sm:$0xff] %v8131_v0  ;;  %7771 = vmatpush.bf16.msra.mxu3 %v7539_v52  ;;  %7762 = vmatpush.bf16.msra.mxu2 %v7548_v60  ;;  %p8071_p11 = pnand %p8070_p10, %p8066_p8 }
  0x56   : > { %878 = vst [vmem:[#allocation2 + $0xf8] sm:$0xff] %v8131_v0  ;;  %v526_v28 = vadd.f32 %v525_v14, %v8485_v6  ;;  %1407 = vmatpush.bf16.msra.mxu0 %v7548_v60  ;;  %1509 = vmatpush.bf16.msra.mxu1 %v7539_v52 }
  0x57   : > { %10190 = vst [vmem:[#allocation22_spill] sm:$0xff] %v8450_v50 }
  0x58   : > { %879 = vst [vmem:[#allocation2 + $0x110] sm:$0xff] %v8131_v0  ;;  %v527_v32 = vadd.f32 %v526_v28, %v8493_v23 }
  0x59   : > { %880 = vst [vmem:[#allocation2 + $0x118] sm:$0xff] %v8131_v0  ;;  %7772 = vmatpush.bf16.msra.mxu3 %v7538_v18  ;;  %7763 = vmatpush.bf16.msra.mxu2 %v7547_v22 }
  0x5a   : > { %10191 = vst [vmem:[#allocation23_spill] sm:$0xff] %v8459_v54  ;;  %v528_v40 = vrot.slane %v527_v32, 4  ;;  %1408 = vmatpush.bf16.msra.mxu0 %v7547_v22  ;;  %1510 = vmatpush.bf16.msra.mxu1 %v7538_v18 }
  0x5b   : > { %4468 = vst [vmem:[#allocation3] sm:$0xf] %v8131_v0 }
  0x5c   : > { %4469 = vst [vmem:[#allocation3 + $0x4] sm:$0xf] %v8131_v0  ;;  %v529_v41 = vadd.f32 %v528_v40, %v527_v32 }
  0x5d   : > { %4471 = vst [vmem:[#allocation3 + $0x48] sm:$0xf] %v8131_v0  ;;  %7773 = vmatpush.bf16.msra.mxu3 %v7537_v33  ;;  %7764 = vmatpush.bf16.msra.mxu2 %v7546_v38 }
  0x5e   : > { %10192 = vst [vmem:[#allocation24_spill] sm:$0xff] %v8485_v6  ;;  %v530_v46 = vrot.slane %v529_v41, 2  ;;  %1409 = vmatpush.bf16.msra.mxu0 %v7546_v38  ;;  %1511 = vmatpush.bf16.msra.mxu1 %v7537_v33 }
  0x5f   : > { %4472 = vst [vmem:[#allocation3 + $0x4c] sm:$0xf] %v8131_v0 }
  0x60   : > { %4474 = vst [vmem:[#allocation3 + $0x8] sm:$0xf] %v8131_v0  ;;  %v531_v47 = vadd.f32 %v530_v46, %v529_v41 }
  0x61   : > { %4475 = vst [vmem:[#allocation3 + $0x10] sm:$0xf] %v8131_v0  ;;  %7774 = vmatpush.bf16.msra.mxu3 %v7536_v42  ;;  %7765 = vmatpush.bf16.msra.mxu2 %v7545_v44 }
  0x62   : > { %10193 = vst [vmem:[#allocation25_spill] sm:$0xff] %v8493_v23  ;;  %v532_v51 = vrot.slane %v531_v47, 1  ;;  %1410 = vmatpush.bf16.msra.mxu0 %v7545_v44  ;;  %1512 = vmatpush.bf16.msra.mxu1 %v7536_v42 }
  0x63   : > { %4476 = vst [vmem:[#allocation3 + $0x18] sm:$0xf] %v8131_v0 }
  0x64   : > { %4477 = vst [vmem:[#allocation3 + $0x20] sm:$0xf] %v8131_v0  ;;  %v533_v52 = vadd.f32 %v532_v51, %v531_v47 }
  0x65   : > { %4478 = vst [vmem:[#allocation3 + $0x28] sm:$0xf] %v8131_v0  ;;  %7775 = vmatpush.bf16.msra.mxu3 %v7535_v48  ;;  %7766 = vmatpush.bf16.msra.mxu2 %v7544_v49 }
  0x66   : > { %4479 = vst [vmem:[#allocation3 + $0x30] sm:$0xf] %v8131_v0  ;;  %v8513_v55 = vmul.f32 0.00390625, %v533_v52  ;;  %1411 = vmatpush.bf16.msra.mxu0 %v7544_v49  ;;  %1513 = vmatpush.bf16.msra.mxu1 %v7535_v48 }
  0x67   : > { %4480 = vst [vmem:[#allocation3 + $0x38] sm:$0xf] %v8131_v0 }
  0x68   : > { %4481 = vst [vmem:[#allocation3 + $0x40] sm:$0xf] %v8131_v0  ;;  %v535_v59 = vsub.f32 %v8327_v1, %v8513_v55  ;;  %v536_v60 = vsub.f32 %v8337_v5, %v8513_v55  ;;  %v537_v62 = vsub.f32 %v8353_v10, %v8513_v55  ;;  %v538_v63 = vsub.f32 %v8369_v16, %v8513_v55 }
  0x69   : > { %4484 = vst [vmem:[#allocation3 + $0xc] sm:$0xf] %v8131_v0  ;;  %v539_v13 = vsub.f32 %v8384_v21, %v8513_v55  ;;  %v540_v5 = vsub.f32 %v8405_v29, %v8513_v55  ;;  %v541_v10 = vsub.f32 %v8424_v36, %v8513_v55  ;;  %v565_v21 = vsub.f32 %v8330_v2, %v8513_v55 }
  0x6a   : > { %4485 = vst [vmem:[#allocation3 + $0x14] sm:$0xf] %v8131_v0  ;;  %v543_v14 = vmul.f32 %v535_v59, %v535_v59  ;;  %v544_v18 = vmul.f32 %v536_v60, %v536_v60  ;;  %v545_v22 = vmul.f32 %v537_v62, %v537_v62  ;;  %v546_v28 = vmul.f32 %v538_v63, %v538_v63 }
  0x6b   : > { %4486 = vst [vmem:[#allocation3 + $0x1c] sm:$0xf] %v8131_v0  ;;  %v566_v32 = vsub.f32 %v8346_v8, %v8513_v55  ;;  %v567_v33 = vsub.f32 %v8356_v11, %v8513_v55  ;;  %v542_v38 = vsub.f32 %v8467_v57, %v8513_v55  ;;  %v547_v29 = vmul.f32 %v539_v13, %v539_v13 }
  0x6c   : > { %4487 = vst [vmem:[#allocation3 + $0x24] sm:$0xf] %v8131_v0  ;;  %v551_v16 = vadd.f32 %v544_v18, %v543_v14  ;;  %v568_v36 = vsub.f32 %v8372_v17, %v8513_v55  ;;  %v573_v41 = vmul.f32 %v565_v21, %v565_v21  ;;  %v548_v44 = vmul.f32 %v540_v5, %v540_v5 }
  0x6d   : > { %4488 = vst [vmem:[#allocation3 + $0x2c] sm:$0xf] %v8131_v0  ;;  %v574_v42 = vmul.f32 %v566_v32, %v566_v32  ;;  %v549_v46 = vmul.f32 %v541_v10, %v541_v10  ;;  %v570_v8 = vsub.f32 %v8408_v30, %v8513_v55  ;;  %v575_v47 = vmul.f32 %v567_v33, %v567_v33 }
  0x6e   : > { %4489 = vst [vmem:[#allocation3 + $0x34] sm:$0xf] %v8131_v0  ;;  %v552_v40 = vadd.f32 %v551_v16, %v545_v22  ;;  %v571_v57 = vsub.f32 %v8427_v37, %v8513_v55  ;;  %v576_v48 = vmul.f32 %v568_v36, %v568_v36  ;;  %v595_v17 = vsub.f32 %v8333_v3, %v8513_v55 }
  0x6f   : > { %4490 = vst [vmem:[#allocation3 + $0x3c] sm:$0xf] %v8131_v0  ;;  %v581_v49 = vadd.f32 %v574_v42, %v573_v41  ;;  %v597_v51 = vsub.f32 %v8359_v12, %v8513_v55  ;;  %v598_v52 = vsub.f32 %v8381_v20, %v8513_v55  ;;  %v550_v30 = vmul.f32 %v542_v38, %v542_v38 }
  0x70   : > { %4491 = vst [vmem:[#allocation3 + $0x44] sm:$0xf] %v8131_v0  ;;  %v553_v11 = vadd.f32 %v552_v40, %v546_v28  ;;  %v572_v37 = vsub.f32 %v8470_v58, %v8513_v55  ;;  %v578_v63 = vmul.f32 %v570_v8, %v570_v8  ;;  %v603_v13 = vmul.f32 %v595_v17, %v595_v17 }
  0x71   : > { %844 = vst [vmem:[#allocation2 + $0x8] sm:$0xff] %v8131_v0  ;;  %v582_v62 = vadd.f32 %v581_v49, %v575_v47  ;;  %v599_v5 = vsub.f32 %v8400_v27, %v8513_v55  ;;  %v605_v10 = vmul.f32 %v597_v51, %v597_v51  ;;  %v579_v28 = vmul.f32 %v571_v57, %v571_v57 }
  0x72   : > { %861 = vst [vmem:[#allocation2 + $0x120] sm:$0xff] %v8131_v0  ;;  %v554_v59 = vadd.f32 %v553_v11, %v547_v29  ;;  %v600_v16 = vsub.f32 %v8411_v31, %v8513_v55  ;;  %v606_v21 = vmul.f32 %v598_v52, %v598_v52  ;;  %v625_v58 = vsub.f32 %v8343_v7, %v8513_v55 }
  0x73   : > { %864 = vst [vmem:[#allocation2 + $0x18] sm:$0xff] %v8131_v0  ;;  %v583_v22 = vadd.f32 %v582_v62, %v576_v48  ;;  %v580_v29 = vmul.f32 %v572_v37, %v572_v37  ;;  %v601_v36 = vsub.f32 %v8456_v53, %v8513_v55  ;;  %v626_v40 = vsub.f32 %v8366_v15, %v8513_v55 }
  0x74   : > { %881 = vst [vmem:[#allocation2 + $0x130] sm:$0xff] %v8131_v0  ;;  %v555_v18 = vadd.f32 %v554_v59, %v548_v44  ;;  %v607_v44 = vmul.f32 %v599_v5, %v599_v5  ;;  %v628_v47 = vsub.f32 %v8394_v25, %v8513_v55  ;;  %v633_v11 = vmul.f32 %v625_v58, %v625_v58 }
  0x75   : > { %4473 = vst [vmem:[#allocation3] sm:$0xf] %v8131_v0  ;;  %v634_v57 = vmul.f32 %v626_v40, %v626_v40  ;;  %v608_v17 = vmul.f32 %v600_v16, %v600_v16  ;;  %v629_v51 = vsub.f32 %v8421_v35, %v8513_v55  ;;  %v631_v5 = vsub.f32 %v8464_v56, %v8513_v55 }
  0x76   : > { %4482 = vst [vmem:[#allocation3 + $0x48] sm:$0xf] %v8131_v0  ;;  %v556_v32 = vadd.f32 %v555_v18, %v549_v46  ;;  %v602_v46 = vsub.f32 %v8475_v61, %v8513_v55  ;;  %v630_v61 = vsub.f32 %v8443_v45, %v8513_v55  ;;  %v636_v37 = vmul.f32 %v628_v47, %v628_v47 }
  0x77   : > { %4483 = vst [vmem:[#allocation3 + $0x4] sm:$0xf] %v8131_v0  ;;  %v639_v40 = vmul.f32 %v631_v5, %v631_v5 }
  0x78   : > { %4492 = vst [vmem:[#allocation3 + $0x4c] sm:$0xf] %v8131_v0  ;;  %v569_v0 = vsub.f32 %v8397_v26, %v8513_v55  ;;  %v596_v26 = vsub.f32 %v8349_v9, %v8513_v55  ;;  %v557_v41 = vadd.f32 %v556_v32, %v550_v30  ;;  %v632_v32 = vsub.f32 %v8482_v4, %v8513_v55 }
  0x7a   : > { %v577_v60 = vmul.f32 %v569_v0, %v569_v0  ;;  %v604_v14 = vmul.f32 %v596_v26, %v596_v26  ;;  %v627_v0 = vsub.f32 %v8378_v19, %v8513_v55  ;;  %v558_v48 = vrot.slane %v557_v41, 4 }
  0x7c   : > { %v584_v33 = vadd.f32 %v583_v22, %v577_v60  ;;  %v611_v38 = vadd.f32 %v604_v14, %v603_v13  ;;  %v635_v52 = vmul.f32 %v627_v0, %v627_v0  ;;  %v559_v30 = vadd.f32 %v558_v48, %v557_v41 }
  0x7d   : > { %v609_v60 = vmul.f32 %v601_v36, %v601_v36  ;;  %v610_v14 = vmul.f32 %v602_v46, %v602_v46 }
  0x7e   : > { %v585_v42 = vadd.f32 %v584_v33, %v578_v63  ;;  %v612_v8 = vadd.f32 %v611_v38, %v605_v10  ;;  %v641_v63 = vadd.f32 %v634_v57, %v633_v11  ;;  %v560_v22 = vrot.slane %v559_v30, 2 }
  0x7f   : > { %v637_v10 = vmul.f32 %v629_v51, %v629_v51  ;;  %v638_v33 = vmul.f32 %v630_v61, %v630_v61 }
  0x80   : > { %v586_v49 = vadd.f32 %v585_v42, %v579_v28  ;;  %v613_v26 = vadd.f32 %v612_v8, %v606_v21  ;;  %v642_v28 = vadd.f32 %v641_v63, %v635_v52  ;;  %v561_v36 = vadd.f32 %v560_v22, %v559_v30 }
  0x82   : > { %v587_v59 = vadd.f32 %v586_v49, %v580_v29  ;;  %v614_v62 = vadd.f32 %v613_v26, %v607_v44  ;;  %v643_v38 = vadd.f32 %v642_v28, %v636_v37  ;;  %v640_v44 = vmul.f32 %v632_v32, %v632_v32 }
  0x83   : > { %v562_v47 = vrot.slane %v561_v36, 1 }
  0x84   : > { %v588_v13 = vrot.slane %v587_v59, 4  ;;  %v615_v18 = vadd.f32 %v614_v62, %v608_v17  ;;  %v644_v0 = vadd.f32 %v643_v38, %v637_v10 }
  0x85   : > { %v563_v26 = vadd.f32 %v562_v47, %v561_v36 }
  0x86   : > { %v589_v16 = vadd.f32 %v588_v13, %v587_v59  ;;  %v616_v21 = vadd.f32 %v615_v18, %v609_v60  ;;  %v645_v8 = vadd.f32 %v644_v0, %v638_v33  ;;  %v667_v33 = vld [vmem:[#allocation7] sm:$0x1] }
  0x87   : > { %v7566_v0 = vld [vmem:[#allocation9 + $0xf8] sm:$0xff] }
  0x88   : > { %v590_v58 = vrot.slane %v589_v16, 2  ;;  %v617_v29 = vadd.f32 %v616_v21, %v610_v14  ;;  %v646_v57 = vadd.f32 %v645_v8, %v639_v40  ;;  %1919 = vmatpush.bf16.msrb.mxu3 %v7566_v0 }
  0x8a   : > { %v591_v41 = vadd.f32 %v590_v58, %v589_v16  ;;  %v618_v42 = vrot.slane %v617_v29, 4  ;;  %v647_v49 = vadd.f32 %v646_v57, %v640_v44 }
  0x8c   : > { %v619_v46 = vadd.f32 %v618_v42, %v617_v29  ;;  %v592_v11 = vrot.slane %v591_v41, 1  ;;  %v648_v51 = vrot.slane %v647_v49, 4  ;;  %v669_v29 = vld [vmem:[%s10147_s2] sm:$0x1] }
  0x8e   : > { %v620_v48 = vrot.slane %v619_v46, 2  ;;  %v593_v4 = vadd.f32 %v592_v11, %v591_v41  ;;  %v649_v59 = vadd.f32 %v648_v51, %v647_v49  ;;  %v7543_v41 = vld [vmem:[#allocation9 + $0x40] sm:$0xff] }
  0x8f   : > { %7767 = vmatpush.bf16.msra.mxu2 %v7543_v41  ;;  %1412 = vmatpush.bf16.msra.mxu0 %v7543_v41 }
  0x90   : > { %v621_v17 = vadd.f32 %v620_v48, %v619_v46  ;;  %v594_v60 = vadd.f32 %v593_v4, %v563_v26  ;;  %v650_v62 = vrot.slane %v649_v59, 2  ;;  %v1194_v26 = vld [vmem:[#allocation2 + $0x8] sm:$0xf] }
  0x92   : > { %v622_v52 = vrot.slane %v621_v17, 1  ;;  %v651_v61 = vadd.f32 %v650_v62, %v649_v59  ;;  %v1214_v62 = vshrl.u32 %v1194_v26, 16 }
  0x94   : > { %v623_v30 = vadd.f32 %v622_v52, %v621_v17  ;;  %v652_v63 = vrot.slane %v651_v61, 1 }
  0x96   : > { %v624_v37 = vadd.f32 %v623_v30, %v594_v60  ;;  %v653_v13 = vadd.f32 %v652_v63, %v651_v61  ;;  %v7558_v30 = vld [vmem:[#allocation9 + $0xb8] sm:$0xff] }
  0x97   : > { %1743 = vmatpush.bf16.msrb.mxu2 %v7558_v30  ;;  %v7586_v30 = vld [vmem:[#allocation9 + $0x178] sm:$0xff] }
  0x98   : > { %v654_v14 = vadd.f32 %v653_v13, %v624_v37  ;;  %v10194_v13 = vmov 0  ;;  %2297 = vmatpush.bf16.msrb.mxu1 %v7586_v30  ;;  %v7584_v30 = vld [vmem:[#allocation9 + $0x168] sm:$0xff] }
  0x9a   : > { %v655_v18 = vmul.f32 0.00390625, %v654_v14  ;;  %v7564_v14 = vld [vmem:[#allocation9 + $0xe8] sm:$0xff] }
  0x9c   : > { %v656_v22 = vadd.f32 1e-05, %v655_v18 }
  0x9e   : > { %7873 = vrsqrt.f32 %v656_v22  ;;  %vm663_vm0 = vweird.f32 %v656_v22 }
  0xa4   : > { %v7874_v5 = vpop.eup %7873 }
  0xa5   : > { %v658_v10 = vmul.f32 %v7874_v5, %v656_v22  ;;  %vm664_vm1 = vweird.f32 %v7874_v5 }
  0xa6   : > { %vm665_vm2 = vmor %vm663_vm0, %vm664_vm1 }
  0xa7   : > { %v659_v28 = vmul.f32 %v7874_v5, %v658_v10  ;;  %vm8638_vm1 = vmand %vm1060_vm3, %vm1061_vm4  ;;  %vm10202_vm4 = vcmask 1044484  }
  0xa8   : > { %v10195_v13 = vsel %vm8638_vm1, 4294967295, %v10194_v13  ;;  %vm8645_vm0 = vmand %vm1063_vm5, %vm1064_vm6 }
  0xa9   : > { %v660_v16 = vmul.f32 0.5, %v659_v28  ;;  %10196 = vst [vmem:[#allocation26_spill] sm:$0xff] %v10195_v13  ;;  %v7557_v28 = vld [vmem:[#allocation9 + $0xb0] sm:$0xff]  ;;  %vm8653_vm3 = vmand %vm1073_vm7, %vm1074_vm8 }
  0xaa   : > { %vm8661_vm5 = vmand %vm10202_vm4, %vm1077_vm10  ;;  %1744 = vmatpush.bf16.msrb.mxu2 %v7557_v28  ;;  %vm1804_vm4 = vcmask 1042432  }
  0xab   : > { %v661_v21 = vsub.f32 1.5, %v660_v16  ;;  %vm8673_vm7 = vmor %vm8645_vm0, %vm8638_vm1 }
  0xad   : > { %v662_v32 = vmul.f32 %v7874_v5, %v661_v21  ;;  %v8649_v21 = vld [vmem:[#allocation2 + $0x18] sm:$0x1] }
  0xae   : > { %v1223_v0 = vshll.u32 %v8649_v21, 16 }
  0xaf   : > { %v666_v38 = vsel %vm665_vm2, %v7874_v5, %v662_v32  ;;  %vm1210_vm2 = vsmask.f32 3328  ;;  %v1216_v32 = vrot.slane %v1214_v62, 4  ;;  %v7577_v62 = vld [vmem:[#allocation9 + $0x130] sm:$0xff] }
  0xb0   : > { %v668_v58 = vmul.f32 %v667_v33, %v666_v38  ;;  %v10199_v38 = vmov 0 }
  0xb1   : > { %v10200_v38 = vsel %vm8653_vm3, 4294967295, %v10199_v38 }
  0xb2   : > { %v670_v36 = vmul.f32 %v668_v58, %v8513_v55  ;;  %v8589_v40 = vperm.slane %v668_v58, 0  ;;  %v7565_v55 = vld [vmem:[#allocation9 + $0xf0] sm:$0xff]  ;;  %10201 = vst [vmem:[#allocation27_spill] sm:$0xff] %v10200_v38  ;;  %v7563_v58 = vld [vmem:[#allocation9 + $0xe0] sm:$0xff] }
  0xb3   : > { %1920 = vmatpush.bf16.msrb.mxu3 %v7565_v55  ;;  %v1167_v38 = vld [vmem:[#allocation2 + $0x118] sm:$0x11] }
  0xb4   : > { %v671_v42 = vsub.f32 %v669_v29, %v670_v36  ;;  %v687_v44 = vmul.f32 %v8589_v40, %v8381_v20  ;;  %v688_v8 = vmul.f32 %v8589_v40, %v8394_v25  ;;  %v691_v46 = vmul.f32 %v8589_v40, %v8400_v27 }
  0xb5   : > { %v692_v47 = vmul.f32 %v8589_v40, %v8421_v35  ;;  %v675_v11 = vmul.f32 %v8589_v40, %v8333_v3  ;;  %v676_v20 = vmul.f32 %v8589_v40, %v8343_v7  ;;  %v695_v27 = vmul.f32 %v8589_v40, %v8411_v31 }
  0xb6   : > { %v8603_v25 = vperm.slane %v671_v42, 0  ;;  %v696_v57 = vmul.f32 %v8589_v40, %v8443_v45  ;;  %v699_v35 = vmul.f32 %v8589_v40, %v8456_v53  ;;  %v700_v48 = vmul.f32 %v8589_v40, %v8464_v56 }
  0xb7   : > { %v8615_v3 = vmul.f32 %v8589_v40, %v8349_v9  ;;  %v8619_v7 = vmul.f32 %v8589_v40, %v8366_v15  ;;  %1921 = vmatpush.bf16.msrb.mxu3 %v7564_v14  ;;  %v1217_v36 = vshll.u32 %v1194_v26, 16  ;;  %v1083_v14 = vld [vmem:[#allocation2 + $0x38] sm:$0x11] }
  0xb8   : > { %v720_v49 = vadd.f32 %v8603_v25, %v687_v44  ;;  %v721_v31 = vadd.f32 %v8603_v25, %v688_v8  ;;  %v724_v45 = vadd.f32 %v8603_v25, %v691_v46  ;;  %v725_v17 = vadd.f32 %v8603_v25, %v692_v47 }
  0xb9   : > { %v708_v53 = vadd.f32 %v8603_v25, %v675_v11  ;;  %v709_v56 = vadd.f32 %v8603_v25, %v676_v20  ;;  %v8628_v9 = vadd.f32 %v8603_v25, %v695_v27  ;;  %v8631_v15 = vadd.f32 %v8603_v25, %v696_v57  ;;  %v1119_v11 = vld [vmem:[#allocation2 + $0x98] sm:$0x11] }
  0xba   : > { %vm752_vm11 = vcmp.ge.f32.partialorder %v720_v49, 0.0  ;;  %vm753_vm12 = vcmp.ge.f32.partialorder %v721_v31, 0.0  ;;  %vm756_vm13 = vcmp.ge.f32.partialorder %v724_v45, 0.0  ;;  %vm757_vm14 = vcmp.ge.f32.partialorder %v725_v17, 0.0 }
  0xbb   : > { %v784_v4 = vmul.f32 0.2, %v720_v49  ;;  %v785_v51 = vmul.f32 0.2, %v721_v31  ;;  %v788_v52 = vmul.f32 0.2, %v724_v45  ;;  %v8634_v59 = vadd.f32 %v8603_v25, %v699_v35  ;;  %1922 = vmatpush.bf16.msrb.mxu3 %v7563_v58 }
  0xbc   : > { %v789_v60 = vmul.f32 0.2, %v725_v17  ;;  %vm740_vm15 = vcmp.ge.f32.partialorder %v708_v53, 0.0  ;;  %v772_v18 = vmul.f32 0.2, %v708_v53  ;;  %vm10205_vm6 = vcmp.ge.f32.partialorder %v709_v56, 0.0 }
  0xbd   : > { %v816_v61 = vsel %vm752_vm11, %v720_v49, %v784_v4  ;;  %v817_v37 = vsel %vm753_vm12, %v721_v31, %v785_v51  ;;  %v820_v63 = vsel %vm756_vm13, %v724_v45, %v788_v52  ;;  %v773_v16 = vmul.f32 0.2, %v709_v56  ;;  %v7556_v49 = vld [vmem:[#allocation9 + $0xa8] sm:$0xff]  ;;  %vm8685_vm11 = vmor %vm8661_vm5, %vm8653_vm3  ;;  %v7562_v51 = vld [vmem:[#allocation9 + $0xd8] sm:$0xff] }
  0xbe   : > { %v821_v22 = vsel %vm757_vm14, %v725_v17, %v789_v60  ;;  %v890_v5 = vpack.c.bf16 %v817_v37, %v816_v61  ;;  %v804_v29 = vsel %vm740_vm15, %v708_v53, %v772_v18  ;;  %v8667_v46 = vadd.f32 %v8603_v25, %v700_v48  ;;  %v7578_v48 = vld [vmem:[#allocation9 + $0x138] sm:$0xff]  ;;  %v1131_v53 = vld [vmem:[#allocation2 + $0xb8] sm:$0x11]  ;;  %1745 = vmatpush.bf16.msrb.mxu2 %v7556_v49  ;;  %vm8703_vm14 = vmor %vm1210_vm2, %vm1211_vm9 }
  0xbf   : > { %v892_v33 = vpack.c.bf16 %v821_v22, %v820_v63  ;;  %v805_v8 = vsel %vm10205_vm6, %v709_v56, %v773_v16  ;;  %v1219_v27 = vrot.slane %v1217_v36, 5  ;;  %v8677_v31 = vrot.slane %v1223_v0, 5  ;;  %2052 = vmatpush.bf16.msrb.mxu0 %v7578_v48  ;;  %v7555_v16 = vld [vmem:[#allocation9 + $0xa0] sm:$0xff]  ;;  %1923 = vmatpush.bf16.msrb.mxu3 %v7562_v51  ;;  %v7561_v36 = vld [vmem:[#allocation9 + $0xd0] sm:$0xff]  ;;  %v7554_v48 = vld [vmem:[#allocation9 + $0x98] sm:$0xff] }
  0xc0   : > { %v955_v41 = vshrl.u32 %v890_v5, 16  ;;  %v958_v42 = vshll.u32 %v890_v5, 16  ;;  %v884_v20 = vpack.c.bf16 %v805_v8, %v804_v29  ;;  %vm760_vm8 = vcmp.ge.f32.partialorder %v8628_v9, 0.0 }
  0xc1   : > { %v971_v55 = vshrl.u32 %v892_v33, 16  ;;  %v974_v47 = vshll.u32 %v892_v33, 16  ;;  %vm761_vm10 = vcmp.ge.f32.partialorder %v8631_v15, 0.0  ;;  %v1220_v4 = vor.u32 %v1219_v27, %v1216_v32 }
  0xc2   : > { %v957_v57 = vrot.slane %v955_v41, 7  ;;  %v907_v56 = vshrl.u32 %v884_v20, 16  ;;  %v910_v26 = vshll.u32 %v884_v20, 16  ;;  %vm764_vm12 = vcmp.ge.f32.partialorder %v8634_v59, 0.0  ;;  %1746 = vmatpush.bf16.msrb.mxu2 %v7555_v16 }
  0xc3   : > { %v973_v45 = vrot.slane %v971_v55, 7  ;;  %vm765_vm13 = vcmp.ge.f32.partialorder %v8667_v46, 0.0  ;;  %v1221_v18 = vrot.slane %v1220_v4, 4  ;;  %v792_v10 = vmul.f32 0.2, %v8628_v9  ;;  %2053 = vmatpush.bf16.msrb.mxu0 %v7577_v62  ;;  %1924 = vmatpush.bf16.msrb.mxu3 %v7561_v36  ;;  %v7553_v4 = vld [vmem:[#allocation9 + $0x90] sm:$0xff] }
  0xc4   : > { %v960_v52 = vor.u32 %v958_v42, %v957_v57  ;;  %v962_v60 = vrot.slane %v957_v57, 4  ;;  %v909_v63 = vrot.slane %v907_v56, 7  ;;  %v793_v28 = vmul.f32 0.2, %v8631_v15  ;;  %v7560_v56 = vld [vmem:[#allocation9 + $0xc8] sm:$0xff] }
  0xc5   : > { %v976_v61 = vor.u32 %v974_v47, %v973_v45  ;;  %v978_v37 = vrot.slane %v973_v45, 4  ;;  %v10210_v0 = vmov 0  ;;  %v796_v41 = vmul.f32 0.2, %v8634_v59  ;;  %v7585_v45 = vld [vmem:[#allocation9 + $0x170] sm:$0xff] }
  0xc6   : > { %v1114_v22 = vsel %vm8673_vm7, %v960_v52, 0  ;;  %v1120_v5 = vsel %vm8685_vm11, %v962_v60, %v1119_v11  ;;  %v912_v58 = vor.u32 %v910_v26, %v909_v63  ;;  %v914_v29 = vrot.slane %v909_v63, 4  ;;  %v7576_v26 = vld [vmem:[#allocation9 + $0x128] sm:$0xff]  ;;  %1747 = vmatpush.bf16.msrb.mxu2 %v7554_v48  ;;  %2298 = vmatpush.bf16.msrb.mxu1 %v7585_v45 }
  0xc7   : > { %1115 = vst [vmem:[#allocation2 + $0x88] sm:$0xff] %v1114_v22  ;;  %v1126_v32 = vsel %vm8673_vm7, %v976_v61, 0  ;;  %v1132_v33 = vsel %vm8685_vm11, %v978_v37, %v1131_v53  ;;  %v10211_v0 = vsel %vm8703_vm14, 4294967295, %v10210_v0  ;;  %v797_v42 = vmul.f32 0.2, %v8667_v46  ;;  %1925 = vmatpush.bf16.msrb.mxu3 %v7560_v56  ;;  %2054 = vmatpush.bf16.msrb.mxu0 %v7576_v26 }
  0xc8   : > { %1127 = vst [vmem:[#allocation2 + $0xa8] sm:$0xff] %v1126_v32  ;;  %v824_v44 = vsel %vm760_vm8, %v8628_v9, %v792_v10  ;;  %v683_v8 = vmul.f32 %v8589_v40, %v8359_v12  ;;  %v1071_v55 = vsel %vm8673_vm7, %v912_v58, 0  ;;  %v1084_v47 = vsel %vm8685_vm11, %v914_v29, %v1083_v14  ;;  %v7575_v58 = vld [vmem:[#allocation9 + $0x120] sm:$0xff] }
  0xc9   : > { %10212 = vst [vmem:[#allocation28_spill] sm:$0xff] %v10211_v0  ;;  %v1226_v11 = vsel %vm8703_vm14, %v1221_v18, %v8677_v31  ;;  %v825_v20 = vsel %vm761_vm10, %v8631_v15, %v793_v28  ;;  %v828_v12 = vsel %vm764_vm12, %v8634_v59, %v796_v41  ;;  %v829_v9 = vsel %vm765_vm13, %v8667_v46, %v797_v42 }
  0xca   : > { %1121 = vst [vmem:[#allocation2 + $0x98] sm:$0x11] %v1120_v5  ;;  %v894_v27 = vpack.c.bf16 %v825_v20, %v824_v44  ;;  %v8730_v57 = vpack.c.bf16 %v829_v9, %v828_v12  ;;  %v684_v49 = vmul.f32 %v8589_v40, %v8378_v19  ;;  %v8734_v53 = vunpack.c.l.b16 %v1226_v11  ;;  %v6551_v11 = vld [vmem:[#allocation2 + $0xc] sm:$0xf]  ;;  %v1143_v20 = vld [vmem:[#allocation2 + $0xd8] sm:$0x11]  ;;  %1748 = vmatpush.bf16.msrb.mxu2 %v7553_v4 }
  0xcb   : > { %1133 = vst [vmem:[#allocation2 + $0xb8] sm:$0x11] %v1132_v33  ;;  %v8740_v51 = vadd.f32 %v8603_v25, %v8615_v3  ;;  %v8746_v62 = vadd.f32 %v8603_v25, %v8619_v7  ;;  %v8749_v61 = vadd.f32 %v8603_v25, %v683_v8  ;;  %v8756_v22 = vmul.f32 %v8589_v40, %v8327_v1  ;;  %v7559_v33 = vld [vmem:[#allocation9 + $0xc0] sm:$0xff] }
  0xcc   : > { %1072 = vst [vmem:[#allocation2 + $0x28] sm:$0xff] %v1071_v55  ;;  %v987_v15 = vshrl.u32 %v894_v27, 16  ;;  %v990_v31 = vshll.u32 %v894_v27, 16  ;;  %v1003_v59 = vshrl.u32 %v8730_v57, 16  ;;  %v1006_v46 = vshll.u32 %v8730_v57, 16  ;;  %2299 = vmatpush.bf16.msrb.mxu1 %v7584_v30  ;;  %1926 = vmatpush.bf16.msrb.mxu3 %v7559_v33 }
  0xcd   : > { %1085 = vst [vmem:[#allocation2 + $0x38] sm:$0x11] %v1084_v47  ;;  %v8752_v37 = vadd.f32 %v8603_v25, %v684_v49  ;;  %v8760_v7 = vmul.f32 %v8589_v40, %v8330_v2  ;;  %vm744_vm9 = vcmp.ge.f32.partialorder %v8740_v51, 0.0  ;;  %2055 = vmatpush.bf16.msrb.mxu0 %v7575_v58  ;;  %vm745_vm15 = vcmp.ge.f32.partialorder %v8746_v62, 0.0 }
  0xce   : > { %v6559_v52 = vld [vmem:[#allocation2 + $0x8c] sm:$0xf]  ;;  %v1202_v19 = vld [vmem:[#allocation2 + $0x88] sm:$0xf]  ;;  %v8742_v60 = vrot.slane %v987_v15, 7  ;;  %v1005_v47 = vrot.slane %v1003_v59, 7 }
  0xcf   : > { %v7533_v63 = vld [vmem:[#allocation2 + $0xa8] sm:$0xf0]  ;;  %v1204_v3 = vld [vmem:[#allocation2 + $0xa8] sm:$0xf]  ;;  %v1270_v14 = vshrl.u32 %v1202_v19, 16  ;;  %v1273_v18 = vshll.u32 %v1202_v19, 16 }
  0xd0   : > { %v6560_v5 = vor.u32 %v7533_v63, %v6559_v52  ;;  %v1284_v28 = vshrl.u32 %v1204_v3, 16  ;;  %v1287_v16 = vshll.u32 %v1204_v3, 16  ;;  %v992_v32 = vor.u32 %v990_v31, %v8742_v60  ;;  %v7552_v15 = vld [vmem:[#allocation9 + $0x88] sm:$0xff]  ;;  %v7583_v59 = vld [vmem:[#allocation9 + $0x160] sm:$0xff] }
  0xd1   : > { %v8762_v10 = vld [vmem:[#allocation2 + $0x98] sm:$0x1]  ;;  %v1272_v36 = vrot.slane %v1270_v14, 4  ;;  %v1275_v41 = vrot.slane %v1273_v18, 5  ;;  %v994_v42 = vrot.slane %v8742_v60, 4  ;;  %v1008_v56 = vor.u32 %v1006_v46, %v1005_v47  ;;  %v8774_v18 = vld [vmem:[#allocation2] sm:$0xff]  ;;  %1749 = vmatpush.bf16.msrb.mxu2 %v7552_v15  ;;  %2300 = vmatpush.bf16.msrb.mxu1 %v7583_v59 }
  0xd2   : > { %v8765_v29 = vld [vmem:[#allocation2 + $0xb8] sm:$0x1]  ;;  %v1279_v1 = vshll.u32 %v8762_v10, 16  ;;  %1524 = vmatmul.bf16.vlgmr.msra.gmra.mxu3 %v6560_v5  ;;  %v1286_v2 = vrot.slane %v1284_v28, 4  ;;  %v1289_v44 = vrot.slane %v1287_v16, 5  ;;  %v1010_v60 = vrot.slane %v1005_v47, 4 }
  0xd3   : > { %v1293_v8 = vshll.u32 %v8765_v29, 16  ;;  %v1196_v55 = vld [vmem:[#allocation2 + $0x28] sm:$0xf]  ;;  %v1276_v12 = vor.u32 %v1275_v41, %v1272_v36  ;;  %v7531_v26 = vld [vmem:[#allocation2 + $0x28] sm:$0xf0]  ;;  %v1138_v30 = vsel %vm8673_vm7, %v992_v32, %v8774_v18  ;;  %v1150_v46 = vsel %vm8673_vm7, %v1008_v56, %v8774_v18 }
  0xd4   : > { %v1281_v9 = vrot.slane %v1279_v1, 5  ;;  %v8771_v27 = vld [vmem:[#allocation2 + $0x38] sm:$0x1]  ;;  %v1228_v57 = vshrl.u32 %v1196_v55, 16  ;;  %v1231_v49 = vshll.u32 %v1196_v55, 16  ;;  %v1290_v31 = vor.u32 %v1289_v44, %v1286_v2  ;;  %1139 = vst [vmem:[#allocation2 + $0xc8] sm:$0xff] %v1138_v30 }
  0xd5   : > { %v1295_v48 = vrot.slane %v1293_v8, 5  ;;  %v1237_v45 = vshll.u32 %v8771_v27, 16  ;;  %v1277_v52 = vrot.slane %v1276_v12, 4  ;;  %v1155_v63 = vld [vmem:[#allocation2 + $0xf8] sm:$0x11]  ;;  %v6552_v16 = vor.u32 %v7531_v26, %v6551_v11  ;;  %1151 = vst [vmem:[#allocation2 + $0xe8] sm:$0xff] %v1150_v46 }
  0xd6   : > { %v1230_v19 = vrot.slane %v1228_v57, 4  ;;  %v1233_v4 = vrot.slane %v1231_v49, 5  ;;  %v1291_v3 = vrot.slane %v1290_v31, 4  ;;  %v1144_v33 = vsel %vm8685_vm11, %v994_v42, %v1143_v20  ;;  %v7880_v44 = vld [vmem:[%s8308_s9 + $0x20] sm:$0xff]  ;;  %v7881_v55 = vld [vmem:[%s8308_s9 + $0x28] sm:$0xff] }
  0xd7   : > { %v1239_v14 = vrot.slane %v1237_v45, 5  ;;  %v1282_v5 = vsel %vm8703_vm14, %v1277_v52, %v1281_v9  ;;  %v1156_v32 = vsel %vm8685_vm11, %v1010_v60, %v1155_v63  ;;  %1514 = vmatmul.bf16.vlgmr.msra.gmra.mxu1 %v6552_v16  ;;  %1145 = vst [vmem:[#allocation2 + $0xd8] sm:$0x11] %v1144_v33  ;;  %vm748_vm0 = vcmp.ge.f32.partialorder %v8749_v61, 0.0  ;;  %v8807_v57 = vld [vmem:[#allocation2 + $0x8] sm:$0xe] }
  0xd8   : > { %v1234_v28 = vor.u32 %v1233_v4, %v1230_v19  ;;  %v1296_v58 = vsel %vm8703_vm14, %v1291_v3, %v1295_v48  ;;  %v1345_v36 = vunpack.c.l.b16 %v1282_v5  ;;  %vm749_vm2 = vcmp.ge.f32.partialorder %v8752_v37, 0.0  ;;  %1157 = vst [vmem:[#allocation2 + $0xf8] sm:$0x11] %v1156_v32  ;;  %v1781_v5 = vld [vmem:[#allocation2 + $0x28] sm:$0xe] }
  0xd9   : > { %v1346_v41 = vunpack.c.l.b16 %v1296_v58  ;;  %v776_v42 = vmul.f32 0.2, %v8740_v51  ;;  %v777_v2 = vmul.f32 0.2, %v8746_v62  ;;  %v8797_v8 = vmul.f32 %v7880_v44, %v8589_v40  ;;  %v1095_v32 = vld [vmem:[#allocation2 + $0x58] sm:$0x11] }
  0xda   : > { %v1235_v1 = vrot.slane %v1234_v28, 4  ;;  %v8801_v47 = vmul.f32 %v7881_v55, %v8589_v40  ;;  %v780_v12 = vmul.f32 0.2, %v8749_v61  ;;  %v781_v9 = vmul.f32 0.2, %v8752_v37  ;;  %v7574_v28 = vld [vmem:[#allocation9 + $0x118] sm:$0xff] }
  0xdb   : > { %v1351_v11 = vpack.c.b16 %v1346_v41, %v1345_v36  ;;  %v808_v15 = vsel %vm744_vm9, %v8740_v51, %v776_v42  ;;  %v809_v31 = vsel %vm745_vm15, %v8746_v62, %v777_v2  ;;  %vm1805_vm5 = vcmask 1046532   ;;  %v6563_v59 = vld [vmem:[#allocation2 + $0xcc] sm:$0xf]  ;;  %v1206_v51 = vld [vmem:[#allocation2 + $0xc8] sm:$0xf]  ;;  %2056 = vmatpush.bf16.msrb.mxu0 %v7574_v28  ;;  %v7551_v44 = vld [vmem:[#allocation9 + $0x80] sm:$0xff] }
  0xdc   : > { %v1240_v20 = vsel %vm8703_vm14, %v1235_v1, %v1239_v14  ;;  %v812_v48 = vsel %vm748_vm0, %v8749_v61, %v780_v12  ;;  %v813_v45 = vsel %vm749_vm2, %v8752_v37, %v781_v9  ;;  %v886_v56 = vpack.c.bf16 %v809_v31, %v808_v15  ;;  %v7534_v4 = vld [vmem:[#allocation2 + $0xe8] sm:$0xf0]  ;;  %v1208_v61 = vld [vmem:[#allocation2 + $0xe8] sm:$0xf]  ;;  %vm8840_vm6 = vmor %vm1804_vm4, %vm1805_vm5  ;;  %1750 = vmatpush.bf16.msrb.mxu2 %v7551_v44 }
  0xdd   : > { %v1342_v49 = vunpack.c.l.b16 %v1240_v20  ;;  %1423 = vmatmul.bf16.vlgmr.msra.gmra.mxu2 %v1351_v11  ;;  %v6629_v52 = vrot.slane %v8807_v57, 9  ;;  %v1809_v62 = vrot.slane %v8649_v21, 5  ;;  %v8826_v19 = vadd.f32 %v8603_v25, %v8756_v22  ;;  %v7582_v55 = vld [vmem:[#allocation9 + $0x158] sm:$0xff]  ;;  %v7573_v57 = vld [vmem:[#allocation9 + $0x110] sm:$0xff]  ;;  %v7572_v28 = vld [vmem:[#allocation9 + $0x108] sm:$0xff] }
  0xde   : > { %v1298_v60 = vshrl.u32 %v1206_v51, 16  ;;  %v1301_v63 = vshll.u32 %v1206_v51, 16  ;;  %v888_v3 = vpack.c.bf16 %v813_v45, %v812_v48  ;;  %v8830_v37 = vadd.f32 %v8603_v25, %v8760_v7  ;;  %v8832_v14 = vld [vmem:[#allocation2 + $0xd8] sm:$0x1]  ;;  %2301 = vmatpush.bf16.msrb.mxu1 %v7582_v55 }
  0xdf   : > { %v1349_v26 = vpack.c.b16 %v1342_v49, %v8734_v53  ;;  %v6564_v53 = vor.u32 %v7534_v4, %v6563_v59  ;;  %v1312_v30 = vshrl.u32 %v1208_v61, 16  ;;  %v1315_v46 = vshll.u32 %v1208_v61, 16  ;;  %v8834_v22 = vld [vmem:[#allocation2 + $0xf8] sm:$0x1]  ;;  %v7594_v49 = vld [vmem:[#allocation9 + $0x1b8] sm:$0xff]  ;;  %2057 = vmatpush.bf16.msrb.mxu0 %v7573_v57 }
  0xe0   : > { %v923_v21 = vshrl.u32 %v886_v56, 16  ;;  %v1300_v16 = vrot.slane %v1298_v60, 4  ;;  %v1303_v33 = vrot.slane %v1301_v63, 5  ;;  %v1307_v58 = vshll.u32 %v8832_v14, 16  ;;  %v1535_v60 = vld [vmem:[#allocation2 + $0xc] sm:$0xf]  ;;  %2542 = vmatpush.bf16.msra.mxu2 %v7594_v49 }
  0xe1   : > { %1413 = vmatmul.bf16.vlgmr.msra.gmra.mxu0 %v1349_v26  ;;  %v926_v36 = vshll.u32 %v886_v56, 16  ;;  %v1314_v7 = vrot.slane %v1312_v30, 4  ;;  %v1317_v41 = vrot.slane %v1315_v46, 5  ;;  %v1321_v1 = vshll.u32 %v8834_v22, 16  ;;  %v7581_v56 = vld [vmem:[#allocation9 + $0x150] sm:$0xff]  ;;  %v7602_v26 = vld [vmem:[#allocation9 + $0x1f8] sm:$0xff] }
  0xe2   : > { %1529 = vmatmul.bf16.gmra.mxu3 %v6564_v53  ;;  %v925_v42 = vrot.slane %v923_v21, 7  ;;  %v10213_v2 = vmov 0  ;;  %v1304_v11 = vor.u32 %v1303_v33, %v1300_v16  ;;  %v1309_v20 = vrot.slane %v1307_v58, 5  ;;  %v7593_v63 = vld [vmem:[#allocation9 + $0x1b0] sm:$0xff]  ;;  %v1107_v46 = vld [vmem:[#allocation2 + $0x78] sm:$0x11]  ;;  %2302 = vmatpush.bf16.msrb.mxu1 %v7581_v56 }
  0xe3   : > { %v10214_v2 = vsel %vm8840_vm6, 4294967295, %v10213_v2  ;;  %v939_v12 = vshrl.u32 %v888_v3, 16  ;;  %v942_v9 = vshll.u32 %v888_v3, 16  ;;  %v1318_v15 = vor.u32 %v1317_v41, %v1314_v7  ;;  %2715 = vmatpush.bf16.msra.mxu3 %v7602_v26  ;;  %v1536_v33 = vld [vmem:[#allocation2 + $0x1c] sm:$0x1]  ;;  %2058 = vmatpush.bf16.msrb.mxu0 %v7572_v28  ;;  %v7571_v49 = vld [vmem:[#allocation9 + $0x100] sm:$0xff] }
  0xe4   : > { %10215 = vst [vmem:[#allocation29_spill] sm:$0xff] %v10214_v2  ;;  %v1323_v31 = vrot.slane %v1321_v1, 5  ;;  %v928_v48 = vor.u32 %v926_v36, %v925_v42  ;;  %v930_v45 = vrot.slane %v925_v42, 4  ;;  %v1305_v59 = vrot.slane %v1304_v11, 4  ;;  %v1537_v58 = vld [vmem:[#allocation2 + $0x2c] sm:$0xf]  ;;  %2543 = vmatpush.bf16.msra.mxu2 %v7593_v63 }
  0xe5   : > { %v941_v51 = vrot.slane %v939_v12, 7  ;;  %v1810_v4 = vsel %vm8840_vm6, %v6629_v52, %v1809_v62  ;;  %v6630_v61 = vrot.slane %v1781_v5, 9  ;;  %v1319_v3 = vrot.slane %v1318_v15, 4  ;;  %v7580_v1 = vld [vmem:[#allocation9 + $0x148] sm:$0xff] }
  0xe6   : > { %v1090_v53 = vsel %vm8673_vm7, %v928_v48, %v8774_v18  ;;  %v1096_v30 = vsel %vm8685_vm11, %v930_v45, %v1095_v32  ;;  %v1813_v21 = vrot.slane %v8771_v27, 5  ;;  %v1310_v52 = vsel %vm8703_vm14, %v1305_v59, %v1309_v20  ;;  %v1538_v32 = vld [vmem:[#allocation2 + $0x3c] sm:$0x1]  ;;  %2303 = vmatpush.bf16.msrb.mxu1 %v7580_v1  ;;  %v7579_v59 = vld [vmem:[#allocation9 + $0x140] sm:$0xff] }
  0xe7   : > { %v944_v62 = vor.u32 %v942_v9, %v941_v51  ;;  %v946_v5 = vrot.slane %v941_v51, 4  ;;  %1091 = vst [vmem:[#allocation2 + $0x48] sm:$0xff] %v1090_v53  ;;  %v1855_v16 = vunpack.c.l.b16 %v1810_v4  ;;  %v1324_v36 = vsel %vm8703_vm14, %v1319_v3, %v1323_v31  ;;  %2059 = vmatpush.bf16.msrb.mxu0 %v7571_v49 }
  0xe8   : > { %v1347_v7 = vunpack.c.l.b16 %v1310_v52  ;;  %1097 = vst [vmem:[#allocation2 + $0x58] sm:$0x11] %v1096_v30  ;;  %v1814_v27 = vsel %vm8840_vm6, %v6630_v61, %v1813_v21  ;;  %v1552_v41 = vshrl.u32 %v1535_v60, 16  ;;  %v1348_v42 = vunpack.c.l.b16 %v1324_v36  ;;  %v7884_v52 = vld [vmem:[%s8308_s9 + $0x60] sm:$0xff] }
  0xe9   : > { %v1102_v44 = vsel %vm8673_vm7, %v944_v62, %v8774_v18  ;;  %v1108_v55 = vsel %vm8685_vm11, %v946_v5, %v1107_v46  ;;  %v1856_v11 = vunpack.c.l.b16 %v1814_v27  ;;  %v1555_v12 = vshll.u32 %v1535_v60, 16  ;;  %v7882_v46 = vld [vmem:[%s8308_s9 + $0x40] sm:$0xff] }
  0xea   : > { %1103 = vst [vmem:[#allocation2 + $0x68] sm:$0xff] %v1102_v44  ;;  %v1554_v20 = vrot.slane %v1552_v41, 4  ;;  %v1561_v9 = vshll.u32 %v1536_v33, 16  ;;  %v1566_v57 = vshrl.u32 %v1537_v58, 16  ;;  %v1352_v15 = vpack.c.b16 %v1348_v42, %v1347_v7  ;;  %v7601_v7 = vld [vmem:[#allocation9 + $0x1f0] sm:$0xff]  ;;  %2304 = vmatpush.bf16.msrb.mxu1 %v7579_v59 }
  0xeb   : > { %1109 = vst [vmem:[#allocation2 + $0x78] sm:$0x11] %v1108_v55  ;;  %v1569_v31 = vshll.u32 %v1537_v58, 16  ;;  %v1575_v48 = vshll.u32 %v1538_v32, 16  ;;  %v8865_v45 = vadd.f32 %v8603_v25, %v8797_v8  ;;  %v1557_v56 = vrot.slane %v1555_v12, 5  ;;  %2716 = vmatpush.bf16.msra.mxu3 %v7601_v7 }
  0xec   : > { %v1568_v26 = vrot.slane %v1566_v57, 4  ;;  %v8869_v51 = vadd.f32 %v8603_v25, %v8801_v47  ;;  %v1863_v4 = vpack.c.b16 %v1856_v11, %v1855_v16  ;;  %v1563_v61 = vrot.slane %v1561_v9, 5  ;;  %v7883_v47 = vld [vmem:[%s8308_s9 + $0x48] sm:$0xff] }
  0xed   : > { %1428 = vmatmul.bf16.gmra.mxu2 %v1352_v15  ;;  %v1571_v60 = vrot.slane %v1569_v31, 5  ;;  %v1577_v63 = vrot.slane %v1575_v48, 5  ;;  %v1558_v8 = vor.u32 %v1557_v56, %v1554_v20  ;;  %vm738_vm8 = vcmp.ge.f32.partialorder %v8826_v19, 0.0  ;;  %v7885_v11 = vld [vmem:[%s8308_s9 + $0x68] sm:$0xff] }
  0xee   : > { %v1198_v3 = vld [vmem:[#allocation2 + $0x48] sm:$0xf]  ;;  %v6555_v53 = vld [vmem:[#allocation2 + $0x4c] sm:$0xf]  ;;  %vm739_vm10 = vcmp.ge.f32.partialorder %v8830_v37, 0.0  ;;  %v681_v21 = vmul.f32 %v7882_v46, %v8589_v40  ;;  %v8877_v28 = vmul.f32 %v7883_v47, %v8589_v40  ;;  %v8881_v62 = vmul.f32 %v7884_v52, %v8589_v40 }
  0xef   : > { %v1782_v30 = vld [vmem:[#allocation2 + $0x48] sm:$0xe]  ;;  %v1199_v5 = vld [vmem:[#allocation2 + $0x58] sm:$0x1]  ;;  %v1242_v16 = vshrl.u32 %v1198_v3, 16  ;;  %v1245_v33 = vshll.u32 %v1198_v3, 16  ;;  %v1572_v58 = vor.u32 %v1571_v60, %v1568_v26  ;;  %v8887_v20 = vmul.f32 %v7885_v11, %v8589_v40 }
  0xf0   : > { %v6631_v36 = vrot.slane %v1782_v30, 9  ;;  %vm742_vm12 = vcmp.ge.f32.partialorder %v8865_v45, 0.0  ;;  %v1251_v27 = vshll.u32 %v1199_v5, 16  ;;  %v1559_v32 = vrot.slane %v1558_v8, 4 }
  0xf1   : > { %v1817_v41 = vrot.slane %v1199_v5, 5  ;;  %vm743_vm13 = vcmp.ge.f32.partialorder %v8869_v51, 0.0  ;;  %v1200_v1 = vld [vmem:[#allocation2 + $0x68] sm:$0xf]  ;;  %v1244_v42 = vrot.slane %v1242_v16, 4  ;;  %v1247_v44 = vrot.slane %v1245_v33, 5 }
  0xf2   : > { %v7532_v55 = vld [vmem:[#allocation2 + $0x68] sm:$0xf0]  ;;  %v8890_v12 = vadd.f32 %v8603_v25, %v681_v21  ;;  %v1201_v9 = vld [vmem:[#allocation2 + $0x78] sm:$0x1]  ;;  %v1253_v57 = vrot.slane %v1251_v27, 5  ;;  %v1256_v49 = vshrl.u32 %v1200_v1, 16  ;;  %1927 = vmatmul.bf16.vlgmr.msrb.gmra.mxu3 %v1863_v4  ;;  %v1564_v26 = vsel %vm8703_vm14, %v1559_v32, %v1563_v61 }
  0xf3   : > { %v1259_v15 = vshll.u32 %v1200_v1, 16  ;;  %v6556_v31 = vor.u32 %v7532_v55, %v6555_v53  ;;  %v1248_v48 = vor.u32 %v1247_v44, %v1244_v42  ;;  %v1265_v56 = vshll.u32 %v1201_v9, 16  ;;  %v1783_v60 = vld [vmem:[#allocation2 + $0x68] sm:$0xe]  ;;  %v1539_v61 = vld [vmem:[#allocation2 + $0x4c] sm:$0xf] }
  0xf4   : > { %v1573_v59 = vrot.slane %v1572_v58, 4  ;;  %v1258_v3 = vrot.slane %v1256_v49, 4  ;;  %v1679_v30 = vunpack.c.l.b16 %v1564_v26  ;;  %v1818_v46 = vsel %vm8840_vm6, %v6631_v36, %v1817_v41 }
  0xf5   : > { %v1261_v8 = vrot.slane %v1259_v15, 5  ;;  %1519 = vmatmul.bf16.gmra.mxu1 %v6556_v31  ;;  %v1249_v21 = vrot.slane %v1248_v48, 4  ;;  %v1267_v47 = vrot.slane %v1265_v56, 5  ;;  %v6632_v53 = vrot.slane %v1783_v60, 9  ;;  %v1540_v15 = vld [vmem:[#allocation2 + $0x5c] sm:$0x1] }
  0xf6   : > { %v1578_v4 = vsel %vm8703_vm14, %v1573_v59, %v1577_v63  ;;  %v1821_v16 = vrot.slane %v1201_v9, 5  ;;  %v1857_v33 = vunpack.c.l.b16 %v1818_v46  ;;  %v770_v7 = vmul.f32 0.2, %v8826_v19  ;;  %v1541_v31 = vld [vmem:[#allocation2 + $0x6c] sm:$0xf]  ;;  %v7592_v60 = vld [vmem:[#allocation9 + $0x1a8] sm:$0xff] }
  0xf7   : > { %v1262_v52 = vor.u32 %v1261_v8, %v1258_v3  ;;  %v1680_v5 = vunpack.c.l.b16 %v1578_v4  ;;  %v1254_v58 = vsel %vm8703_vm14, %v1249_v21, %v1253_v57  ;;  %v771_v27 = vmul.f32 0.2, %v8830_v37  ;;  %v1542_v46 = vld [vmem:[#allocation2 + $0x7c] sm:$0x1]  ;;  %2544 = vmatpush.bf16.msra.mxu2 %v7592_v60 }
  0xf8   : > { %v774_v36 = vmul.f32 0.2, %v8865_v45  ;;  %v1343_v41 = vunpack.c.l.b16 %v1254_v58  ;;  %v1822_v63 = vsel %vm8840_vm6, %v6632_v53, %v1821_v16  ;;  %v775_v44 = vmul.f32 0.2, %v8869_v51 }
  0xf9   : > { %v1263_v32 = vrot.slane %v1262_v52, 4  ;;  %v1687_v1 = vpack.c.b16 %v1680_v5, %v1679_v30  ;;  %v1858_v42 = vunpack.c.l.b16 %v1822_v63  ;;  %v802_v55 = vsel %vm738_vm8, %v8826_v19, %v770_v7  ;;  %v7591_v5 = vld [vmem:[#allocation9 + $0x1a0] sm:$0xff] }
  0xfa   : > { %v803_v11 = vsel %vm739_vm10, %v8830_v37, %v771_v27  ;;  %v806_v57 = vsel %vm742_vm12, %v8865_v45, %v774_v36  ;;  %v1580_v48 = vshrl.u32 %v1539_v61, 16  ;;  %v807_v19 = vsel %vm743_vm13, %v8869_v51, %v775_v44  ;;  %v7600_v37 = vld [vmem:[#allocation9 + $0x1e8] sm:$0xff]  ;;  %v1080_v45 = vld [vmem:[#allocation2 + $0x30] sm:$0x11] }
  0xfb   : > { %v1268_v9 = vsel %vm8703_vm14, %v1263_v32, %v1267_v47  ;;  %v883_v49 = vpack.c.bf16 %v803_v11, %v802_v55  ;;  %v1864_v26 = vpack.c.b16 %v1858_v42, %v1857_v33  ;;  %v1583_v59 = vshll.u32 %v1539_v61, 16  ;;  %2717 = vmatpush.bf16.msra.mxu3 %v7600_v37  ;;  %v1784_v61 = vld [vmem:[#allocation2 + $0x88] sm:$0xe]  ;;  %v1092_v7 = vld [vmem:[#allocation2 + $0x50] sm:$0x11]  ;;  %2545 = vmatpush.bf16.msra.mxu2 %v7591_v5 }
  0xfc   : > { %v1344_v56 = vunpack.c.l.b16 %v1268_v9  ;;  %v885_v3 = vpack.c.bf16 %v807_v19, %v806_v57  ;;  %v1582_v21 = vrot.slane %v1580_v48, 4  ;;  %v1589_v53 = vshll.u32 %v1540_v15, 16  ;;  %v1785_v55 = vld [vmem:[#allocation2 + $0xa8] sm:$0xe]  ;;  %v7599_v15 = vld [vmem:[#allocation9 + $0x1e0] sm:$0xff] }
  0xfd   : > { %v900_v8 = vshrl.u32 %v883_v49, 16  ;;  %v903_v30 = vshll.u32 %v883_v49, 16  ;;  %1751 = vmatmul.bf16.vlgmr.msrb.gmra.mxu2 %v1687_v1  ;;  %v1585_v4 = vrot.slane %v1583_v59, 5  ;;  %v1594_v52 = vshrl.u32 %v1541_v31, 16 }
  0xfe   : > { %v1350_v47 = vpack.c.b16 %v1344_v56, %v1343_v41  ;;  %v916_v33 = vshrl.u32 %v885_v3, 16  ;;  %v919_v58 = vshll.u32 %v885_v3, 16  ;;  %v1597_v51 = vshll.u32 %v1541_v31, 16 }
  0xff   : > { %v902_v16 = vrot.slane %v900_v8, 7  ;;  %v1586_v27 = vor.u32 %v1585_v4, %v1582_v21  ;;  %v1591_v36 = vrot.slane %v1589_v53, 5  ;;  %v1596_v32 = vrot.slane %v1594_v52, 4  ;;  %2718 = vmatpush.bf16.msra.mxu3 %v7599_v15  ;;  %v8940_v4 = vld [vmem:[#allocation2 + $0x8c] sm:$0xf] }
 0x100   : > { %1418 = vmatmul.bf16.gmra.mxu0 %v1350_v47  ;;  %v1603_v63 = vshll.u32 %v1542_v46, 16  ;;  %v918_v42 = vrot.slane %v916_v33, 7  ;;  %v1599_v44 = vrot.slane %v1597_v51, 5  ;;  %v6633_v57 = vrot.slane %v1784_v61, 9 }
 0x101   : > { %v905_v41 = vor.u32 %v903_v30, %v902_v16  ;;  %v913_v1 = vrot.slane %v902_v16, 4  ;;  %v1587_v11 = vrot.slane %v1586_v27, 4  ;;  %v1825_v49 = vrot.slane %v8762_v10, 5 }
 0x102   : > { %v1605_v9 = vrot.slane %v1603_v63, 5  ;;  %1932 = vmatmul.bf16.gmra.mxu3 %v1864_v26  ;;  %v921_v31 = vor.u32 %v919_v58, %v918_v42  ;;  %v929_v48 = vrot.slane %v918_v42, 4  ;;  %v1600_v60 = vor.u32 %v1599_v44, %v1596_v32 }
 0x103   : > { %v1068_v56 = vsel %vm8673_vm7, %v905_v41, %v8774_v18  ;;  %v1081_v19 = vsel %vm8685_vm11, %v913_v1, %v1080_v45  ;;  %v1592_v59 = vsel %vm8703_vm14, %v1587_v11, %v1591_v36  ;;  %v1826_v10 = vsel %vm8840_vm6, %v6633_v57, %v1825_v49 }
 0x104   : > { %1069 = vst [vmem:[#allocation2 + $0x20] sm:$0xff] %v1068_v56  ;;  %v6634_v37 = vrot.slane %v1785_v55, 9  ;;  %v1087_v26 = vsel %vm8673_vm7, %v921_v31, %v8774_v18  ;;  %v1093_v3 = vsel %vm8685_vm11, %v929_v48, %v1092_v7  ;;  %v1681_v8 = vunpack.c.l.b16 %v1592_v59  ;;  %v7886_v31 = vld [vmem:[%s8308_s9 + $0x80] sm:$0xff] }
 0x105   : > { %1082 = vst [vmem:[#allocation2 + $0x30] sm:$0x11] %v1081_v19  ;;  %v1829_v30 = vrot.slane %v8765_v29, 5  ;;  %v1601_v46 = vrot.slane %v1600_v60, 4  ;;  %v1859_v21 = vunpack.c.l.b16 %v1826_v10  ;;  %v715_v47 = vadd.f32 %v8603_v25, %v8877_v28 }
 0x106   : > { %1088 = vst [vmem:[#allocation2 + $0x40] sm:$0xff] %v1087_v26  ;;  %v718_v45 = vadd.f32 %v8603_v25, %v8881_v62  ;;  %v719_v52 = vadd.f32 %v8603_v25, %v8887_v20  ;;  %vm746_vm9 = vcmp.ge.f32.partialorder %v8890_v12, 0.0  ;;  %v778_v29 = vmul.f32 0.2, %v8890_v12  ;;  %v7590_v26 = vld [vmem:[#allocation9 + $0x198] sm:$0xff] }
 0x107   : > { %1094 = vst [vmem:[#allocation2 + $0x50] sm:$0x11] %v1093_v3  ;;  %v1830_v53 = vsel %vm8840_vm6, %v6634_v37, %v1829_v30  ;;  %v1606_v5 = vsel %vm8703_vm14, %v1601_v46, %v1605_v9  ;;  %vm747_vm15 = vcmp.ge.f32.partialorder %v715_v47, 0.0  ;;  %v779_v16 = vmul.f32 0.2, %v715_v47  ;;  %2546 = vmatpush.bf16.msra.mxu2 %v7590_v26 }
 0x108   : > { %v1860_v28 = vunpack.c.l.b16 %v1830_v53  ;;  %vm750_vm0 = vcmp.ge.f32.partialorder %v718_v45, 0.0  ;;  %v1682_v62 = vunpack.c.l.b16 %v1606_v5  ;;  %vm751_vm2 = vcmp.ge.f32.partialorder %v719_v52, 0.0  ;;  %v8964_v37 = vld [vmem:[#allocation2 + $0xac] sm:$0xf]  ;;  %v1787_v26 = vld [vmem:[#allocation2 + $0xe8] sm:$0xe] }
 0x109   : > { %v782_v33 = vmul.f32 0.2, %v718_v45  ;;  %v783_v51 = vmul.f32 0.2, %v719_v52  ;;  %v810_v61 = vsel %vm746_vm9, %v8890_v12, %v778_v29  ;;  %v1608_v20 = vshrl.u32 %v8940_v4, 16  ;;  %v7589_v29 = vld [vmem:[#allocation9 + $0x190] sm:$0xff] }
 0x10a   : > { %v1865_v58 = vpack.c.b16 %v1860_v28, %v1859_v21  ;;  %v1688_v36 = vpack.c.b16 %v1682_v62, %v1681_v8  ;;  %v811_v32 = vsel %vm747_vm15, %v715_v47, %v779_v16  ;;  %v1611_v41 = vshll.u32 %v8940_v4, 16  ;;  %v7598_v21 = vld [vmem:[#allocation9 + $0x1d8] sm:$0xff] }
 0x10b   : > { %v6671_v7 = vld [vmem:[#allocation2 + $0x24] sm:$0xf]  ;;  %v2089_v27 = vld [vmem:[#allocation2 + $0x20] sm:$0xf]  ;;  %v814_v63 = vsel %vm750_vm0, %v718_v45, %v782_v33  ;;  %v815_v55 = vsel %vm751_vm2, %v719_v52, %v783_v51  ;;  %v887_v11 = vpack.c.bf16 %v811_v32, %v810_v61  ;;  %v8960_v48 = vmul.f32 %v7886_v31, %v8589_v40  ;;  %v1544_v52 = vld [vmem:[#allocation2 + $0x9c] sm:$0x1]  ;;  %2719 = vmatpush.bf16.msra.mxu3 %v7598_v21 }
 0x10c   : > { %v8953_v1 = vld [vmem:[#allocation2 + $0x30] sm:$0x1]  ;;  %v2106_v42 = vshrl.u32 %v2089_v27, 16  ;;  %v2109_v44 = vshll.u32 %v2089_v27, 16  ;;  %v889_v15 = vpack.c.bf16 %v815_v55, %v814_v63  ;;  %v1610_v61 = vrot.slane %v1608_v20, 4  ;;  %2547 = vmatpush.bf16.msra.mxu2 %v7589_v29 }
 0x10d   : > { %v7567_v9 = vld [vmem:[#allocation2 + $0x40] sm:$0xf0]  ;;  %v2091_v57 = vld [vmem:[#allocation2 + $0x40] sm:$0xf]  ;;  %v2115_v12 = vshll.u32 %v8953_v1, 16  ;;  %v2605_v49 = vrot.slane %v8953_v1, 5  ;;  %1756 = vmatmul.bf16.gmra.mxu2 %v1688_v36 }
 0x10e   : > { %v6672_v56 = vor.u32 %v7567_v9, %v6671_v7  ;;  %v8962_v19 = vld [vmem:[#allocation2 + $0x50] sm:$0x1]  ;;  %v2108_v59 = vrot.slane %v2106_v42, 4  ;;  %v2111_v60 = vrot.slane %v2109_v44, 5  ;;  %v2120_v10 = vshrl.u32 %v2091_v57, 16 }
 0x10f   : > { %v2117_v3 = vrot.slane %v2115_v12, 5  ;;  %v2123_v8 = vshll.u32 %v2091_v57, 16  ;;  %v2129_v30 = vshll.u32 %v8962_v19, 16  ;;  %v2609_v46 = vrot.slane %v8962_v19, 5  ;;  %v1104_v32 = vld [vmem:[#allocation2 + $0x70] sm:$0x11] }
 0x110   : > { %2060 = vmatmul.bf16.vlgmr.msrb.gmra.mxu0 %v6672_v56  ;;  %v2112_v47 = vor.u32 %v2111_v60, %v2108_v59  ;;  %v2122_v45 = vrot.slane %v2120_v10, 4  ;;  %v932_v4 = vshrl.u32 %v887_v11, 16  ;;  %v935_v53 = vshll.u32 %v887_v11, 16  ;;  %v1116_v9 = vld [vmem:[#allocation2 + $0x90] sm:$0x11] }
 0x111   : > { %v2125_v5 = vrot.slane %v2123_v8, 5  ;;  %v2131_v28 = vrot.slane %v2129_v30, 5  ;;  %v948_v62 = vshrl.u32 %v889_v15, 16  ;;  %v951_v16 = vshll.u32 %v889_v15, 16  ;;  %v1786_v10 = vld [vmem:[#allocation2 + $0xc8] sm:$0xe] }
 0x112   : > { %v2113_v33 = vrot.slane %v2112_v47, 4  ;;  %v934_v51 = vrot.slane %v932_v4, 7  ;;  %v1613_v7 = vrot.slane %v1611_v41, 5  ;;  %1937 = vmatmul.bf16.gmra.mxu3 %v1865_v58  ;;  %v1617_v63 = vshll.u32 %v1544_v52, 16  ;;  %v1546_v41 = vld [vmem:[#allocation2 + $0xbc] sm:$0x1] }
 0x113   : > { %v2126_v27 = vor.u32 %v2125_v5, %v2122_v45  ;;  %v950_v36 = vrot.slane %v948_v62, 7  ;;  %v1622_v42 = vshrl.u32 %v8964_v37, 16  ;;  %v1625_v4 = vshll.u32 %v8964_v37, 16 }
 0x114   : > { %v2118_v44 = vsel %vm8703_vm14, %v2113_v33, %v2117_v3  ;;  %v937_v55 = vor.u32 %v935_v53, %v934_v51  ;;  %v945_v11 = vrot.slane %v934_v51, 4  ;;  %v1614_v57 = vor.u32 %v1613_v7, %v1610_v61  ;;  %v7887_v7 = vld [vmem:[%s8308_s9 + $0x88] sm:$0xff] }
 0x115   : > { %v2127_v12 = vrot.slane %v2126_v27, 4  ;;  %v2233_v15 = vunpack.c.l.b16 %v2118_v44  ;;  %v953_v31 = vor.u32 %v951_v16, %v950_v36  ;;  %v961_v20 = vrot.slane %v950_v36, 4  ;;  %v7888_v27 = vld [vmem:[%s8308_s9 + $0xa0] sm:$0xff] }
 0x116   : > { %v1099_v58 = vsel %vm8673_vm7, %v937_v55, %v8774_v18  ;;  %v1105_v56 = vsel %vm8685_vm11, %v945_v11, %v1104_v32  ;;  %v1615_v59 = vrot.slane %v1614_v57, 4  ;;  %v1619_v60 = vrot.slane %v1617_v63, 5  ;;  %v7889_v32 = vld [vmem:[%s8308_s9 + $0xa8] sm:$0xff]  ;;  %v7597_v55 = vld [vmem:[#allocation9 + $0x1d0] sm:$0xff]  ;;  %v7614_v11 = vld [vmem:[#allocation9 + $0x238] sm:$0xff] }
 0x117   : > { %v2132_v3 = vsel %vm8703_vm14, %v2127_v12, %v2131_v28  ;;  %1100 = vst [vmem:[#allocation2 + $0x60] sm:$0xff] %v1099_v58  ;;  %v1111_v8 = vsel %vm8673_vm7, %v953_v31, %v8774_v18  ;;  %v1117_v30 = vsel %vm8685_vm11, %v961_v20, %v1116_v9  ;;  %v1624_v21 = vrot.slane %v1622_v42, 4  ;;  %2720 = vmatpush.bf16.msra.mxu3 %v7597_v55  ;;  %v7890_v58 = vld [vmem:[%s8308_s9 + $0xc0] sm:$0xff] }
 0x118   : > { %v2234_v47 = vunpack.c.l.b16 %v2132_v3  ;;  %1112 = vst [vmem:[#allocation2 + $0x80] sm:$0xff] %v1111_v8  ;;  %v1620_v45 = vsel %vm8703_vm14, %v1615_v59, %v1619_v60  ;;  %v1631_v53 = vshll.u32 %v1546_v41, 16  ;;  %v6635_v29 = vrot.slane %v1786_v10, 9  ;;  %2848 = vmatpush.bf16.msra.mxu0 %v7614_v11 }
 0x119   : > { %1106 = vst [vmem:[#allocation2 + $0x70] sm:$0x11] %v1105_v56  ;;  %v8986_v52 = vunpack.c.l.b16 %v1620_v45  ;;  %v1833_v5 = vrot.slane %v8832_v14, 5  ;;  %v6636_v28 = vrot.slane %v1787_v26, 9  ;;  %v1627_v16 = vrot.slane %v1625_v4, 5  ;;  %v7891_v56 = vld [vmem:[%s8308_s9 + $0xc8] sm:$0xff] }
 0x11a   : > { %v2241_v62 = vpack.c.b16 %v2234_v47, %v2233_v15  ;;  %1118 = vst [vmem:[#allocation2 + $0x90] sm:$0x11] %v1117_v30  ;;  %v1633_v33 = vrot.slane %v1631_v53, 5  ;;  %v1837_v51 = vrot.slane %v8834_v22, 5  ;;  %v690_v37 = vmul.f32 %v7887_v7, %v8589_v40  ;;  %v7892_v30 = vld [vmem:[%s8308_s9 + $0xe0] sm:$0xff] }
 0x11b   : > { %v1834_v61 = vsel %vm8840_vm6, %v6635_v29, %v1833_v5  ;;  %v693_v36 = vmul.f32 %v7888_v27, %v8589_v40  ;;  %v694_v63 = vmul.f32 %v7889_v32, %v8589_v40  ;;  %v1628_v14 = vor.u32 %v1627_v16, %v1624_v21  ;;  %v1547_v27 = vld [vmem:[#allocation2 + $0xcc] sm:$0xf] }
 0x11c   : > { %2305 = vmatmul.bf16.vlgmr.msrb.gmra.mxu1 %v2241_v62  ;;  %v1838_v42 = vsel %vm8840_vm6, %v6636_v28, %v1837_v51  ;;  %v1861_v44 = vunpack.c.l.b16 %v1834_v61  ;;  %v722_v22 = vadd.f32 %v8603_v25, %v8960_v48  ;;  %v723_v57 = vadd.f32 %v8603_v25, %v690_v37 }
 0x11d   : > { %v1862_v9 = vunpack.c.l.b16 %v1838_v42  ;;  %v726_v12 = vadd.f32 %v8603_v25, %v693_v36  ;;  %v9005_v15 = vadd.f32 %v8603_v25, %v694_v63  ;;  %v1629_v41 = vrot.slane %v1628_v14, 4 }
 0x11e   : > { %v6675_v31 = vld [vmem:[#allocation2 + $0x64] sm:$0xf]  ;;  %v2093_v20 = vld [vmem:[#allocation2 + $0x60] sm:$0xf]  ;;  %vm754_vm4 = vcmp.ge.f32.partialorder %v722_v22, 0.0  ;;  %v9009_v48 = vmul.f32 %v7890_v58, %v8589_v40  ;;  %v9013_v59 = vmul.f32 %v7891_v56, %v8589_v40  ;;  %v9017_v21 = vmul.f32 %v7892_v30, %v8589_v40  ;;  %v7622_v56 = vld [vmem:[#allocation9 + $0x278] sm:$0xff] }
 0x11f   : > { %v7568_v60 = vld [vmem:[#allocation2 + $0x80] sm:$0xf0]  ;;  %v2095_v10 = vld [vmem:[#allocation2 + $0x80] sm:$0xf]  ;;  %v2134_v26 = vshrl.u32 %v2093_v20, 16  ;;  %v2137_v3 = vshll.u32 %v2093_v20, 16  ;;  %v1866_v8 = vpack.c.b16 %v1862_v9, %v1861_v44  ;;  %v1634_v29 = vsel %vm8703_vm14, %v1629_v41, %v1633_v33  ;;  %3093 = vmatpush.bf16.msra.mxu1 %v7622_v56 }
 0x120   : > { %v6676_v47 = vor.u32 %v7568_v60, %v6675_v31  ;;  %v9019_v45 = vld [vmem:[#allocation2 + $0x70] sm:$0x1]  ;;  %v2148_v4 = vshrl.u32 %v2095_v10, 16  ;;  %v2151_v53 = vshll.u32 %v2095_v10, 16  ;;  %v1684_v51 = vunpack.c.l.b16 %v1634_v29  ;;  %v1548_v44 = vld [vmem:[#allocation2 + $0xdc] sm:$0x1] }
 0x121   : > { %v9023_v5 = vld [vmem:[#allocation2 + $0x90] sm:$0x1]  ;;  %v2136_v28 = vrot.slane %v2134_v26, 4  ;;  %v2139_v62 = vrot.slane %v2137_v3, 5  ;;  %v2143_v16 = vshll.u32 %v9019_v45, 16  ;;  %vm755_vm5 = vcmp.ge.f32.partialorder %v723_v57, 0.0 }
 0x122   : > { %2065 = vmatmul.bf16.gmra.mxu0 %v6676_v47  ;;  %v2150_v61 = vrot.slane %v2148_v4, 4  ;;  %v2153_v7 = vrot.slane %v2151_v53, 5  ;;  %v2157_v37 = vshll.u32 %v9023_v5, 16  ;;  %v1689_v63 = vpack.c.b16 %v1684_v51, %v8986_v52  ;;  %1942 = vmatmul.bf16.gmra.mxu3 %v1866_v8  ;;  %v7613_v3 = vld [vmem:[#allocation9 + $0x230] sm:$0xff]  ;;  %v1549_v8 = vld [vmem:[#allocation2 + $0xec] sm:$0xf] }
 0x123   : > { %v2140_v36 = vor.u32 %v2139_v62, %v2136_v28  ;;  %v2145_v32 = vrot.slane %v2143_v16, 5  ;;  %vm758_vm8 = vcmp.ge.f32.partialorder %v726_v12, 0.0  ;;  %vm759_vm10 = vcmp.ge.f32.partialorder %v9005_v15, 0.0  ;;  %v7588_v47 = vld [vmem:[#allocation9 + $0x188] sm:$0xff]  ;;  %v7621_v28 = vld [vmem:[#allocation9 + $0x270] sm:$0xff]  ;;  %2849 = vmatpush.bf16.msra.mxu0 %v7613_v3 }
 0x124   : > { %v2154_v33 = vor.u32 %v2153_v7, %v2150_v61  ;;  %v2159_v14 = vrot.slane %v2157_v37, 5  ;;  %v786_v42 = vmul.f32 0.2, %v722_v22  ;;  %1761 = vmatmul.bf16.gmra.mxu2 %v1689_v63  ;;  %v787_v11 = vmul.f32 0.2, %v723_v57  ;;  %v7596_v62 = vld [vmem:[#allocation9 + $0x1c8] sm:$0xff]  ;;  %3094 = vmatpush.bf16.msra.mxu1 %v7621_v28 }
 0x125   : > { %v2141_v55 = vrot.slane %v2140_v36, 4  ;;  %v790_v9 = vmul.f32 0.2, %v726_v12  ;;  %v1636_v31 = vshrl.u32 %v1547_v27, 16  ;;  %v791_v41 = vmul.f32 0.2, %v9005_v15  ;;  %2548 = vmatpush.bf16.msra.mxu2 %v7588_v47  ;;  %2721 = vmatpush.bf16.msra.mxu3 %v7596_v62 }
 0x126   : > { %v2155_v20 = vrot.slane %v2154_v33, 4  ;;  %v818_v58 = vsel %vm754_vm4, %v722_v22, %v786_v42  ;;  %v1639_v52 = vshll.u32 %v1547_v27, 16  ;;  %v819_v10 = vsel %vm755_vm5, %v723_v57, %v787_v11  ;;  %v7612_v7 = vld [vmem:[#allocation9 + $0x228] sm:$0xff]  ;;  %v7595_v63 = vld [vmem:[#allocation9 + $0x1c0] sm:$0xff] }
 0x127   : > { %v2146_v60 = vsel %vm8703_vm14, %v2141_v55, %v2145_v32  ;;  %v822_v26 = vsel %vm758_vm8, %v726_v12, %v790_v9  ;;  %v1638_v30 = vrot.slane %v1636_v31, 4  ;;  %v823_v22 = vsel %vm759_vm10, %v9005_v15, %v791_v41  ;;  %v1550_v12 = vld [vmem:[#allocation2 + $0xfc] sm:$0x1]  ;;  %v7587_v33 = vld [vmem:[#allocation9 + $0x180] sm:$0xff]  ;;  %2850 = vmatpush.bf16.msra.mxu0 %v7612_v7 }
 0x128   : > { %v2160_v4 = vsel %vm8703_vm14, %v2155_v20, %v2159_v14  ;;  %v2235_v53 = vunpack.c.l.b16 %v2146_v60  ;;  %v891_v29 = vpack.c.bf16 %v819_v10, %v818_v58  ;;  %v893_v57 = vpack.c.bf16 %v823_v22, %v822_v26  ;;  %v1128_v58 = vld [vmem:[#allocation2 + $0xb0] sm:$0x11]  ;;  %v7893_v10 = vld [vmem:[%s8308_s9 + $0xe8] sm:$0xff] }
 0x129   : > { %v2236_v16 = vunpack.c.l.b16 %v2160_v4  ;;  %v1641_v51 = vrot.slane %v1639_v52, 5  ;;  %v1645_v61 = vshll.u32 %v1548_v44, 16  ;;  %v1650_v36 = vshrl.u32 %v1549_v8, 16  ;;  %v7620_v44 = vld [vmem:[#allocation9 + $0x268] sm:$0xff]  ;;  %v7611_v60 = vld [vmem:[#allocation9 + $0x220] sm:$0xff]  ;;  %2722 = vmatpush.bf16.msra.mxu3 %v7595_v63  ;;  %2549 = vmatpush.bf16.msra.mxu2 %v7587_v33 }
 0x12a   : > { %v964_v37 = vshrl.u32 %v891_v29, 16  ;;  %v967_v27 = vshll.u32 %v891_v29, 16  ;;  %v1653_v32 = vshll.u32 %v1549_v8, 16  ;;  %v980_v14 = vshrl.u32 %v893_v57, 16  ;;  %v1140_v47 = vld [vmem:[#allocation2 + $0xd0] sm:$0x11]  ;;  %3095 = vmatpush.bf16.msra.mxu1 %v7620_v44 }
 0x12b   : > { %v2242_v15 = vpack.c.b16 %v2236_v16, %v2235_v53  ;;  %v983_v42 = vshll.u32 %v893_v57, 16  ;;  %v1642_v55 = vor.u32 %v1641_v51, %v1638_v30  ;;  %v1647_v9 = vrot.slane %v1645_v61, 5  ;;  %v7619_v51 = vld [vmem:[#allocation9 + $0x260] sm:$0xff]  ;;  %v2579_v61 = vld [vmem:[#allocation2 + $0x20] sm:$0xe]  ;;  %2851 = vmatpush.bf16.msra.mxu0 %v7611_v60 }
 0x12c   : > { %v966_v11 = vrot.slane %v964_v37, 7  ;;  %v1652_v31 = vrot.slane %v1650_v36, 4  ;;  %v1655_v20 = vrot.slane %v1653_v32, 5  ;;  %v982_v41 = vrot.slane %v980_v14, 7  ;;  %v7610_v36 = vld [vmem:[#allocation9 + $0x218] sm:$0xff] }
 0x12d   : > { %2310 = vmatmul.bf16.gmra.mxu1 %v2242_v15  ;;  %v1643_v56 = vrot.slane %v1642_v55, 4  ;;  %v1659_v52 = vshll.u32 %v1550_v12, 16  ;;  %v702_v26 = vmul.f32 %v7893_v10, %v8589_v40  ;;  %v730_v4 = vadd.f32 %v8603_v25, %v9009_v48  ;;  %v9051_v48 = vld [vmem:[#allocation2] sm:$0xff]  ;;  %v7618_v10 = vld [vmem:[#allocation9 + $0x258] sm:$0xff] }
 0x12e   : > { %v969_v3 = vor.u32 %v967_v27, %v966_v11  ;;  %v977_v8 = vrot.slane %v966_v11, 4  ;;  %v1656_v30 = vor.u32 %v1655_v20, %v1652_v31  ;;  %v985_v53 = vor.u32 %v983_v42, %v982_v41  ;;  %v2580_v27 = vld [vmem:[#allocation2 + $0x40] sm:$0xe]  ;;  %v9065_v14 = vld [vmem:[#allocation2 + $0x24] sm:$0xf]  ;;  %3096 = vmatpush.bf16.msra.mxu1 %v7619_v51 }
 0x12f   : > { %v993_v22 = vrot.slane %v982_v41, 4  ;;  %v1648_v29 = vsel %vm8703_vm14, %v1643_v56, %v1647_v9  ;;  %v1661_v28 = vrot.slane %v1659_v52, 5  ;;  %vm762_vm12 = vcmp.ge.f32.partialorder %v730_v4, 0.0  ;;  %v9067_v42 = vld [vmem:[#allocation2 + $0x34] sm:$0x1]  ;;  %2852 = vmatpush.bf16.msra.mxu0 %v7610_v36 }
 0x130   : > { %v1123_v62 = vsel %vm8673_vm7, %v969_v3, %v8774_v18  ;;  %v1129_v16 = vsel %vm8685_vm11, %v977_v8, %v1128_v58  ;;  %v1657_v57 = vrot.slane %v1656_v30, 4  ;;  %v1685_v12 = vunpack.c.l.b16 %v1648_v29 }
 0x131   : > { %1124 = vst [vmem:[#allocation2 + $0xa0] sm:$0xff] %v1123_v62  ;;  %v1135_v7 = vsel %vm8673_vm7, %v985_v53, %v9051_v48  ;;  %v1141_v37 = vsel %vm8685_vm11, %v993_v22, %v1140_v47  ;;  %v731_v18 = vadd.f32 %v8603_v25, %v9013_v59  ;;  %v734_v63 = vadd.f32 %v8603_v25, %v9017_v21 }
 0x132   : > { %1136 = vst [vmem:[#allocation2 + $0xc0] sm:$0xff] %v1135_v7  ;;  %v1662_v32 = vsel %vm8703_vm14, %v1657_v57, %v1661_v28  ;;  %v735_v33 = vadd.f32 %v8603_v25, %v702_v26  ;;  %v794_v15 = vmul.f32 0.2, %v730_v4  ;;  %v6781_v11 = vrot.slane %v2579_v61, 9  ;;  %3097 = vmatpush.bf16.msra.mxu1 %v7618_v10 }
 0x133   : > { %1130 = vst [vmem:[#allocation2 + $0xb0] sm:$0x11] %v1129_v16  ;;  %v1686_v55 = vunpack.c.l.b16 %v1662_v32  ;;  %vm763_vm13 = vcmp.ge.f32.partialorder %v731_v18, 0.0  ;;  %v795_v59 = vmul.f32 0.2, %v731_v18  ;;  %vm766_vm9 = vcmp.ge.f32.partialorder %v734_v63, 0.0 }
 0x134   : > { %1142 = vst [vmem:[#allocation2 + $0xd0] sm:$0x11] %v1141_v37  ;;  %vm767_vm15 = vcmp.ge.f32.partialorder %v735_v33, 0.0  ;;  %v798_v9 = vmul.f32 0.2, %v734_v63  ;;  %v826_v31 = vsel %vm762_vm12, %v730_v4, %v794_v15  ;;  %v2606_v56 = vsel %vm8840_vm6, %v6781_v11, %v2605_v49  ;;  %v7630_v11 = vld [vmem:[#allocation9 + $0x2b8] sm:$0xff] }
 0x135   : > { %v1690_v21 = vpack.c.b16 %v1686_v55, %v1685_v12  ;;  %v799_v20 = vmul.f32 0.2, %v735_v33  ;;  %v827_v44 = vsel %vm763_vm13, %v731_v18, %v795_v59  ;;  %v6782_v52 = vrot.slane %v2580_v27, 9  ;;  %v1152_v18 = vld [vmem:[#allocation2 + $0xf0] sm:$0x11]  ;;  %v7609_v27 = vld [vmem:[#allocation9 + $0x210] sm:$0xff]  ;;  %3338 = vmatpush.bf16.msrb.mxu2 %v7630_v11 }
 0x136   : > { %v830_v41 = vsel %vm766_vm9, %v734_v63, %v798_v9  ;;  %v895_v58 = vpack.c.bf16 %v827_v44, %v826_v31  ;;  %v2351_v26 = vshrl.u32 %v9065_v14, 16  ;;  %v2354_v3 = vshll.u32 %v9065_v14, 16  ;;  %v1164_v59 = vld [vmem:[#allocation2 + $0x110] sm:$0x11]  ;;  %v7617_v9 = vld [vmem:[#allocation9 + $0x250] sm:$0xff]  ;;  %2853 = vmatpush.bf16.msra.mxu0 %v7609_v27 }
 0x137   : > { %1766 = vmatmul.bf16.gmra.mxu2 %v1690_v21  ;;  %v831_v60 = vsel %vm767_vm15, %v735_v33, %v799_v20  ;;  %v2360_v8 = vshll.u32 %v9067_v42, 16  ;;  %v2610_v1 = vsel %vm8840_vm6, %v6782_v52, %v2609_v46  ;;  %v2651_v16 = vunpack.c.l.b16 %v2606_v56  ;;  %v7638_v31 = vld [vmem:[#allocation9 + $0x2f8] sm:$0xff]  ;;  %v7608_v56 = vld [vmem:[#allocation9 + $0x208] sm:$0xff]  ;;  %3098 = vmatpush.bf16.msra.mxu1 %v7617_v9 }
 0x138   : > { %v6679_v47 = vld [vmem:[#allocation2 + $0xa4] sm:$0xf]  ;;  %v2097_v30 = vld [vmem:[#allocation2 + $0xa0] sm:$0xf]  ;;  %v897_v4 = vpack.c.bf16 %v831_v60, %v830_v41  ;;  %v996_v53 = vshrl.u32 %v895_v58, 16  ;;  %v999_v22 = vshll.u32 %v895_v58, 16  ;;  %v2652_v57 = vunpack.c.l.b16 %v2610_v1  ;;  %3511 = vmatpush.bf16.msrb.mxu3 %v7638_v31 }
 0x139   : > { %v7569_v49 = vld [vmem:[#allocation2 + $0xc0] sm:$0xf0]  ;;  %v2099_v29 = vld [vmem:[#allocation2 + $0xc0] sm:$0xf]  ;;  %v2162_v28 = vshrl.u32 %v2097_v30, 16  ;;  %v2165_v62 = vshll.u32 %v2097_v30, 16 }
 0x13a   : > { %v6680_v12 = vor.u32 %v7569_v49, %v6679_v47  ;;  %v9081_v51 = vld [vmem:[#allocation2 + $0xb0] sm:$0x1]  ;;  %v2176_v61 = vshrl.u32 %v2099_v29, 16  ;;  %v2179_v7 = vshll.u32 %v2099_v29, 16  ;;  %v998_v37 = vrot.slane %v996_v53, 7  ;;  %v7616_v53 = vld [vmem:[#allocation9 + $0x248] sm:$0xff]  ;;  %2854 = vmatpush.bf16.msra.mxu0 %v7608_v56 }
 0x13b   : > { %v9083_v36 = vld [vmem:[#allocation2 + $0xd0] sm:$0x1]  ;;  %v2164_v19 = vrot.slane %v2162_v28, 4  ;;  %v2167_v32 = vrot.slane %v2165_v62, 5  ;;  %v2171_v46 = vshll.u32 %v9081_v51, 16  ;;  %v1012_v63 = vshrl.u32 %v897_v4, 16  ;;  %3099 = vmatpush.bf16.msra.mxu1 %v7616_v53 }
 0x13c   : > { %2070 = vmatmul.bf16.gmra.mxu0 %v6680_v12  ;;  %v2178_v33 = vrot.slane %v2176_v61, 4  ;;  %v2181_v15 = vrot.slane %v2179_v7, 5  ;;  %v2185_v14 = vshll.u32 %v9083_v36, 16  ;;  %v1001_v55 = vor.u32 %v999_v22, %v998_v37  ;;  %v2336_v58 = vld [vmem:[#allocation2 + $0x44] sm:$0xf] }
 0x13d   : > { %v2168_v21 = vor.u32 %v2167_v32, %v2164_v19  ;;  %v2173_v20 = vrot.slane %v2171_v46, 5  ;;  %v1009_v44 = vrot.slane %v998_v37, 4  ;;  %v1014_v41 = vrot.slane %v1012_v63, 7  ;;  %v2337_v30 = vld [vmem:[#allocation2 + $0x54] sm:$0x1]  ;;  %v7629_v28 = vld [vmem:[#allocation9 + $0x2b0] sm:$0xff] }
 0x13e   : > { %v2182_v52 = vor.u32 %v2181_v15, %v2178_v33  ;;  %v2187_v60 = vrot.slane %v2185_v14, 5  ;;  %v1015_v10 = vshll.u32 %v897_v4, 16  ;;  %v1147_v47 = vsel %vm8673_vm7, %v1001_v55, %v9051_v48  ;;  %v7637_v62 = vld [vmem:[#allocation9 + $0x2f0] sm:$0xff]  ;;  %v7607_v37 = vld [vmem:[#allocation9 + $0x200] sm:$0xff]  ;;  %3339 = vmatpush.bf16.msrb.mxu2 %v7629_v28 }
 0x13f   : > { %v2169_v22 = vrot.slane %v2168_v21, 4  ;;  %v1025_v1 = vrot.slane %v1014_v41, 4  ;;  %1148 = vst [vmem:[#allocation2 + $0xe0] sm:$0xff] %v1147_v47  ;;  %v2659_v49 = vpack.c.b16 %v2652_v57, %v2651_v16  ;;  %v1153_v29 = vsel %vm8685_vm11, %v1009_v44, %v1152_v18  ;;  %v2581_v18 = vld [vmem:[#allocation2 + $0x60] sm:$0xe]  ;;  %v7615_v33 = vld [vmem:[#allocation9 + $0x240] sm:$0xff]  ;;  %3512 = vmatpush.bf16.msrb.mxu3 %v7637_v62  ;;  %2855 = vmatpush.bf16.msra.mxu0 %v7607_v37 }
 0x140   : > { %v2183_v12 = vrot.slane %v2182_v52, 4  ;;  %v1017_v4 = vor.u32 %v1015_v10, %v1014_v41  ;;  %1154 = vst [vmem:[#allocation2 + $0xf0] sm:$0x11] %v1153_v29  ;;  %v2353_v61 = vrot.slane %v2351_v26, 4  ;;  %v2356_v7 = vrot.slane %v2354_v3, 5  ;;  %3100 = vmatpush.bf16.msra.mxu1 %v7615_v33  ;;  %v7627_v33 = vld [vmem:[#allocation9 + $0x2a0] sm:$0xff] }
 0x141   : > { %v2174_v27 = vsel %vm8703_vm14, %v2169_v22, %v2173_v20  ;;  %2723 = vmatmul.bf16.vlgmr.msra.gmra.mxu3 %v2659_v49  ;;  %v1165_v19 = vsel %vm8685_vm11, %v1025_v1, %v1164_v59  ;;  %v2362_v16 = vrot.slane %v2360_v8, 5  ;;  %v2365_v57 = vshrl.u32 %v2336_v58, 16  ;;  %v2582_v32 = vld [vmem:[#allocation2 + $0x80] sm:$0xe]  ;;  %v2885_v55 = vld [vmem:[#allocation2 + $0x28] sm:$0xf] }
 0x142   : > { %v2188_v46 = vsel %vm8703_vm14, %v2183_v12, %v2187_v60  ;;  %v2237_v26 = vunpack.c.l.b16 %v2174_v27  ;;  %v1159_v3 = vsel %vm8673_vm7, %v1017_v4, %v9051_v48  ;;  %1166 = vst [vmem:[#allocation2 + $0x110] sm:$0x11] %v1165_v19  ;;  %v2357_v63 = vor.u32 %v2356_v7, %v2353_v61  ;;  %v9116_v61 = vld [vmem:[#allocation2 + $0x38] sm:$0x1]  ;;  %v7628_v7 = vld [vmem:[#allocation9 + $0x2a8] sm:$0xff] }
 0x143   : > { %v2238_v15 = vunpack.c.l.b16 %v2188_v46  ;;  %1160 = vst [vmem:[#allocation2 + $0x100] sm:$0xff] %v1159_v3  ;;  %v2367_v42 = vrot.slane %v2365_v57, 4  ;;  %v2368_v8 = vshll.u32 %v2336_v58, 16  ;;  %v2374_v14 = vshll.u32 %v2337_v30, 16  ;;  %v2887_v3 = vld [vmem:[#allocation2 + $0x48] sm:$0xf]  ;;  %3340 = vmatpush.bf16.msrb.mxu2 %v7628_v7 }
 0x144   : > { %v2358_v59 = vrot.slane %v2357_v63, 4  ;;  %v6783_v11 = vrot.slane %v2581_v18, 9  ;;  %v2613_v9 = vrot.slane %v9019_v45, 5  ;;  %v6784_v31 = vrot.slane %v2582_v32, 9  ;;  %v7636_v63 = vld [vmem:[#allocation9 + $0x2e8] sm:$0xff] }
 0x145   : > { %v2243_v21 = vpack.c.b16 %v2238_v15, %v2237_v26  ;;  %v2370_v20 = vrot.slane %v2368_v8, 5  ;;  %v2617_v44 = vrot.slane %v9023_v5, 5  ;;  %v2376_v56 = vrot.slane %v2374_v14, 5  ;;  %v9121_v14 = vld [vmem:[#allocation2 + $0x58] sm:$0x1]  ;;  %3513 = vmatpush.bf16.msrb.mxu3 %v7636_v63 }
 0x146   : > { %v2101_v41 = vld [vmem:[#allocation2 + $0xe0] sm:$0xf]  ;;  %v2614_v58 = vsel %vm8840_vm6, %v6783_v11, %v2613_v9  ;;  %v2902_v52 = vshrl.u32 %v2885_v55, 16  ;;  %v2363_v45 = vsel %vm8703_vm14, %v2358_v59, %v2362_v16  ;;  %v6683_v53 = vld [vmem:[#allocation2 + $0xe4] sm:$0xf]  ;;  %v2905_v59 = vshll.u32 %v2885_v55, 16 }
 0x147   : > { %2315 = vmatmul.bf16.gmra.mxu1 %v2243_v21  ;;  %v9107_v60 = vld [vmem:[#allocation2 + $0xf0] sm:$0x1]  ;;  %v2190_v10 = vshrl.u32 %v2101_v41, 16  ;;  %v2193_v47 = vshll.u32 %v2101_v41, 16  ;;  %v2371_v30 = vor.u32 %v2370_v20, %v2367_v42  ;;  %v2618_v5 = vsel %vm8840_vm6, %v6784_v31, %v2617_v44  ;;  %v2338_v20 = vld [vmem:[#allocation2 + $0x64] sm:$0xf]  ;;  %3341 = vmatpush.bf16.msrb.mxu2 %v7627_v33 }
 0x148   : > { %v2199_v22 = vshll.u32 %v9107_v60, 16  ;;  %v2653_v1 = vunpack.c.l.b16 %v2614_v58  ;;  %v2904_v49 = vrot.slane %v2902_v52, 4  ;;  %v2654_v4 = vunpack.c.l.b16 %v2618_v5  ;;  %v9127_v5 = vld [vmem:[#allocation2 + $0x2c] sm:$0xf]  ;;  %v2583_v63 = vld [vmem:[#allocation2 + $0xa0] sm:$0xe] }
 0x149   : > { %v9114_v29 = vld [vmem:[#allocation2 + $0x110] sm:$0x1]  ;;  %v2192_v28 = vrot.slane %v2190_v10, 4  ;;  %v2195_v62 = vrot.slane %v2193_v47, 5  ;;  %v2372_v12 = vrot.slane %v2371_v30, 4  ;;  %v2478_v57 = vunpack.c.l.b16 %v2363_v45  ;;  %v7635_v10 = vld [vmem:[#allocation9 + $0x2e0] sm:$0xff] }
 0x14a   : > { %v7570_v37 = vld [vmem:[#allocation2 + $0x100] sm:$0xf0]  ;;  %v2103_v27 = vld [vmem:[#allocation2 + $0x100] sm:$0xf]  ;;  %v2201_v19 = vrot.slane %v2199_v22, 5  ;;  %v2213_v16 = vshll.u32 %v9114_v29, 16  ;;  %v2660_v8 = vpack.c.b16 %v2654_v4, %v2653_v1  ;;  %3514 = vmatpush.bf16.msrb.mxu3 %v7635_v10 }
 0x14b   : > { %v6684_v18 = vor.u32 %v7570_v37, %v6683_v53  ;;  %v2196_v32 = vor.u32 %v2195_v62, %v2192_v28  ;;  %v2204_v46 = vshrl.u32 %v2103_v27, 16  ;;  %v2207_v26 = vshll.u32 %v2103_v27, 16  ;;  %v2339_v30 = vld [vmem:[#allocation2 + $0x74] sm:$0x1]  ;;  %v2340_v53 = vld [vmem:[#allocation2 + $0x84] sm:$0xf] }
 0x14c   : > { %v2215_v15 = vrot.slane %v2213_v16, 5  ;;  %v2377_v42 = vsel %vm8703_vm14, %v2372_v12, %v2376_v56  ;;  %v2907_v44 = vrot.slane %v2905_v59, 5  ;;  %v2911_v41 = vshll.u32 %v9116_v61, 16  ;;  %v9129_v4 = vld [vmem:[#allocation2 + $0x48] sm:$0xf0] }
 0x14d   : > { %2075 = vmatmul.bf16.gmra.mxu0 %v6684_v18  ;;  %v2197_v11 = vrot.slane %v2196_v32, 4  ;;  %v2206_v9 = vrot.slane %v2204_v46, 4  ;;  %v2209_v31 = vrot.slane %v2207_v26, 5  ;;  %v2479_v21 = vunpack.c.l.b16 %v2377_v42 }
 0x14e   : > { %v2916_v58 = vshrl.u32 %v2887_v3, 16  ;;  %v2919_v52 = vshll.u32 %v2887_v3, 16  ;;  %v2925_v55 = vshll.u32 %v9121_v14, 16  ;;  %v2908_v1 = vor.u32 %v2907_v44, %v2904_v49  ;;  %v2341_v49 = vld [vmem:[#allocation2 + $0x94] sm:$0x1] }
 0x14f   : > { %v2202_v56 = vsel %vm8703_vm14, %v2197_v11, %v2201_v19  ;;  %v2210_v47 = vor.u32 %v2209_v31, %v2206_v9  ;;  %v2486_v45 = vpack.c.b16 %v2479_v21, %v2478_v57  ;;  %v2913_v28 = vrot.slane %v2911_v41, 5  ;;  %v2584_v11 = vld [vmem:[#allocation2 + $0xc0] sm:$0xe] }
 0x150   : > { %v2239_v22 = vunpack.c.l.b16 %v2202_v56  ;;  %v2918_v62 = vrot.slane %v2916_v58, 4  ;;  %v2921_v7 = vrot.slane %v2919_v52, 5  ;;  %v2927_v37 = vrot.slane %v2925_v55, 5  ;;  %v2889_v52 = vld [vmem:[#allocation2 + $0x68] sm:$0xf] }
 0x151   : > { %v2211_v12 = vrot.slane %v2210_v47, 4  ;;  %2550 = vmatmul.bf16.vlgmr.msra.gmra.mxu2 %v2486_v45  ;;  %2728 = vmatmul.bf16.gmra.mxu3 %v2660_v8  ;;  %v2379_v27 = vshrl.u32 %v2338_v20, 16  ;;  %v2909_v19 = vrot.slane %v2908_v1, 4  ;;  %v2382_v16 = vshll.u32 %v2338_v20, 16 }
 0x152   : > { %v2388_v57 = vshll.u32 %v2339_v30, 16  ;;  %v2393_v18 = vshrl.u32 %v2340_v53, 16  ;;  %v2922_v46 = vor.u32 %v2921_v7, %v2918_v62  ;;  %v2396_v3 = vshll.u32 %v2340_v53, 16  ;;  %v9149_v7 = vld [vmem:[#allocation2 + $0x78] sm:$0x1] }
 0x153   : > { %v2216_v32 = vsel %vm8703_vm14, %v2211_v12, %v2215_v15  ;;  %v2381_v26 = vrot.slane %v2379_v27, 4  ;;  %v6824_v42 = vor.u32 %v9129_v4, %v9127_v5  ;;  %v2914_v8 = vsel %vm8703_vm14, %v2909_v19, %v2913_v28  ;;  %v7634_v28 = vld [vmem:[#allocation9 + $0x2d8] sm:$0xff] }
 0x154   : > { %v2240_v33 = vunpack.c.l.b16 %v2216_v32  ;;  %v2384_v59 = vrot.slane %v2382_v16, 5  ;;  %v2923_v9 = vrot.slane %v2922_v46, 4  ;;  %v2390_v31 = vrot.slane %v2388_v57, 5  ;;  %v2342_v16 = vld [vmem:[#allocation2 + $0xa4] sm:$0xf]  ;;  %3515 = vmatpush.bf16.msrb.mxu3 %v7634_v28 }
 0x155   : > { %v2395_v21 = vrot.slane %v2393_v18, 4  ;;  %v2398_v20 = vrot.slane %v2396_v3, 5  ;;  %v2402_v41 = vshll.u32 %v2341_v49, 16  ;;  %v6785_v58 = vrot.slane %v2583_v63, 9  ;;  %v9143_v1 = vpop.f32.mrf.mxu3  ;;  %v7625_v57 = vld [vmem:[#allocation9 + $0x290] sm:$0xff] }
 0x156   : > { %v2244_v44 = vpack.c.b16 %v2240_v33, %v2239_v22  ;;  %v2385_v15 = vor.u32 %v2384_v59, %v2381_v26  ;;  %v2928_v10 = vsel %vm8703_vm14, %v2923_v9, %v2927_v37  ;;  %v2621_v47 = vrot.slane %v9081_v51, 5  ;;  %v7626_v22 = vld [vmem:[#allocation9 + $0x298] sm:$0xff]  ;;  %v9157_v49 = vld [vmem:[#allocation2 + $0x98] sm:$0x1]  ;;  %v2344_v59 = vld [vmem:[#allocation2 + $0xc4] sm:$0xf] }
 0x157   : > { %v2399_v56 = vor.u32 %v2398_v20, %v2395_v21  ;;  %v6786_v45 = vrot.slane %v2584_v11, 9  ;;  %v9140_v55 = vunpack.c.l.b16 %v2914_v8  ;;  %v2404_v53 = vrot.slane %v2402_v41, 5  ;;  %v2891_v51 = vld [vmem:[#allocation2 + $0x88] sm:$0xf]  ;;  %3342 = vmatpush.bf16.msrb.mxu2 %v7626_v22  ;;  %v2343_v21 = vld [vmem:[#allocation2 + $0xb4] sm:$0x1] }
 0x158   : > { %2320 = vmatmul.bf16.gmra.mxu1 %v2244_v44  ;;  %v2386_v30 = vrot.slane %v2385_v15, 4  ;;  %v2625_v5 = vrot.slane %v9083_v36, 5  ;;  %v9145_v62 = vunpack.c.l.b16 %v2928_v10  ;;  %v2622_v4 = vsel %vm8840_vm6, %v6785_v58, %v2621_v47  ;;  %v7633_v44 = vld [vmem:[#allocation9 + $0x2d0] sm:$0xff]  ;;  %v7650_v15 = vld [vmem:[#allocation9 + $0x338] sm:$0xff] }
 0x159   : > { %v2400_v12 = vrot.slane %v2399_v56, 4  ;;  %v2930_v37 = vshrl.u32 %v2889_v52, 16  ;;  %v2655_v19 = vunpack.c.l.b16 %v2622_v4  ;;  %v2933_v63 = vshll.u32 %v2889_v52, 16  ;;  %v2345_v52 = vld [vmem:[#allocation2 + $0xd4] sm:$0x1]  ;;  %3516 = vmatpush.bf16.msrb.mxu3 %v7633_v44  ;;  %3645 = vmatpush.bf16.msrb.mxu0 %v7650_v15 }
 0x15a   : > { %v2391_v27 = vsel %vm8703_vm14, %v2386_v30, %v2390_v31  ;;  %v2626_v36 = vsel %vm8840_vm6, %v6786_v45, %v2625_v5  ;;  %v2939_v33 = vshll.u32 %v9149_v7, 16  ;;  %v2944_v8 = vshrl.u32 %v2891_v51, 16  ;;  %v2893_v44 = vld [vmem:[#allocation2 + $0xa8] sm:$0xf] }
 0x15b   : > { %v2405_v18 = vsel %vm8703_vm14, %v2400_v12, %v2404_v53  ;;  %v2480_v32 = vunpack.c.l.b16 %v2391_v27  ;;  %v2656_v46 = vunpack.c.l.b16 %v2626_v36  ;;  %v2932_v26 = vrot.slane %v2930_v37, 4  ;;  %3343 = vmatpush.bf16.msrb.mxu2 %v7625_v57  ;;  %v1515_v53 = vpop.f32.mrf.mxu1 }
 0x15c   : > { %v2481_v3 = vunpack.c.l.b16 %v2405_v18  ;;  %v3037_v11 = vpack.c.b16 %v9145_v62, %v9140_v55  ;;  %v2947_v31 = vshll.u32 %v2891_v51, 16  ;;  %v2407_v20 = vshrl.u32 %v2342_v16, 16 }
 0x15d   : > { %2856 = vmatmul.bf16.vlgmr.msra.gmra.mxu0 %v6824_v42  ;;  %v2661_v9 = vpack.c.b16 %v2656_v46, %v2655_v19  ;;  %v2935_v58 = vrot.slane %v2933_v63, 5  ;;  %v2946_v10 = vrot.slane %v2944_v8, 4  ;;  %v2953_v56 = vshll.u32 %v9157_v49, 16  ;;  %v9165_v62 = vpop.f32.mrf.mxu3  ;;  %v2585_v19 = vld [vmem:[#allocation2 + $0xe0] sm:$0xe] }
 0x15e   : > { %v2487_v41 = vpack.c.b16 %v2481_v3, %v2480_v32  ;;  %v9163_v47 = vrot.slane %v2939_v33, 5  ;;  %v2949_v45 = vrot.slane %v2947_v31, 5  ;;  %v2409_v42 = vrot.slane %v2407_v20, 4  ;;  %v1414_v12 = vpop.f32.mrf.mxu0  ;;  %v2586_v46 = vld [vmem:[#allocation2 + $0x100] sm:$0xe] }
 0x15f   : > { %v2410_v30 = vshll.u32 %v2342_v16, 16  ;;  %v2936_v55 = vor.u32 %v2935_v58, %v2932_v26  ;;  %v2416_v5 = vshll.u32 %v2343_v21, 16  ;;  %v2421_v22 = vshrl.u32 %v2344_v59, 16  ;;  %v6827_v26 = vld [vmem:[#allocation2 + $0x6c] sm:$0xf] }
 0x160   : > { %v2424_v28 = vshll.u32 %v2344_v59, 16  ;;  %v2950_v4 = vor.u32 %v2949_v45, %v2946_v10  ;;  %v2430_v37 = vshll.u32 %v2345_v52, 16  ;;  %v1424_v27 = vpop.f32.mrf.mxu2  ;;  %v9167_v36 = vadd.f32 %v1515_v53, %v1414_v12  ;;  %v7604_v3 = vld [vmem:[#allocation2 + $0x88] sm:$0xf0]  ;;  %v7649_v12 = vld [vmem:[#allocation9 + $0x330] sm:$0xff] }
 0x161   : > { %2555 = vmatmul.bf16.gmra.mxu2 %v2487_v41  ;;  %2733 = vmatmul.bf16.gmra.mxu3 %v2661_v9  ;;  %v2412_v51 = vrot.slane %v2410_v30, 5  ;;  %v2937_v16 = vrot.slane %v2936_v55, 4  ;;  %v2955_v57 = vrot.slane %v2953_v56, 5  ;;  %v2423_v18 = vrot.slane %v2421_v22, 4  ;;  %v7658_v53 = vld [vmem:[#allocation9 + $0x378] sm:$0xff] }
 0x162   : > { %v2426_v32 = vrot.slane %v2424_v28, 5  ;;  %v2951_v63 = vrot.slane %v2950_v4, 4  ;;  %v2418_v8 = vrot.slane %v2416_v5, 5  ;;  %v9170_v59 = vadd.f32 %v9143_v1, %v1424_v27  ;;  %v9187_v28 = vld [vmem:[#allocation2 + $0xb8] sm:$0x1]  ;;  %v7624_v4 = vld [vmem:[#allocation9 + $0x288] sm:$0xff]  ;;  %3890 = vmatpush.bf16.msrb.mxu1 %v7658_v53  ;;  %3646 = vmatpush.bf16.msrb.mxu0 %v7649_v12 }
 0x163   : > { %v2413_v33 = vor.u32 %v2412_v51, %v2409_v42  ;;  %v2432_v31 = vrot.slane %v2430_v37, 5  ;;  %v6787_v21 = vrot.slane %v2585_v19, 9  ;;  %v2629_v20 = vrot.slane %v9107_v60, 5  ;;  %v2895_v42 = vld [vmem:[#allocation2 + $0xc8] sm:$0xf]  ;;  %3344 = vmatpush.bf16.msrb.mxu2 %v7624_v4  ;;  %v7656_v12 = vld [vmem:[#allocation9 + $0x368] sm:$0xff] }
 0x164   : > { %v2427_v9 = vor.u32 %v2426_v32, %v2423_v18  ;;  %v6788_v41 = vrot.slane %v2586_v46, 9  ;;  %v6828_v58 = vor.u32 %v7604_v3, %v6827_v26  ;;  %v2633_v52 = vrot.slane %v9114_v29, 5  ;;  %v9193_v19 = vld [vmem:[#allocation2 + $0xd8] sm:$0x1]  ;;  %v7657_v18 = vld [vmem:[#allocation9 + $0x370] sm:$0xff]  ;;  %v7632_v32 = vld [vmem:[#allocation9 + $0x2c8] sm:$0xff] }
 0x165   : > { %v2414_v15 = vrot.slane %v2413_v33, 4  ;;  %v2630_v56 = vsel %vm8840_vm6, %v6787_v21, %v2629_v20  ;;  %v2942_v1 = vsel %vm8703_vm14, %v2937_v16, %v9163_v47  ;;  %v2956_v45 = vsel %vm8703_vm14, %v2951_v63, %v2955_v57  ;;  %v9189_v47 = vpop.f32.mrf.mxu3  ;;  %v2346_v57 = vld [vmem:[#allocation2 + $0xe4] sm:$0xf]  ;;  %v2347_v3 = vld [vmem:[#allocation2 + $0xf4] sm:$0x1]  ;;  %v7648_v63 = vld [vmem:[#allocation9 + $0x328] sm:$0xff]  ;;  %3517 = vmatpush.bf16.msrb.mxu3 %v7632_v32 }
 0x166   : > { %v2428_v10 = vrot.slane %v2427_v9, 4  ;;  %v2958_v30 = vshrl.u32 %v2893_v44, 16  ;;  %v2634_v29 = vsel %vm8840_vm6, %v6788_v41, %v2633_v52  ;;  %v2657_v22 = vunpack.c.l.b16 %v2630_v56  ;;  %v7623_v33 = vld [vmem:[#allocation9 + $0x280] sm:$0xff]  ;;  %v2348_v20 = vld [vmem:[#allocation2 + $0x104] sm:$0xf]  ;;  %3891 = vmatpush.bf16.msrb.mxu1 %v7657_v18  ;;  %3647 = vmatpush.bf16.msrb.mxu0 %v7648_v63 }
 0x167   : > { %v2419_v60 = vsel %vm8703_vm14, %v2414_v15, %v2418_v8  ;;  %v2658_v37 = vunpack.c.l.b16 %v2634_v29  ;;  %v2961_v16 = vshll.u32 %v2893_v44, 16  ;;  %v2972_v46 = vshrl.u32 %v2895_v42, 16  ;;  %v7631_v44 = vld [vmem:[#allocation9 + $0x2c0] sm:$0xff]  ;;  %3345 = vmatpush.bf16.msrb.mxu2 %v7623_v33  ;;  %v3375_v33 = vld [vmem:[#allocation2 + $0x28] sm:$0xe] }
 0x168   : > { %3101 = vmatmul.bf16.vlgmr.msra.gmra.mxu1 %v3037_v11  ;;  %v2433_v55 = vsel %vm8703_vm14, %v2428_v10, %v2432_v31  ;;  %v2482_v5 = vunpack.c.l.b16 %v2419_v60  ;;  %v9191_v27 = vpop.f32.mrf.mxu2  ;;  %v2960_v11 = vrot.slane %v2958_v30, 4  ;;  %v2975_v26 = vshll.u32 %v2895_v42, 16  ;;  %v2349_v56 = vld [vmem:[#allocation2 + $0x114] sm:$0x1] }
 0x169   : > { %v2483_v51 = vunpack.c.l.b16 %v2433_v55  ;;  %v9195_v8 = vunpack.c.l.b16 %v2942_v1  ;;  %v9197_v9 = vunpack.c.l.b16 %v2956_v45  ;;  %v2963_v31 = vrot.slane %v2961_v16, 5  ;;  %v7647_v4 = vld [vmem:[#allocation9 + $0x320] sm:$0xff]  ;;  %3518 = vmatpush.bf16.msrb.mxu3 %v7631_v44 }
 0x16a   : > { %v2967_v21 = vshll.u32 %v9187_v28, 16  ;;  %v2974_v41 = vrot.slane %v2972_v46, 4  ;;  %v2977_v10 = vrot.slane %v2975_v26, 5  ;;  %v2435_v52 = vshrl.u32 %v2346_v57, 16  ;;  %3892 = vmatpush.bf16.msrb.mxu1 %v7656_v12  ;;  %3648 = vmatpush.bf16.msrb.mxu0 %v7647_v4 }
 0x16b   : > { %v2488_v15 = vpack.c.b16 %v2483_v51, %v2482_v5  ;;  %v2662_v60 = vpack.c.b16 %v2658_v37, %v2657_v22  ;;  %v2964_v42 = vor.u32 %v2963_v31, %v2960_v11  ;;  %v2438_v30 = vshll.u32 %v2346_v57, 16 }
 0x16c   : > { %v2444_v53 = vshll.u32 %v2347_v3, 16  ;;  %v2981_v1 = vshll.u32 %v9193_v19, 16  ;;  %v2437_v45 = vrot.slane %v2435_v52, 4  ;;  %v2449_v55 = vshrl.u32 %v2348_v20, 16  ;;  %v7895_v3 = vld [vmem:[%s8308_s9 + $0xf0] sm:$0xff]  ;;  %v9220_v52 = vpop.f32.mrf.mxu1 }
 0x16d   : > { %2861 = vmatmul.bf16.gmra.mxu0 %v6828_v58  ;;  %v2452_v29 = vshll.u32 %v2348_v20, 16  ;;  %v2978_v5 = vor.u32 %v2977_v10, %v2974_v41  ;;  %v2440_v51 = vrot.slane %v2438_v30, 5  ;;  %v2458_v16 = vshll.u32 %v2349_v56, 16  ;;  %v9205_v57 = vpop.f32.mrf.mxu3  ;;  %v9218_v10 = vpop.f32.mrf.mxu0 }
 0x16e   : > { %v9201_v58 = vrot.slane %v2964_v42, 4  ;;  %v9203_v22 = vrot.slane %v2967_v21, 5  ;;  %v2451_v37 = vrot.slane %v2449_v55, 4  ;;  %v3038_v18 = vpack.c.b16 %v9197_v9, %v9195_v8  ;;  %v7655_v8 = vld [vmem:[#allocation9 + $0x360] sm:$0xff]  ;;  %v3376_v9 = vld [vmem:[#allocation2 + $0x48] sm:$0xe] }
 0x16f   : > { %v2454_v11 = vrot.slane %v2452_v29, 5  ;;  %v2441_v32 = vor.u32 %v2440_v51, %v2437_v45  ;;  %v2446_v46 = vrot.slane %v2444_v53, 5  ;;  %v703_v63 = vmul.f32 %v7895_v3, %v8589_v40  ;;  %v6831_v53 = vld [vmem:[#allocation2 + $0xac] sm:$0xf]  ;;  %3893 = vmatpush.bf16.msrb.mxu1 %v7655_v8 }
 0x170   : > { %v1429_v26 = vpop.f32.mrf.mxu2  ;;  %v9211_v31 = vrot.slane %v2981_v1, 5  ;;  %v2460_v20 = vrot.slane %v2458_v16, 5  ;;  %v9216_v41 = vrot.slane %v2978_v5, 4  ;;  %v6933_v45 = vrot.slane %v3375_v33, 9  ;;  %v7605_v29 = vld [vmem:[#allocation2 + $0xc8] sm:$0xf0] }
 0x171   : > { %2560 = vmatmul.bf16.gmra.mxu2 %v2488_v15  ;;  %2738 = vmatmul.bf16.gmra.mxu3 %v2662_v60  ;;  %v2455_v21 = vor.u32 %v2454_v11, %v2451_v37  ;;  %v9214_v44 = vadd.f32 %v9189_v47, %v1429_v26  ;;  %v7646_v15 = vld [vmem:[#allocation9 + $0x318] sm:$0xff]  ;;  %v2442_v56 = vrot.slane %v2441_v32, 4  ;;  %v736_v30 = vadd.f32 %v8603_v25, %v703_v63  ;;  %v7645_v33 = vld [vmem:[#allocation9 + $0x310] sm:$0xff] }
 0x172   : > { %v7896_v60 = vld [vmem:[%s8308_s9 + $0xf8] sm:$0xff]  ;;  %v2970_v47 = vsel %vm8703_vm14, %v9201_v58, %v9203_v22  ;;  %v3401_v55 = vrot.slane %v9116_v61, 5  ;;  %3649 = vmatpush.bf16.msrb.mxu0 %v7646_v15  ;;  %v6832_v32 = vor.u32 %v7605_v29, %v6831_v53  ;;  %v2984_v8 = vsel %vm8703_vm14, %v9216_v41, %v9211_v31 }
 0x173   : > { %v704_v42 = vmul.f32 %v7896_v60, %v8589_v40  ;;  %v2456_v1 = vrot.slane %v2455_v21, 4  ;;  %v2447_v12 = vsel %vm8703_vm14, %v2442_v56, %v2446_v46  ;;  %vm768_vm0 = vcmp.ge.f32.partialorder %v736_v30, 0.0  ;;  %v2897_v5 = vld [vmem:[#allocation2 + $0xe8] sm:$0xf]  ;;  %v3130_v21 = vld [vmem:[#allocation2 + $0x2c] sm:$0xf] }
 0x174   : > { %v6934_v40 = vrot.slane %v3376_v9, 9  ;;  %v9235_v16 = vunpack.c.l.b16 %v2447_v12  ;;  %v800_v58 = vmul.f32 0.2, %v736_v30  ;;  %v3402_v22 = vsel %vm8840_vm6, %v6933_v45, %v3401_v55  ;;  %v7654_v11 = vld [vmem:[#allocation9 + $0x358] sm:$0xff]  ;;  %v9253_v56 = vld [vmem:[#allocation2 + $0xf8] sm:$0x1] }
 0x175   : > { %v737_v4 = vadd.f32 %v8603_v25, %v704_v42  ;;  %v2461_v51 = vsel %vm8703_vm14, %v2456_v1, %v2460_v20  ;;  %v3405_v25 = vrot.slane %v9121_v14, 5  ;;  %v2986_v26 = vshrl.u32 %v2897_v5, 16  ;;  %v9243_v63 = vpop.f32.mrf.mxu3  ;;  %v7666_v20 = vld [vmem:[#allocation9 + $0x3b8] sm:$0xff]  ;;  %v3131_v60 = vld [vmem:[#allocation2 + $0x3c] sm:$0x1]  ;;  %3894 = vmatpush.bf16.msrb.mxu1 %v7654_v11  ;;  %v7653_v41 = vld [vmem:[#allocation9 + $0x350] sm:$0xff] }
 0x176   : > { %v9239_v61 = vunpack.c.l.b16 %v2461_v51  ;;  %v832_v46 = vsel %vm768_vm0, %v736_v30, %v800_v58  ;;  %v2989_v3 = vshll.u32 %v2897_v5, 16  ;;  %v7674_v42 = vld [vmem:[#allocation9 + $0x3f8] sm:$0xff]  ;;  %v9255_v30 = vunpack.c.l.b16 %v2970_v47  ;;  %3650 = vmatpush.bf16.msrb.mxu0 %v7645_v33  ;;  %v7644_v55 = vld [vmem:[#allocation9 + $0x308] sm:$0xff]  ;;  %4135 = vmatpush.bf16.msra.mxu2 %v7666_v20  ;;  %v7665_v5 = vld [vmem:[#allocation9 + $0x3b0] sm:$0xff] }
 0x177   : > { %vm769_vm2 = vcmp.ge.f32.partialorder %v737_v4, 0.0  ;;  %v801_v37 = vmul.f32 0.2, %v737_v4  ;;  %v3406_v14 = vsel %vm8840_vm6, %v6934_v40, %v3405_v25  ;;  %v3132_v31 = vld [vmem:[#allocation2 + $0x4c] sm:$0xf]  ;;  %v2988_v29 = vrot.slane %v2986_v26, 4  ;;  %4308 = vmatpush.bf16.msra.mxu3 %v7674_v42 }
 0x178   : > { %3106 = vmatmul.bf16.gmra.mxu1 %v3038_v18  ;;  %v3447_v18 = vunpack.c.l.b16 %v3402_v22  ;;  %v9251_v15 = vpop.f32.mrf.mxu2  ;;  %v2489_v53 = vpack.c.b16 %v9239_v61, %v9235_v16  ;;  %v3448_v45 = vunpack.c.l.b16 %v3406_v14  ;;  %v2991_v12 = vrot.slane %v2989_v3, 5  ;;  %v3133_v22 = vld [vmem:[#allocation2 + $0x5c] sm:$0x1]  ;;  %v7673_v26 = vld [vmem:[#allocation9 + $0x3f0] sm:$0xff]  ;;  %v7643_v42 = vld [vmem:[#allocation9 + $0x300] sm:$0xff] }
 0x179   : > { %v833_v9 = vsel %vm769_vm2, %v737_v4, %v801_v37  ;;  %v3147_v4 = vshrl.u32 %v3130_v21, 16  ;;  %v3150_v40 = vshll.u32 %v3130_v21, 16  ;;  %v2995_v58 = vshll.u32 %v9253_v56, 16  ;;  %v1520_v37 = vpop.f32.mrf.mxu1  ;;  %3895 = vmatpush.bf16.msrb.mxu1 %v7653_v41  ;;  %v7652_v14 = vld [vmem:[#allocation9 + $0x348] sm:$0xff] }
 0x17a   : > { %v898_v1 = vpack.c.bf16 %v833_v9, %v832_v46  ;;  %v3156_v16 = vshll.u32 %v3131_v60, 16  ;;  %v3455_v25 = vpack.c.b16 %v3448_v45, %v3447_v18  ;;  %v3161_v33 = vshrl.u32 %v3132_v31, 16  ;;  %3651 = vmatpush.bf16.msrb.mxu0 %v7644_v55  ;;  %4136 = vmatpush.bf16.msra.mxu2 %v7665_v5 }
 0x17b   : > { %v3149_v11 = vrot.slane %v3147_v4, 4  ;;  %v3152_v46 = vrot.slane %v3150_v40, 5  ;;  %v3034_v3 = vunpack.c.l.b16 %v2984_v8  ;;  %v3164_v20 = vshll.u32 %v3132_v31, 16  ;;  %4309 = vmatpush.bf16.msra.mxu3 %v7673_v26  ;;  %v9284_v26 = vld [vmem:[#allocation2 + $0x50] sm:$0x1] }
 0x17c   : > { %v1019_v51 = vshrl.u32 %v898_v1, 16  ;;  %v1022_v47 = vshll.u32 %v898_v1, 16  ;;  %v3377_v1 = vld [vmem:[#allocation2 + $0x68] sm:$0xe]  ;;  %v2992_v60 = vor.u32 %v2991_v12, %v2988_v29  ;;  %v3163_v13 = vrot.slane %v3161_v33, 4 }
 0x17d   : > { %2866 = vmatmul.bf16.gmra.mxu0 %v6832_v32  ;;  %v1419_v61 = vpop.f32.mrf.mxu0  ;;  %v3153_v32 = vor.u32 %v3152_v46, %v3149_v11  ;;  %v3170_v23 = vshll.u32 %v3133_v22, 16  ;;  %v3158_v4 = vrot.slane %v3156_v16, 5  ;;  %v3166_v8 = vrot.slane %v3164_v20, 5  ;;  %v9262_v40 = vpop.f32.mrf.mxu3  ;;  %3896 = vmatpush.bf16.msrb.mxu1 %v7652_v14  ;;  %v3682_v16 = vld [vmem:[#allocation2 + $0x40] sm:$0xf] }
 0x17e   : > { %v9260_v9 = vadd.f32 %v1520_v37, %v1419_v61  ;;  %v1021_v21 = vrot.slane %v1019_v51, 7  ;;  %v3378_v51 = vld [vmem:[#allocation2 + $0x88] sm:$0xe]  ;;  %v6935_v61 = vrot.slane %v3377_v1, 9  ;;  %3652 = vmatpush.bf16.msrb.mxu0 %v7643_v42  ;;  %v3409_v22 = vrot.slane %v9149_v7, 5 }
 0x17f   : > { %v3154_v31 = vrot.slane %v3153_v32, 4  ;;  %v3172_v41 = vrot.slane %v3170_v23, 5  ;;  %v3167_v5 = vor.u32 %v3166_v8, %v3163_v13  ;;  %v2997_v37 = vrot.slane %v2995_v58, 5  ;;  %v3684_v7 = vld [vmem:[#allocation2 + $0x60] sm:$0xf] }
 0x180   : > { %v1024_v18 = vor.u32 %v1022_v47, %v1021_v21  ;;  %v1026_v45 = vrot.slane %v1021_v21, 4  ;;  %v1752_v55 = vpop.f32.mrf.mxu2  ;;  %v7651_v47 = vld [vmem:[#allocation9 + $0x340] sm:$0xff]  ;;  %v3039_v11 = vpack.c.b16 %v3034_v3, %v9255_v30  ;;  %v3413_v13 = vrot.slane %v9157_v49, 5  ;;  %v6835_v49 = vld [vmem:[#allocation2 + $0xec] sm:$0xf]  ;;  %v7672_v32 = vld [vmem:[#allocation9 + $0x3e8] sm:$0xff] }
 0x181   : > { %2565 = vmatmul.bf16.gmra.mxu2 %v2489_v53  ;;  %3519 = vmatmul.bf16.vlgmr.msrb.gmra.mxu3 %v3455_v25  ;;  %v2993_v53 = vrot.slane %v2992_v60, 4  ;;  %v1772_v23 = vadd.f32 %v1752_v55, %v9167_v36  ;;  %v6936_v25 = vrot.slane %v3378_v51, 9  ;;  %v3159_v35 = vsel %vm8703_vm14, %v3154_v31, %v3158_v4  ;;  %v7664_v60 = vld [vmem:[#allocation9 + $0x3a8] sm:$0xff]  ;;  %v9292_v51 = vld [vmem:[#allocation2 + $0x70] sm:$0x1] }
 0x182   : > { %v1162_v29 = vsel %vm8673_vm7, %v1024_v18, %v9051_v48  ;;  %v1168_v12 = vsel %vm8685_vm11, %v1026_v45, %v1167_v38  ;;  %v3168_v38 = vrot.slane %v3167_v5, 4  ;;  %v3699_v46 = vshrl.u32 %v3682_v16, 16  ;;  %3897 = vmatpush.bf16.msrb.mxu1 %v7651_v47  ;;  %4137 = vmatpush.bf16.msra.mxu2 %v7664_v60 }
 0x183   : > { %1163 = vst [vmem:[#allocation2 + $0x108] sm:$0xff] %v1162_v29  ;;  %v1948_v48 = vadd.f32 %v9243_v63, %v1772_v23  ;;  %v3702_v33 = vshll.u32 %v3682_v16, 16  ;;  %v3410_v30 = vsel %vm8840_vm6, %v6935_v61, %v3409_v22  ;;  %v3414_v58 = vsel %vm8840_vm6, %v6936_v25, %v3413_v13  ;;  %4310 = vmatpush.bf16.msra.mxu3 %v7672_v32 }
 0x184   : > { %1169 = vst [vmem:[#allocation2 + $0x118] sm:$0x11] %v1168_v12  ;;  %v3173_v36 = vsel %vm8703_vm14, %v3168_v38, %v3172_v41  ;;  %v2998_v3 = vsel %vm8703_vm14, %v2993_v53, %v2997_v37  ;;  %v3274_v63 = vunpack.c.l.b16 %v3159_v35  ;;  %v3701_v21 = vrot.slane %v3699_v46, 4  ;;  %v7663_v41 = vld [vmem:[#allocation9 + $0x3a0] sm:$0xff]  ;;  %v3135_v35 = vld [vmem:[#allocation2 + $0x7c] sm:$0x1] }
 0x185   : > { %v9275_v17 = vpop.f32.mrf.mxu0  ;;  %v3704_v20 = vrot.slane %v3702_v33, 5  ;;  %v3713_v14 = vshrl.u32 %v3684_v7, 16  ;;  %v3716_v42 = vshll.u32 %v3684_v7, 16  ;;  %v9288_v1 = vpop.f32.mrf.mxu3  ;;  %v3275_v18 = vunpack.c.l.b16 %v3173_v36  ;;  %v3136_v36 = vld [vmem:[#allocation2 + $0x8c] sm:$0xf] }
 0x186   : > { %v3449_v45 = vunpack.c.l.b16 %v3410_v30  ;;  %v3450_v4 = vunpack.c.l.b16 %v3414_v58  ;;  %v3708_v31 = vshll.u32 %v9284_v26, 16  ;;  %v9298_v37 = vunpack.c.l.b16 %v2998_v3  ;;  %v3137_v30 = vld [vmem:[#allocation2 + $0x9c] sm:$0x1]  ;;  %4138 = vmatpush.bf16.msra.mxu2 %v7663_v41 }
 0x187   : > { %v3715_v29 = vrot.slane %v3713_v14, 4  ;;  %v3718_v12 = vrot.slane %v3716_v42, 5  ;;  %v3705_v23 = vor.u32 %v3704_v20, %v3701_v21  ;;  %v3722_v25 = vshll.u32 %v9292_v51, 16  ;;  %v7671_v21 = vld [vmem:[#allocation9 + $0x3e0] sm:$0xff]  ;;  %v9305_v42 = vpop.f32.mrf.mxu1 }
 0x188   : > { %3111 = vmatmul.bf16.gmra.mxu1 %v3039_v11  ;;  %v9290_v8 = vpop.f32.mrf.mxu2  ;;  %v3134_v11 = vld [vmem:[#allocation2 + $0x6c] sm:$0xf]  ;;  %v3282_v7 = vpack.c.b16 %v3275_v18, %v3274_v63  ;;  %v3456_v33 = vpack.c.b16 %v3450_v4, %v3449_v45  ;;  %v9303_v14 = vrot.slane %v3708_v31, 5  ;;  %v3189_v63 = vshrl.u32 %v3136_v36, 16  ;;  %4311 = vmatpush.bf16.msra.mxu3 %v7671_v21 }
 0x189   : > { %v3719_v3 = vor.u32 %v3718_v12, %v3715_v29  ;;  %v3175_v60 = vshrl.u32 %v3134_v11, 16  ;;  %v3178_v32 = vshll.u32 %v3134_v11, 16  ;;  %v3192_v18 = vshll.u32 %v3136_v36, 16 }
 0x18a   : > { %v7606_v55 = vld [vmem:[#allocation2 + $0x108] sm:$0xf0]  ;;  %v2899_v61 = vld [vmem:[#allocation2 + $0x108] sm:$0xf]  ;;  %v3198_v45 = vshll.u32 %v3137_v30, 16  ;;  %v3417_v30 = vrot.slane %v9187_v28, 5 }
 0x18b   : > { %v6836_v5 = vor.u32 %v7606_v55, %v6835_v49  ;;  %v9295_v47 = vld [vmem:[#allocation2 + $0x118] sm:$0x1]  ;;  %v3000_v22 = vshrl.u32 %v2899_v61, 16  ;;  %v3003_v16 = vshll.u32 %v2899_v61, 16  ;;  %v3184_v55 = vshll.u32 %v3135_v35, 16 }
 0x18c   : > { %v3009_v53 = vshll.u32 %v9295_v47, 16  ;;  %v9307_v61 = vrot.slane %v3705_v23, 4  ;;  %v3177_v31 = vrot.slane %v3175_v60, 4  ;;  %v3180_v29 = vrot.slane %v3178_v32, 5  ;;  %v3380_v23 = vld [vmem:[#allocation2 + $0xc8] sm:$0xe] }
 0x18d   : > { %2871 = vmatmul.bf16.gmra.mxu0 %v6836_v5  ;;  %v3002_v38 = vrot.slane %v3000_v22, 4  ;;  %v3005_v13 = vrot.slane %v3003_v16, 5  ;;  %v2061_v46 = vpop.f32.mrf.mxu0  ;;  %v9309_v12 = vpop.f32.mrf.mxu3  ;;  %v3379_v5 = vld [vmem:[#allocation2 + $0xa8] sm:$0xe]  ;;  %v3720_v22 = vrot.slane %v3719_v3, 4  ;;  %v3186_v16 = vrot.slane %v3184_v55, 5 }
 0x18e   : > { %v3011_v58 = vrot.slane %v3009_v53, 5  ;;  %v9301_v49 = vadd.f32 %v2061_v46, %v1948_v48  ;;  %v3724_v48 = vrot.slane %v3722_v25, 5  ;;  %v3191_v53 = vrot.slane %v3189_v63, 4  ;;  %v6975_v25 = vld [vmem:[#allocation2 + $0x44] sm:$0xf] }
 0x18f   : > { %v3006_v20 = vor.u32 %v3005_v13, %v3002_v38  ;;  %v3194_v11 = vrot.slane %v3192_v18, 5  ;;  %v3181_v38 = vor.u32 %v3180_v29, %v3177_v31  ;;  %v3200_v13 = vrot.slane %v3198_v45, 5  ;;  %v3686_v55 = vld [vmem:[#allocation2 + $0x80] sm:$0xf]  ;;  %v7639_v63 = vld [vmem:[#allocation2 + $0x60] sm:$0xf0] }
 0x190   : > { %v1757_v41 = vpop.f32.mrf.mxu2  ;;  %v6937_v36 = vrot.slane %v3379_v5, 9  ;;  %v6938_v60 = vrot.slane %v3380_v23, 9  ;;  %v3421_v32 = vrot.slane %v9193_v19, 5  ;;  %v3688_v45 = vld [vmem:[#allocation2 + $0xa0] sm:$0xf]  ;;  %v3727_v29 = vshrl.u32 %v3686_v55, 16 }
 0x191   : > { %v3007_v4 = vrot.slane %v3006_v20, 4  ;;  %3346 = vmatmul.bf16.vlgmr.msrb.gmra.mxu2 %v3282_v7  ;;  %3524 = vmatmul.bf16.gmra.mxu3 %v3456_v33  ;;  %v1774_v7 = vadd.f32 %v1757_v41, %v9260_v9  ;;  %v3195_v33 = vor.u32 %v3194_v11, %v3191_v53  ;;  %v3182_v3 = vrot.slane %v3181_v38, 4  ;;  %v7662_v41 = vld [vmem:[#allocation9 + $0x398] sm:$0xff]  ;;  %v3139_v38 = vld [vmem:[#allocation2 + $0xbc] sm:$0x1] }
 0x192   : > { %v3711_v9 = vsel %vm8703_vm14, %v9307_v61, %v9303_v14  ;;  %v3418_v28 = vsel %vm8840_vm6, %v6937_v36, %v3417_v30  ;;  %v7670_v5 = vld [vmem:[#allocation9 + $0x3d8] sm:$0xff]  ;;  %v6976_v11 = vor.u32 %v7639_v63, %v6975_v25  ;;  %4139 = vmatpush.bf16.msra.mxu2 %v7662_v41  ;;  %v3729_v30 = vrot.slane %v3727_v29, 4 }
 0x193   : > { %v3012_v35 = vsel %vm8703_vm14, %v3007_v4, %v3011_v58  ;;  %v1950_v20 = vadd.f32 %v9288_v1, %v1774_v7  ;;  %v3196_v18 = vrot.slane %v3195_v33, 4  ;;  %v3725_v1 = vsel %vm8703_vm14, %v3720_v22, %v3724_v48  ;;  %v3140_v7 = vld [vmem:[#allocation2 + $0xcc] sm:$0xf]  ;;  %4312 = vmatpush.bf16.msra.mxu3 %v7670_v5  ;;  %v9341_v36 = vld [vmem:[#allocation2 + $0x90] sm:$0x1] }
 0x194   : > { %v3036_v46 = vunpack.c.l.b16 %v3012_v35  ;;  %v3187_v19 = vsel %vm8703_vm14, %v3182_v3, %v3186_v16  ;;  %v3451_v4 = vunpack.c.l.b16 %v3418_v28  ;;  %v3730_v48 = vshll.u32 %v3686_v55, 16  ;;  %v3138_v35 = vld [vmem:[#allocation2 + $0xac] sm:$0xf]  ;;  %v9345_v55 = vld [vmem:[#allocation2 + $0xb0] sm:$0x1] }
 0x195   : > { %v9315_v21 = vpop.f32.mrf.mxu0  ;;  %v3201_v31 = vsel %vm8703_vm14, %v3196_v18, %v3200_v13  ;;  %v3276_v14 = vunpack.c.l.b16 %v3187_v19  ;;  %v3741_v22 = vshrl.u32 %v3688_v45, 16  ;;  %v9337_v13 = vunpack.c.l.b16 %v3711_v9  ;;  %v9343_v3 = vpop.f32.mrf.mxu3  ;;  %v3141_v18 = vld [vmem:[#allocation2 + $0xdc] sm:$0x1] }
 0x196   : > { %v3040_v58 = vpack.c.b16 %v3036_v46, %v9298_v37  ;;  %v3422_v37 = vsel %vm8840_vm6, %v6938_v60, %v3421_v32  ;;  %v3277_v23 = vunpack.c.l.b16 %v3201_v31  ;;  %v7661_v46 = vld [vmem:[#allocation9 + $0x390] sm:$0xff]  ;;  %v9339_v33 = vunpack.c.l.b16 %v3725_v1 }
 0x197   : > { %v3452_v61 = vunpack.c.l.b16 %v3422_v37  ;;  %v3732_v25 = vrot.slane %v3730_v48, 5  ;;  %v3743_v63 = vrot.slane %v3741_v22, 4  ;;  %v3206_v28 = vshll.u32 %v3138_v35, 16  ;;  %4140 = vmatpush.bf16.msra.mxu2 %v7661_v46 }
 0x198   : > { %3116 = vmatmul.bf16.gmra.mxu1 %v3040_v58  ;;  %v3283_v60 = vpack.c.b16 %v3277_v23, %v3276_v14  ;;  %v3203_v58 = vshrl.u32 %v3138_v35, 16  ;;  %v3212_v9 = vshll.u32 %v3139_v38, 16  ;;  %v3217_v19 = vshrl.u32 %v3140_v7, 16  ;;  %v9347_v1 = vpop.f32.mrf.mxu2  ;;  %v3381_v14 = vld [vmem:[#allocation2 + $0xe8] sm:$0xe] }
 0x199   : > { %v2306_v53 = vpop.f32.mrf.mxu1  ;;  %v3457_v32 = vpack.c.b16 %v3452_v61, %v3451_v4  ;;  %v3736_v37 = vshll.u32 %v9341_v36, 16  ;;  %v3220_v41 = vshll.u32 %v3140_v7, 16  ;;  %v3733_v61 = vor.u32 %v3732_v25, %v3729_v30  ;;  %v3382_v35 = vld [vmem:[#allocation2 + $0x108] sm:$0xe] }
 0x19a   : > { %v9335_v16 = vadd.f32 %v2306_v53, %v9301_v49  ;;  %v3744_v49 = vshll.u32 %v3688_v45, 16  ;;  %v3205_v29 = vrot.slane %v3203_v58, 4  ;;  %v3750_v45 = vshll.u32 %v9345_v55, 16 }
 0x19b   : > { %v3208_v5 = vrot.slane %v3206_v28, 5  ;;  %v3219_v53 = vrot.slane %v3217_v19, 4  ;;  %v3214_v23 = vrot.slane %v3212_v9, 5  ;;  %v3222_v48 = vrot.slane %v3220_v41, 5  ;;  %v3690_v28 = vld [vmem:[#allocation2 + $0xc0] sm:$0xf] }
 0x19c   : > { %v3746_v31 = vrot.slane %v3744_v49, 5  ;;  %v3226_v22 = vshll.u32 %v3141_v18, 16  ;;  %v6939_v46 = vrot.slane %v3381_v14, 9  ;;  %v3425_v58 = vrot.slane %v9253_v56, 5  ;;  %v6979_v14 = vld [vmem:[#allocation2 + $0x84] sm:$0xf] }
 0x19d   : > { %3653 = vmatmul.bf16.vlgmr.msrb.gmra.mxu0 %v6976_v11  ;;  %v3209_v7 = vor.u32 %v3208_v5, %v3205_v29  ;;  %v9358_v30 = vadd.f32 %v9165_v62, %v9191_v27  ;;  %v3223_v25 = vor.u32 %v3222_v48, %v3219_v53  ;;  %v9362_v18 = vrot.slane %v3736_v37, 5  ;;  %v7669_v37 = vld [vmem:[#allocation9 + $0x3d0] sm:$0xff] }
 0x19e   : > { %v3747_v49 = vor.u32 %v3746_v31, %v3743_v63  ;;  %v3228_v9 = vrot.slane %v3226_v22, 5  ;;  %v6940_v19 = vrot.slane %v3382_v35, 9  ;;  %v3426_v56 = vsel %vm8840_vm6, %v6939_v46, %v3425_v58  ;;  %v3692_v29 = vld [vmem:[#allocation2 + $0xe0] sm:$0xf]  ;;  %4313 = vmatpush.bf16.msra.mxu3 %v7669_v37  ;;  %v9381_v35 = vld [vmem:[#allocation2 + $0xd0] sm:$0x1] }
 0x19f   : > { %v2066_v4 = vpop.f32.mrf.mxu0  ;;  %v3224_v63 = vrot.slane %v3223_v25, 4  ;;  %v3429_v31 = vrot.slane %v9295_v47, 5  ;;  %v3734_v62 = vrot.slane %v3733_v61, 4  ;;  %v3755_v41 = vshrl.u32 %v3690_v28, 16 }
 0x1a0   : > { %v9351_v11 = vadd.f32 %v2066_v4, %v1950_v20  ;;  %v3834_v20 = vpack.c.b16 %v9339_v33, %v9337_v13  ;;  %v3748_v27 = vrot.slane %v3747_v49, 4  ;;  %v9371_v33 = vpop.f32.mrf.mxu3  ;;  %v7640_v4 = vld [vmem:[#allocation2 + $0xa0] sm:$0xf0]  ;;  %v3758_v61 = vshll.u32 %v3690_v28, 16 }
 0x1a1   : > { %3351 = vmatmul.bf16.gmra.mxu2 %v3283_v60  ;;  %v9353_v38 = vpop.f32.mrf.mxu1  ;;  %3529 = vmatmul.bf16.gmra.mxu3 %v3457_v32  ;;  %v3210_v60 = vrot.slane %v3209_v7, 4  ;;  %v9364_v32 = vrot.slane %v3750_v45, 5  ;;  %v3229_v45 = vsel %vm8703_vm14, %v3224_v63, %v3228_v9  ;;  %v3430_v47 = vsel %vm8840_vm6, %v6940_v19, %v3429_v31  ;;  %v7660_v9 = vld [vmem:[#allocation9 + $0x388] sm:$0xff]  ;;  %v9387_v31 = vld [vmem:[#allocation2 + $0xf0] sm:$0x1] }
 0x1a2   : > { %v3279_v48 = vunpack.c.l.b16 %v3229_v45  ;;  %v3453_v22 = vunpack.c.l.b16 %v3426_v56  ;;  %v3454_v7 = vunpack.c.l.b16 %v3430_v47  ;;  %v3757_v46 = vrot.slane %v3755_v41, 4  ;;  %4141 = vmatpush.bf16.msra.mxu2 %v7660_v9 }
 0x1a3   : > { %v3215_v13 = vsel %vm8703_vm14, %v3210_v60, %v3214_v23  ;;  %v3760_v58 = vrot.slane %v3758_v61, 5  ;;  %v3769_v25 = vshrl.u32 %v3692_v29, 16  ;;  %v3142_v60 = vld [vmem:[#allocation2 + $0xec] sm:$0xf]  ;;  %v6980_v63 = vor.u32 %v7640_v4, %v6979_v14  ;;  %v7668_v23 = vld [vmem:[#allocation9 + $0x3c8] sm:$0xff] }
 0x1a4   : > { %v9375_v5 = vunpack.c.l.b16 %v3215_v13  ;;  %v3739_v28 = vsel %vm8703_vm14, %v3734_v62, %v9362_v18  ;;  %v3772_v56 = vshll.u32 %v3692_v29, 16  ;;  %v3764_v41 = vshll.u32 %v9381_v35, 16  ;;  %v3144_v14 = vld [vmem:[#allocation2 + $0x10c] sm:$0xf]  ;;  %v3143_v62 = vld [vmem:[#allocation2 + $0xfc] sm:$0x1]  ;;  %4314 = vmatpush.bf16.msra.mxu3 %v7668_v23 }
 0x1a5   : > { %v3771_v45 = vrot.slane %v3769_v25, 4  ;;  %v3145_v29 = vld [vmem:[#allocation2 + $0x11c] sm:$0x1]  ;;  %v3231_v47 = vshrl.u32 %v3142_v60, 16  ;;  %v3458_v61 = vpack.c.b16 %v3454_v7, %v3453_v22  ;;  %v3245_v25 = vshrl.u32 %v3144_v14, 16 }
 0x1a6   : > { %v3284_v37 = vpack.c.b16 %v3279_v48, %v9375_v5  ;;  %v3774_v18 = vrot.slane %v3772_v56, 5  ;;  %v3248_v9 = vshll.u32 %v3144_v14, 16  ;;  %v4172_v56 = vld [vmem:[#allocation2 + $0x40] sm:$0xe]  ;;  %v3766_v22 = vrot.slane %v3764_v41, 5 }
 0x1a7   : > { %v1762_v49 = vpop.f32.mrf.mxu2  ;;  %v3233_v48 = vrot.slane %v3231_v47, 4  ;;  %v9401_v54 = vpop.f32.mrf.mxu0 }
 0x1a8   : > { %3898 = vmatmul.bf16.vlgmr.msrb.gmra.mxu1 %v3834_v20  ;;  %v1776_v19 = vadd.f32 %v1762_v49, %v9170_v59  ;;  %v3753_v20 = vsel %vm8703_vm14, %v3748_v27, %v9364_v32  ;;  %v3761_v49 = vor.u32 %v3760_v58, %v3757_v46  ;;  %v3778_v32 = vshll.u32 %v9387_v31, 16  ;;  %v9403_v7 = vpop.f32.mrf.mxu3 }
 0x1a9   : > { %v3234_v27 = vshll.u32 %v3142_v60, 16  ;;  %v3775_v5 = vor.u32 %v3774_v18, %v3771_v45  ;;  %v3829_v6 = vunpack.c.l.b16 %v3753_v20  ;;  %v3247_v46 = vrot.slane %v3245_v25, 4  ;;  %v7667_v60 = vld [vmem:[#allocation9 + $0x3c0] sm:$0xff] }
 0x1aa   : > { %v2311_v13 = vpop.f32.mrf.mxu1  ;;  %v9398_v59 = vadd.f32 %v9343_v3, %v1776_v19  ;;  %v3240_v3 = vshll.u32 %v3143_v62, 16  ;;  %v3254_v19 = vshll.u32 %v3145_v29, 16  ;;  %v3250_v58 = vrot.slane %v3248_v9, 5  ;;  %v6983_v9 = vld [vmem:[#allocation2 + $0xc4] sm:$0xf]  ;;  %4315 = vmatpush.bf16.msra.mxu3 %v7667_v60 }
 0x1ab   : > { %v9395_v4 = vadd.f32 %v2311_v13, %v9351_v11  ;;  %v7659_v11 = vld [vmem:[#allocation9 + $0x380] sm:$0xff]  ;;  %v3828_v13 = vunpack.c.l.b16 %v3739_v28  ;;  %v3236_v53 = vrot.slane %v3234_v27, 5  ;;  %v3762_v14 = vrot.slane %v3761_v49, 4 }
 0x1ac   : > { %4142 = vmatpush.bf16.msra.mxu2 %v7659_v11  ;;  %v3776_v18 = vrot.slane %v3775_v5, 4  ;;  %v3780_v28 = vrot.slane %v3778_v32, 5  ;;  %v3251_v62 = vor.u32 %v3250_v58, %v3247_v46  ;;  %v7085_v29 = vrot.slane %v4172_v56, 9  ;;  %v7641_v5 = vld [vmem:[#allocation2 + $0xe0] sm:$0xf0] }
 0x1ad   : > { %3658 = vmatmul.bf16.gmra.mxu0 %v6980_v63  ;;  %v4173_v63 = vld [vmem:[#allocation2 + $0x60] sm:$0xe]  ;;  %v3237_v47 = vor.u32 %v3236_v53, %v3233_v48  ;;  %v3242_v50 = vrot.slane %v3240_v3, 5  ;;  %v3256_v25 = vrot.slane %v3254_v19, 5  ;;  %v3835_v49 = vpack.c.b16 %v3829_v6, %v3828_v13 }
 0x1ae   : > { %v7086_v41 = vrot.slane %v4173_v63, 9  ;;  %v3252_v11 = vrot.slane %v3251_v62, 4  ;;  %v3767_v53 = vsel %vm8703_vm14, %v3762_v14, %v3766_v22  ;;  %v10216_v32 = vrot.slane %v9284_v26, 5  ;;  %v3696_v22 = vld [vmem:[#allocation2 + $0x120] sm:$0xf] }
 0x1af   : > { %v1764_v45 = vpop.f32.mrf.mxu2  ;;  %v3238_v27 = vrot.slane %v3237_v47, 4  ;;  %v6984_v19 = vor.u32 %v7641_v5, %v6983_v9  ;;  %v9425_v56 = vunpack.c.l.b16 %v3767_v53  ;;  %v3929_v26 = vld [vmem:[#allocation2 + $0x64] sm:$0xf]  ;;  %v3800_v5 = vshll.u32 %v3696_v22, 16  ;;  %v3930_v53 = vld [vmem:[#allocation2 + $0x74] sm:$0x1] }
 0x1b0   : > { %v1777_v20 = vadd.f32 %v1764_v45, %v9358_v30  ;;  %v3781_v30 = vsel %vm8703_vm14, %v3776_v18, %v3780_v28  ;;  %v4199_v48 = vsel %vm8840_vm6, %v7085_v29, %v10216_v32  ;;  %v3257_v13 = vsel %vm8703_vm14, %v3252_v11, %v3256_v25  ;;  %v3928_v45 = vld [vmem:[#allocation2 + $0x54] sm:$0x1]  ;;  %v1945_v47 = vpop.f32.mrf.mxu3 }
 0x1b1   : > { %3356 = vmatmul.bf16.gmra.mxu2 %v3284_v37  ;;  %3534 = vmatmul.bf16.gmra.mxu3 %v3458_v61  ;;  %v3694_v37 = vld [vmem:[#allocation2 + $0x100] sm:$0xf]  ;;  %v3927_v61 = vld [vmem:[#allocation2 + $0x44] sm:$0xf]  ;;  %v3243_v6 = vsel %vm8703_vm14, %v3238_v27, %v3242_v50  ;;  %v9427_v60 = vunpack.c.l.b16 %v3781_v30  ;;  %v3281_v50 = vunpack.c.l.b16 %v3257_v13  ;;  %v3797_v25 = vshrl.u32 %v3696_v22, 16 }
 0x1b2   : > { %v9407_v23 = vadd.f32 %v9371_v33, %v1777_v20  ;;  %v10217_v33 = vrot.slane %v9292_v51, 5  ;;  %v3783_v46 = vshrl.u32 %v3694_v37, 16  ;;  %v3944_v58 = vshrl.u32 %v3927_v61, 16  ;;  %v9429_v29 = vpop.f32.mrf.mxu1  ;;  %v4175_v22 = vld [vmem:[#allocation2 + $0xa0] sm:$0xe] }
 0x1b3   : > { %v4244_v51 = vunpack.c.l.b16 %v4199_v48  ;;  %v3947_v14 = vshll.u32 %v3927_v61, 16  ;;  %v3280_v28 = vunpack.c.l.b16 %v3243_v6  ;;  %v3786_v20 = vshll.u32 %v3694_v37, 16 }
 0x1b4   : > { %v4203_v3 = vsel %vm8840_vm6, %v7086_v41, %v10217_v33  ;;  %v3946_v62 = vrot.slane %v3944_v58, 4  ;;  %v3958_v11 = vshrl.u32 %v3929_v26, 16  ;;  %v3953_v30 = vshll.u32 %v3928_v45, 16 }
 0x1b5   : > { %v4245_v63 = vunpack.c.l.b16 %v4203_v3  ;;  %v3949_v9 = vrot.slane %v3947_v14, 5  ;;  %v3961_v61 = vshll.u32 %v3929_v26, 16  ;;  %v3785_v48 = vrot.slane %v3783_v46, 4 }
 0x1b6   : > { %v3960_v3 = vrot.slane %v3958_v11, 4  ;;  %v3285_v37 = vpack.c.b16 %v3281_v50, %v3280_v28  ;;  %v3788_v13 = vrot.slane %v3786_v20, 5  ;;  %v3799_v14 = vrot.slane %v3797_v25, 4  ;;  %v3931_v25 = vld [vmem:[#allocation2 + $0x84] sm:$0xf] }
 0x1b7   : > { %v4252_v32 = vpack.c.b16 %v4245_v63, %v4244_v51  ;;  %v3950_v33 = vor.u32 %v3949_v9, %v3946_v62  ;;  %v3963_v58 = vrot.slane %v3961_v61, 5  ;;  %v3802_v26 = vrot.slane %v3800_v5, 5 }
 0x1b8   : > { %3903 = vmatmul.bf16.gmra.mxu1 %v3835_v49  ;;  %v3955_v46 = vrot.slane %v3953_v30, 5  ;;  %v7088_v28 = vrot.slane %v4175_v22, 9  ;;  %v1533_v50 = vadd.f32 %v9205_v57, %v9251_v15  ;;  %v3836_v20 = vpack.c.b16 %v9427_v60, %v9425_v56  ;;  %v7642_v30 = vld [vmem:[#allocation2 + $0x120] sm:$0xf0] }
 0x1b9   : > { %v2071_v18 = vpop.f32.mrf.mxu0  ;;  %v3951_v51 = vrot.slane %v3950_v33, 4  ;;  %v3964_v63 = vor.u32 %v3963_v58, %v3960_v3  ;;  %v3789_v57 = vor.u32 %v3788_v13, %v3785_v48  ;;  %v3803_v15 = vor.u32 %v3802_v26, %v3799_v14 }
 0x1ba   : > { %v2085_v41 = vadd.f32 %v2071_v18, %v9398_v59  ;;  %v1767_v27 = vpop.f32.mrf.mxu2  ;;  %v9436_v59 = vld [vmem:[#allocation2 + $0x110] sm:$0x1]  ;;  %v3967_v18 = vshll.u32 %v3930_v53, 16  ;;  %v3933_v53 = vld [vmem:[#allocation2 + $0xa4] sm:$0xf]  ;;  %v3975_v58 = vshll.u32 %v3931_v25, 16 }
 0x1bb   : > { %v1778_v49 = vadd.f32 %v1767_v27, %v9214_v44  ;;  %v4174_v44 = vld [vmem:[#allocation2 + $0x80] sm:$0xe]  ;;  %v9438_v27 = vld [vmem:[#allocation2 + $0x130] sm:$0x1]  ;;  %v3792_v11 = vshll.u32 %v9436_v59, 16  ;;  %v3956_v56 = vsel %vm8703_vm14, %v3951_v51, %v3955_v46  ;;  %v3986_v48 = vshrl.u32 %v3933_v53, 16 }
 0x1bc   : > { %v7087_v45 = vrot.slane %v4174_v44, 9  ;;  %v3969_v5 = vrot.slane %v3967_v18, 5  ;;  %v3989_v13 = vshll.u32 %v3933_v53, 16  ;;  %v3790_v26 = vrot.slane %v3789_v57, 4 }
 0x1bd   : > { %3663 = vmatmul.bf16.gmra.mxu0 %v6984_v19  ;;  %v9434_v6 = vadd.f32 %v9403_v7, %v1778_v49  ;;  %v4206_v19 = vrot.slane %v9341_v36, 5  ;;  %v4210_v7 = vrot.slane %v9345_v55, 5  ;;  %v3806_v49 = vshll.u32 %v9438_v27, 16  ;;  %v6987_v55 = vld [vmem:[#allocation2 + $0x104] sm:$0xf] }
 0x1be   : > { %v3965_v36 = vrot.slane %v3964_v63, 4  ;;  %v6988_v14 = vor.u32 %v7642_v30, %v6987_v55  ;;  %v3794_v51 = vrot.slane %v3792_v11, 5  ;;  %v3804_v46 = vrot.slane %v3803_v15, 4 }
 0x1bf   : > { %v4211_v3 = vsel %vm8840_vm6, %v7088_v28, %v4210_v7  ;;  %v3808_v63 = vrot.slane %v3806_v49, 5  ;;  %v3932_v7 = vld [vmem:[#allocation2 + $0x94] sm:$0x1] }
 0x1c0   : > { %v3970_v22 = vsel %vm8703_vm14, %v3965_v36, %v3969_v5  ;;  %v4247_v28 = vunpack.c.l.b16 %v4211_v3  ;;  %v3795_v11 = vsel %vm8703_vm14, %v3790_v26, %v3794_v51  ;;  %v3981_v36 = vshll.u32 %v3932_v7, 16  ;;  %v3935_v26 = vld [vmem:[#allocation2 + $0xc4] sm:$0xf] }
 0x1c1   : > { %v9446_v62 = vpop.f32.mrf.mxu0  ;;  %3361 = vmatmul.bf16.gmra.mxu2 %v3285_v37  ;;  %4316 = vmatmul.bf16.vlgmr.msra.gmra.mxu3 %v4252_v32  ;;  %v4207_v32 = vsel %vm8840_vm6, %v7087_v45, %v4206_v19  ;;  %v3972_v37 = vshrl.u32 %v3931_v25, 16  ;;  %v4071_v45 = vunpack.c.l.b16 %v3956_v56  ;;  %v3934_v25 = vld [vmem:[#allocation2 + $0xb4] sm:$0x1]  ;;  %v3937_v51 = vld [vmem:[#allocation2 + $0xe4] sm:$0xf] }
 0x1c2   : > { %v1769_v9 = vpop.f32.mrf.mxu2  ;;  %v4246_v19 = vunpack.c.l.b16 %v4207_v32  ;;  %v3995_v5 = vshll.u32 %v3934_v25, 16  ;;  %v3832_v32 = vunpack.c.l.b16 %v3795_v11  ;;  %v4003_v25 = vshll.u32 %v3935_v26, 16 }
 0x1c3   : > { %v1779_v61 = vadd.f32 %v1769_v9, %v1533_v50  ;;  %v3974_v50 = vrot.slane %v3972_v37, 4  ;;  %v3988_v9 = vrot.slane %v3986_v48, 4  ;;  %v4177_v37 = vld [vmem:[#allocation2 + $0xe0] sm:$0xe] }
 0x1c4   : > { %v2316_v60 = vpop.f32.mrf.mxu1  ;;  %v9452_v33 = vpop.f32.mrf.mxu3  ;;  %v4253_v15 = vpack.c.b16 %v4247_v28, %v4246_v19  ;;  %v3997_v48 = vrot.slane %v3995_v5, 5  ;;  %v4218_v19 = vrot.slane %v9387_v31, 5 }
 0x1c5   : > { %v9458_v18 = vadd.f32 %v2316_v60, %v2085_v41  ;;  %v9460_v44 = vadd.f32 %v1945_v47, %v1779_v61  ;;  %v4072_v41 = vunpack.c.l.b16 %v3970_v22  ;;  %v3977_v47 = vrot.slane %v3975_v58, 5 }
 0x1c6   : > { %v3991_v61 = vrot.slane %v3989_v13, 5  ;;  %v3983_v58 = vrot.slane %v3981_v36, 5 }
 0x1c7   : > { %v4079_v57 = vpack.c.b16 %v4072_v41, %v4071_v45  ;;  %v3978_v56 = vor.u32 %v3977_v47, %v3974_v50  ;;  %v7090_v45 = vrot.slane %v4177_v37, 9  ;;  %v4000_v41 = vshrl.u32 %v3935_v26, 16  ;;  %v3938_v37 = vld [vmem:[#allocation2 + $0xf4] sm:$0x1] }
 0x1c8   : > { %3908 = vmatmul.bf16.gmra.mxu1 %v3836_v20  ;;  %v3809_v20 = vsel %vm8703_vm14, %v3804_v46, %v3808_v63  ;;  %v3992_v60 = vor.u32 %v3991_v61, %v3988_v9  ;;  %v4014_v47 = vshrl.u32 %v3937_v51, 16  ;;  %v4017_v9 = vshll.u32 %v3937_v51, 16 }
 0x1c9   : > { %v3833_v3 = vunpack.c.l.b16 %v3809_v20  ;;  %v3979_v13 = vrot.slane %v3978_v56, 4  ;;  %v4219_v36 = vsel %vm8840_vm6, %v7090_v45, %v4218_v19 }
 0x1ca   : > { %v2076_v53 = vpop.f32.mrf.mxu0  ;;  %v3993_v22 = vrot.slane %v3992_v60, 4  ;;  %v4019_v56 = vrot.slane %v4017_v9, 5 }
 0x1cb   : > { %v2087_v55 = vadd.f32 %v2076_v53, %v9434_v6  ;;  %v4176_v6 = vld [vmem:[#allocation2 + $0xc0] sm:$0xe]  ;;  %v3837_v28 = vpack.c.b16 %v3833_v3, %v3832_v32  ;;  %v3984_v11 = vsel %vm8703_vm14, %v3979_v13, %v3983_v58  ;;  %v4249_v3 = vunpack.c.l.b16 %v4219_v36 }
 0x1cc   : > { %v9465_v30 = vpop.f32.mrf.mxu1  ;;  %v9471_v49 = vpop.f32.mrf.mxu3  ;;  %v7089_v63 = vrot.slane %v4176_v6, 9  ;;  %v4073_v60 = vunpack.c.l.b16 %v3984_v11  ;;  %v3936_v6 = vld [vmem:[#allocation2 + $0xd4] sm:$0x1]  ;;  %v4226_v36 = vrot.slane %v9438_v27, 5 }
 0x1cd   : > { %3668 = vmatmul.bf16.gmra.mxu0 %v6988_v14  ;;  %v4214_v14 = vrot.slane %v9381_v35, 5  ;;  %v3998_v35 = vsel %vm8703_vm14, %v3993_v22, %v3997_v48  ;;  %v4009_v51 = vshll.u32 %v3936_v6, 16 }
 0x1ce   : > { %v4074_v32 = vunpack.c.l.b16 %v3998_v35  ;;  %v4222_v35 = vrot.slane %v9436_v59, 5 }
 0x1cf   : > { %v4215_v31 = vsel %vm8840_vm6, %v7089_v63, %v4214_v14  ;;  %v4023_v63 = vshll.u32 %v3938_v37, 16 }
 0x1d0   : > { %v4080_v45 = vpack.c.b16 %v4074_v32, %v4073_v60 }
 0x1d1   : > { %4143 = vmatmul.bf16.vlgmr.msra.gmra.mxu2 %v4079_v57  ;;  %4321 = vmatmul.bf16.gmra.mxu3 %v4253_v15  ;;  %v4002_v57 = vrot.slane %v4000_v41, 4  ;;  %v4005_v15 = vrot.slane %v4003_v25, 5  ;;  %v4011_v25 = vrot.slane %v4009_v51, 5  ;;  %v4025_v9 = vrot.slane %v4023_v63, 5 }
 0x1d2   : > { %v9473_v46 = vpop.f32.mrf.mxu0 }
 0x1d3   : > { %v4006_v26 = vor.u32 %v4005_v15, %v4002_v57 }
 0x1d4   : > { %v2551_v7 = vpop.f32.mrf.mxu2  ;;  %v9477_v50 = vpop.f32.mrf.mxu3 }
 0x1d5   : > { %v2321_v61 = vpop.f32.mrf.mxu1  ;;  %v2571_v53 = vadd.f32 %v2551_v7, %v9335_v16  ;;  %v4016_v16 = vrot.slane %v4014_v47, 4  ;;  %v4179_v7 = vld [vmem:[#allocation2 + $0x120] sm:$0xe]  ;;  %v4007_v41 = vrot.slane %v4006_v26, 4 }
 0x1d6   : > { %v9482_v20 = vadd.f32 %v2321_v61, %v2087_v55  ;;  %v4248_v55 = vunpack.c.l.b16 %v4215_v31  ;;  %v3939_v61 = vld [vmem:[#allocation2 + $0x104] sm:$0xf]  ;;  %v7092_v31 = vrot.slane %v4179_v7, 9 }
 0x1d7   : > { %v2744_v5 = vadd.f32 %v9452_v33, %v2571_v53  ;;  %v4020_v33 = vor.u32 %v4019_v56, %v4016_v16  ;;  %v4012_v16 = vsel %vm8703_vm14, %v4007_v41, %v4011_v25 }
 0x1d8   : > { %3913 = vmatmul.bf16.gmra.mxu1 %v3837_v28  ;;  %v4254_v19 = vpack.c.b16 %v4249_v3, %v4248_v55  ;;  %v4178_v28 = vld [vmem:[#allocation2 + $0x100] sm:$0xe]  ;;  %v4028_v55 = vshrl.u32 %v3939_v61, 16  ;;  %v4031_v3 = vshll.u32 %v3939_v61, 16  ;;  %v4227_v27 = vsel %vm8840_vm6, %v7092_v31, %v4226_v36 }
 0x1d9   : > { %v4021_v47 = vrot.slane %v4020_v33, 4  ;;  %v7091_v11 = vrot.slane %v4178_v28, 9  ;;  %v4075_v51 = vunpack.c.l.b16 %v4012_v16 }
 0x1da   : > { %v2857_v58 = vpop.f32.mrf.mxu0  ;;  %v4030_v28 = vrot.slane %v4028_v55, 4 }
 0x1db   : > { %v2877_v48 = vadd.f32 %v2857_v58, %v2744_v5  ;;  %v3941_v5 = vld [vmem:[#allocation2 + $0x124] sm:$0xf]  ;;  %v4026_v56 = vsel %vm8703_vm14, %v4021_v47, %v4025_v9  ;;  %v4223_v59 = vsel %vm8840_vm6, %v7091_v11, %v4222_v35  ;;  %v3942_v47 = vld [vmem:[#allocation2 + $0x134] sm:$0x1] }
 0x1dc   : > { %v9491_v13 = vpop.f32.mrf.mxu2  ;;  %v9493_v22 = vpop.f32.mrf.mxu3  ;;  %v4042_v6 = vshrl.u32 %v3941_v5, 16  ;;  %v4045_v58 = vshll.u32 %v3941_v5, 16  ;;  %v4076_v33 = vunpack.c.l.b16 %v4026_v56  ;;  %v4250_v63 = vunpack.c.l.b16 %v4223_v59 }
 0x1dd   : > { %v9495_v14 = vpop.f32.mrf.mxu1 }
 0x1de   : > { %v4044_v7 = vrot.slane %v4042_v6, 4  ;;  %v4047_v41 = vrot.slane %v4045_v58, 5  ;;  %v4081_v35 = vpack.c.b16 %v4076_v33, %v4075_v51 }
 0x1e0   : > { %v4048_v5 = vor.u32 %v4047_v41, %v4044_v7 }
 0x1e1   : > { %4148 = vmatmul.bf16.gmra.mxu2 %v4080_v45  ;;  %4326 = vmatmul.bf16.gmra.mxu3 %v4254_v19  ;;  %v4251_v45 = vunpack.c.l.b16 %v4227_v27 }
 0x1e2   : > { %v9497_v53 = vpop.f32.mrf.mxu0 }
 0x1e4   : > { %v2556_v57 = vpop.f32.mrf.mxu2  ;;  %v2734_v15 = vpop.f32.mrf.mxu3 }
 0x1e5   : > { %v3102_v60 = vpop.f32.mrf.mxu1  ;;  %v2573_v32 = vadd.f32 %v2556_v57, %v9395_v4  ;;  %v4033_v4 = vrot.slane %v4031_v3, 5  ;;  %v4051_v57 = vshll.u32 %v3942_v47, 16 }
 0x1e6   : > { %v3122_v37 = vadd.f32 %v3102_v60, %v2877_v48  ;;  %v3940_v48 = vld [vmem:[#allocation2 + $0x114] sm:$0x1] }
 0x1e7   : > { %v2746_v26 = vadd.f32 %v9477_v50, %v2573_v32  ;;  %v4255_v50 = vpack.c.b16 %v4251_v45, %v4250_v63  ;;  %v4034_v31 = vor.u32 %v4033_v4, %v4030_v28  ;;  %v4037_v36 = vshll.u32 %v3940_v48, 16 }
 0x1e8   : > { %v4049_v32 = vrot.slane %v4048_v5, 4  ;;  %v4053_v55 = vrot.slane %v4051_v57, 5 }
 0x1e9   : > { %v4035_v56 = vrot.slane %v4034_v31, 4  ;;  %v4039_v60 = vrot.slane %v4037_v36, 5 }
 0x1ea   : > { %v2862_v19 = vpop.f32.mrf.mxu0  ;;  %v4054_v51 = vsel %vm8703_vm14, %v4049_v32, %v4053_v55 }
 0x1eb   : > { %v2879_v25 = vadd.f32 %v2862_v19, %v2746_v26  ;;  %v4040_v26 = vsel %vm8703_vm14, %v4035_v56, %v4039_v60  ;;  %v4078_v45 = vunpack.c.l.b16 %v4054_v51 }
 0x1ec   : > { %v9511_v9 = vpop.f32.mrf.mxu2  ;;  %v9513_v61 = vpop.f32.mrf.mxu3  ;;  %v4077_v63 = vunpack.c.l.b16 %v4040_v26 }
 0x1ed   : > { %v9515_v11 = vpop.f32.mrf.mxu1 }
 0x1ee   : > { %v4082_v48 = vpack.c.b16 %v4078_v45, %v4077_v63 }
 0x1f1   : > { %4153 = vmatmul.bf16.gmra.mxu2 %v4081_v35  ;;  %4331 = vmatmul.bf16.gmra.mxu3 %v4255_v50 }
 0x1f2   : > { %v9517_v16 = vpop.f32.mrf.mxu0 }
 0x1f4   : > { %v2561_v3 = vpop.f32.mrf.mxu2  ;;  %v2739_v6 = vpop.f32.mrf.mxu3 }
 0x1f5   : > { %v3107_v59 = vpop.f32.mrf.mxu1  ;;  %v2575_v27 = vadd.f32 %v2561_v3, %v9458_v18 }
 0x1f6   : > { %v3124_v58 = vadd.f32 %v3107_v59, %v2879_v25 }
 0x1f7   : > { %v2748_v33 = vadd.f32 %v2734_v15, %v2575_v27 }
 0x1fa   : > { %v2867_v19 = vpop.f32.mrf.mxu0 }
 0x1fb   : > { %v2881_v28 = vadd.f32 %v2867_v19, %v2748_v33 }
 0x1fc   : > { %v9524_v4 = vpop.f32.mrf.mxu2  ;;  %v9526_v7 = vpop.f32.mrf.mxu3 }
 0x1fd   : > { %v9528_v41 = vpop.f32.mrf.mxu1 }
 0x201   : > { %4158 = vmatmul.bf16.gmra.mxu2 %v4082_v48 }
 0x202   : > { %v9541_v3 = vpop.f32.mrf.mxu0 }
 0x204   : > { %v2566_v18 = vpop.f32.mrf.mxu2  ;;  %v3520_v25 = vpop.f32.mrf.mxu3 }
 0x205   : > { %v3112_v47 = vpop.f32.mrf.mxu1  ;;  %v2577_v35 = vadd.f32 %v2566_v18, %v9482_v20 }
 0x206   : > { %v3126_v50 = vadd.f32 %v3112_v47, %v2881_v28 }
 0x207   : > { %v9531_v31 = vadd.f32 %v2739_v6, %v2577_v35 }
 0x20a   : > { %v2872_v51 = vpop.f32.mrf.mxu0 }
 0x20c   : > { %v9533_v15 = vpop.f32.mrf.mxu2  ;;  %v9535_v36 = vpop.f32.mrf.mxu3 }
 0x20d   : > { %v9543_v59 = vpop.f32.mrf.mxu1 }
 0x214   : > { %v3347_v5 = vpop.f32.mrf.mxu2  ;;  %v3525_v57 = vpop.f32.mrf.mxu3 }
 0x215   : > { %v3367_v56 = vadd.f32 %v3347_v5, %v3122_v37  ;;  %v9549_v45 = vpop.f32.mrf.mxu1  ;;  %v9551_v37 = vpop.f32.mrf.mxu0 }
 0x217   : > { %v9537_v60 = vadd.f32 %v3520_v25, %v3367_v56 }
 0x21c   : > { %v3349_v32 = vpop.f32.mrf.mxu2  ;;  %v9539_v55 = vpop.f32.mrf.mxu3 }
 0x21d   : > { %v9557_v25 = vpop.f32.mrf.mxu1 }
 0x224   : > { %v3352_v20 = vpop.f32.mrf.mxu2  ;;  %v3530_v27 = vpop.f32.mrf.mxu3 }
 0x225   : > { %v3369_v6 = vadd.f32 %v3352_v20, %v3124_v58  ;;  %v3654_v58 = vpop.f32.mrf.mxu0  ;;  %v9561_v5 = vpop.f32.mrf.mxu1 }
 0x227   : > { %v9545_v26 = vadd.f32 %v3525_v57, %v3369_v6 }
 0x22c   : > { %v3354_v33 = vpop.f32.mrf.mxu2  ;;  %v9547_v63 = vpop.f32.mrf.mxu3 }
 0x22d   : > { %v3656_v56 = vpop.f32.mrf.mxu0  ;;  %v3901_v6 = vpop.f32.mrf.mxu1 }
 0x234   : > { %v3357_v19 = vpop.f32.mrf.mxu2  ;;  %v9553_v28 = vpop.f32.mrf.mxu3 }
 0x235   : > { %v3371_v48 = vadd.f32 %v3357_v19, %v3126_v50  ;;  %v1518_v50 = vadd.f32 %v9220_v52, %v9218_v10  ;;  %v3904_v24 = vpop.f32.mrf.mxu1 }
 0x237   : > { %v9555_v18 = vadd.f32 %v3530_v27, %v3371_v48  ;;  %v1523_v27 = vadd.f32 %v9305_v42, %v9275_v17  ;;  %v1773_v19 = vadd.f32 %v9290_v8, %v1518_v50  ;;  %v3659_v48 = vpop.f32.mrf.mxu0 }
 0x239   : > { %v1949_v39 = vadd.f32 %v9262_v40, %v1773_v19  ;;  %v1775_v34 = vadd.f32 %v9347_v1, %v1523_v27  ;;  %v2086_v1 = vadd.f32 %v9446_v62, %v9407_v23 }
 0x23c   : > { %v3359_v47 = vpop.f32.mrf.mxu2  ;;  %v9559_v35 = vpop.f32.mrf.mxu3 }
 0x23d   : > { %10218 = vst [vmem:[#allocation30_spill] sm:$0xff] %v9559_v35  ;;  %v2082_v35 = vadd.f32 %v9315_v21, %v1949_v39  ;;  %v3906_v50 = vpop.f32.mrf.mxu1  ;;  %v2331_v21 = vadd.f32 %v9465_v30, %v2086_v1  ;;  %v3676_v1 = vadd.f32 %v3659_v48, %v9545_v26 }
 0x23f   : > { %v3661_v10 = vpop.f32.mrf.mxu0  ;;  %v2327_v17 = vadd.f32 %v9353_v38, %v2082_v35 }
 0x241   : > { %v2572_v42 = vadd.f32 %v9491_v13, %v2327_v17  ;;  %v2576_v13 = vadd.f32 %v9524_v4, %v2331_v21 }
 0x243   : > { %v2745_v39 = vadd.f32 %v9471_v49, %v2572_v42 }
 0x244   : > { %v3362_v57 = vpop.f32.mrf.mxu2  ;;  %v9563_v20 = vpop.f32.mrf.mxu3 }
 0x245   : > { %10219 = vst [vmem:[#allocation31_spill] sm:$0xff] %v9563_v20  ;;  %v1951_v20 = vadd.f32 %v9309_v12, %v1775_v34  ;;  %v3909_v23 = vpop.f32.mrf.mxu1 }
 0x247   : > { %v2084_v8 = vadd.f32 %v9401_v54, %v1951_v20  ;;  %v3664_v27 = vpop.f32.mrf.mxu0  ;;  %v2878_v54 = vadd.f32 %v9497_v53, %v2745_v39 }
 0x249   : > { %v2329_v40 = vadd.f32 %v9429_v29, %v2084_v8  ;;  %v2088_v29 = vadd.f32 %v9473_v46, %v9460_v44  ;;  %v3123_v62 = vadd.f32 %v9515_v11, %v2878_v54  ;;  %v2883_v44 = vadd.f32 %v2872_v51, %v9531_v31 }
 0x24b   : > { %v2574_v34 = vadd.f32 %v9511_v9, %v2329_v40  ;;  %v2749_v9 = vadd.f32 %v9513_v61, %v2576_v13  ;;  %v3368_v35 = vadd.f32 %v3349_v32, %v3123_v62  ;;  %v2333_v20 = vadd.f32 %v9495_v14, %v2088_v29 }
 0x24c   : > { %v9565_v0 = vpop.f32.mrf.mxu2  ;;  %v9572_v2 = vpop.f32.mrf.mxu3  ;;  %v3128_v14 = vadd.f32 %v9549_v45, %v2883_v44  ;;  %v3921_v45 = vadd.f32 %v3904_v24, %v3676_v1 }
 0x24d   : > { %10220 = vst [vmem:[#allocation32_spill] sm:$0xff] %v9565_v0  ;;  %v2747_v38 = vadd.f32 %v9493_v22, %v2574_v34  ;;  %v2882_v22 = vadd.f32 %v9541_v3, %v2749_v9  ;;  %v2578_v4 = vadd.f32 %v9533_v15, %v2333_v20  ;;  %v3541_v46 = vadd.f32 %v9535_v36, %v3368_v35  ;;  %v3911_v32 = vpop.f32.mrf.mxu1 }
 0x24e   : > { %v3674_v15 = vadd.f32 %v3654_v58, %v9537_v60  ;;  %v3373_v31 = vadd.f32 %v3362_v57, %v3128_v14  ;;  %v7530_v14 = vld [vmem:[#allocation12 + $0x38] sm:$0xff] }
 0x24f   : > { %v2880_v49 = vadd.f32 %v9517_v16, %v2747_v38  ;;  %v3666_v17 = vpop.f32.mrf.mxu0  ;;  %v3127_v16 = vadd.f32 %v9543_v59, %v2882_v22  ;;  %v2751_v61 = vadd.f32 %v9526_v7, %v2578_v4  ;;  %4803 = vmatpush.bf16.msra.mxu1 %v7530_v14 }
 0x250   : > { %v3919_v39 = vadd.f32 %v9561_v5, %v3674_v15 }
 0x251   : > { %v3125_v53 = vadd.f32 %v9528_v41, %v2880_v49  ;;  %v3675_v41 = vadd.f32 %v3656_v56, %v3541_v46  ;;  %v3372_v40 = vadd.f32 %v3359_v47, %v3127_v16  ;;  %v2884_v36 = vadd.f32 %v9551_v37, %v2751_v61 }
 0x252   : > { %v3678_v56 = vadd.f32 %v3664_v27, %v9555_v18  ;;  %v10222_v18 = vld [vmem:[#allocation31_spill] sm:$0xff] }
 0x253   : > { %v3370_v11 = vadd.f32 %v3354_v33, %v3125_v53  ;;  %v3920_v51 = vadd.f32 %v3901_v6, %v3675_v41  ;;  %v3545_v59 = vadd.f32 %v9547_v63, %v3372_v40  ;;  %v3129_v60 = vadd.f32 %v9557_v25, %v2884_v36 }
 0x254   : > { %v9574_v43 = vpop.f32.mrf.mxu2  ;;  %v9580_v0 = vpop.f32.mrf.mxu3  ;;  %v10221_v63 = vld [vmem:[#allocation32_spill] sm:$0xff]  ;;  %v3923_v21 = vadd.f32 %v3909_v23, %v3678_v56  ;;  %v8132_v53 = vmov 64.0  }
 0x255   : > { %v3543_v3 = vadd.f32 %v9539_v55, %v3370_v11  ;;  %v3546_v55 = vadd.f32 %v9553_v28, %v3373_v31  ;;  %v4164_v26 = vadd.f32 %v9574_v43, %v3919_v39  ;;  %v3679_v57 = vadd.f32 %v3666_v17, %v3545_v59  ;;  %v3914_v48 = vpop.f32.mrf.mxu1  ;;  %v7871_v28 = vld [vmem:[%s10151_s6] ss:$0 sm:$0xff] }
 0x256   : > { %7875 = vrcp.f32 %v8132_v53 }
 0x257   : > { %v3677_v33 = vadd.f32 %v3661_v10, %v3543_v3  ;;  %v3669_v7 = vpop.f32.mrf.mxu0  ;;  %v3374_v10 = vadd.f32 %v10221_v63, %v3129_v60  ;;  %v4337_v27 = vadd.f32 %v10222_v18, %v4164_v26  ;;  %v3924_v25 = vadd.f32 %v3911_v32, %v3679_v57  ;;  %v7525_v63 = vld [vmem:[#allocation12 + $0x10] sm:$0xff] }
 0x258   : > { %v3680_v5 = vadd.f32 %v3669_v7, %v3546_v55 }
 0x259   : > { %v3922_v37 = vadd.f32 %v3906_v50, %v3677_v33  ;;  %v10223_v50 = vld [vmem:[#allocation30_spill] sm:$0xff]  ;;  %v9631_v62 = vadd.f32 %v7871_v28, %v4337_v27 }
 0x25a   : > { %v3925_v38 = vadd.f32 %v3914_v48, %v3680_v5 }
 0x25c   : > { %v4146_v52 = vpop.f32.mrf.mxu2  ;;  %v9591_v19 = vpop.f32.mrf.mxu3 }
 0x25d   : > { %v4165_v47 = vadd.f32 %v4146_v52, %v3920_v51  ;;  %v3916_v44 = vpop.f32.mrf.mxu1  ;;  %v7876_v16 = vpop.eup %7875  ;;  %v7529_v51 = vld [vmem:[#allocation12 + $0x30] sm:$0xff] }
 0x25e   : > { %v4371_v1 = vmul.f32 64.0, %v7876_v16  ;;  %4804 = vmatpush.bf16.msra.mxu1 %v7529_v51  ;;  %vm4375_vm7 = vweird.f32 %v7876_v16  ;;  %v7686_v51 = vld [vmem:[#allocation10 + $0x38] sm:$0xff] }
 0x25f   : > { %v4338_v24 = vadd.f32 %v9572_v2, %v4165_v47  ;;  %v3671_v13 = vpop.f32.mrf.mxu0  ;;  %v7527_v47 = vld [vmem:[#allocation12 + $0x20] sm:$0xff]  ;;  %4726 = vmatpush.bf16.msra.mxu0 %v7686_v51 }
 0x260   : > { %v4372_v7 = vsub.f32 1.0, %v4371_v1 }
 0x261   : > { %v9628_v29 = vadd.f32 %v7871_v28, %v4338_v24 }
 0x262   : > { %v4373_v56 = vmul.f32 %v7876_v16, %v4372_v7  ;;  %v7685_v7 = vld [vmem:[#allocation10 + $0x30] sm:$0xff] }
 0x263   : > { %v4357_v22 = vadd.f32 %v9628_v29, %v9631_v62  ;;  %4727 = vmatpush.bf16.msra.mxu0 %v7685_v7  ;;  %v7716_v7 = vld [vmem:[#allocation10 + $0x108] sm:$0xff] }
 0x264   : > { %v4149_v12 = vpop.f32.mrf.mxu2  ;;  %v4327_v8 = vpop.f32.mrf.mxu3  ;;  %v4374_v26 = vadd.f32 %v7876_v16, %v4373_v56 }
 0x265   : > { %v4166_v6 = vadd.f32 %v4149_v12, %v3921_v45  ;;  %v3547_v12 = vadd.f32 %v10223_v50, %v3374_v10  ;;  %v7523_v50 = vld [vmem:[#allocation12] sm:$0xff] }
 0x267   : > { %v4339_v43 = vadd.f32 %v9580_v0, %v4166_v6  ;;  %v3681_v0 = vadd.f32 %v3671_v13, %v3547_v12  ;;  %v4376_v6 = vsel %vm4375_vm7, %v7876_v16, %v4374_v26 }
 0x269   : > { %v3926_v61 = vadd.f32 %v3916_v44, %v3681_v0 }
 0x26c   : > { %v4151_v30 = vpop.f32.mrf.mxu2  ;;  %v4329_v34 = vpop.f32.mrf.mxu3 }
 0x26d   : > { %v4167_v54 = vadd.f32 %v4151_v30, %v3922_v37  ;;  %v9633_v30 = vadd.f32 %v7871_v28, %v4339_v43  ;;  %v7526_v37 = vld [vmem:[#allocation12 + $0x18] sm:$0xff] }
 0x26f   : > { %v4340_v23 = vadd.f32 %v9591_v19, %v4167_v54  ;;  %v4358_v19 = vadd.f32 %v4357_v22, %v9633_v30  ;;  %v7524_v54 = vld [vmem:[#allocation12 + $0x8] sm:$0xff] }
 0x271   : > { %v9637_v17 = vadd.f32 %v7871_v28, %v4340_v23 }
 0x274   : > { %v4154_v42 = vpop.f32.mrf.mxu2  ;;  %v4332_v49 = vpop.f32.mrf.mxu3 }
 0x275   : > { %v4168_v52 = vadd.f32 %v4154_v42, %v3923_v21 }
 0x277   : > { %v4341_v35 = vadd.f32 %v4327_v8, %v4168_v52  ;;  %v4359_v8 = vadd.f32 %v4358_v19, %v9637_v17 }
 0x279   : > { %v9640_v46 = vadd.f32 %v7871_v28, %v4341_v35  ;;  %v10225_v35 = vld [vmem:[#allocation19_spill] sm:$0xff] }
 0x27b   : > { %v4360_v41 = vadd.f32 %v4359_v8, %v9640_v46 }
 0x27c   : > { %v4156_v58 = vpop.f32.mrf.mxu2  ;;  %v4334_v15 = vpop.f32.mrf.mxu3 }
 0x27d   : > { %v4169_v2 = vadd.f32 %v4156_v58, %v3924_v25 }
 0x27f   : > { %v4342_v4 = vadd.f32 %v4329_v34, %v4169_v2  ;;  %v7528_v34 = vld [vmem:[#allocation12 + $0x28] sm:$0xff] }
 0x280   : > { %4805 = vmatpush.bf16.msra.mxu1 %v7528_v34  ;;  %v7684_v34 = vld [vmem:[#allocation10 + $0x28] sm:$0xff] }
 0x281   : > { %v9643_v32 = vadd.f32 %v7871_v28, %v4342_v4  ;;  %4728 = vmatpush.bf16.msra.mxu0 %v7684_v34 }
 0x283   : > { %v4361_v31 = vadd.f32 %v4360_v41, %v9643_v32  ;;  %v10226_v41 = vld [vmem:[#allocation20_spill] sm:$0xff] }
 0x284   : > { %v4159_v9 = vpop.f32.mrf.mxu2  ;;  %4806 = vmatpush.bf16.msra.mxu1 %v7527_v47  ;;  %v10229_v47 = vld [vmem:[#allocation23_spill] sm:$0xff] }
 0x285   : > { %v4170_v20 = vadd.f32 %v4159_v9, %v3925_v38  ;;  %v10224_v9 = vld [vmem:[#allocation18_spill] sm:$0xff] }
 0x287   : > { %v4343_v11 = vadd.f32 %v4332_v49, %v4170_v20  ;;  %v501_v20 = vpack.c.bf16 %v10225_v35, %v10224_v9  ;;  %v7697_v9 = vld [vmem:[#allocation10 + $0x90] sm:$0xff] }
 0x288   : > { %4807 = vmatpush.bf16.msra.mxu1 %v7526_v37  ;;  %v7722_v37 = vld [vmem:[#allocation10 + $0x138] sm:$0xff] }
 0x289   : > { %v9646_v3 = vadd.f32 %v7871_v28, %v4343_v11 }
 0x28b   : > { %v4362_v33 = vadd.f32 %v4361_v31, %v9646_v3 }
 0x28c   : > { %v4161_v42 = vpop.f32.mrf.mxu2  ;;  %4808 = vmatpush.bf16.msra.mxu1 %v7525_v63  ;;  %v7682_v63 = vld [vmem:[#allocation10 + $0x18] sm:$0xff] }
 0x28d   : > { %v4171_v40 = vadd.f32 %v4161_v42, %v3926_v61 }
 0x28f   : > { %v4344_v36 = vadd.f32 %v4334_v15, %v4171_v40  ;;  %v10227_v40 = vld [vmem:[#allocation21_spill] sm:$0xff] }
 0x290   : > { %4809 = vmatpush.bf16.msra.mxu1 %v7524_v54  ;;  %v502_v15 = vpack.c.bf16 %v10227_v40, %v10226_v41  ;;  %v7699_v54 = vld [vmem:[#allocation10 + $0xa0] sm:$0xff]  ;;  %v9696_v41 = vld [vmem:[#allocation3] sm:$0xe] }
 0x291   : > { %v9650_v59 = vadd.f32 %v7871_v28, %v4344_v36  ;;  %v7689_v40 = vld [vmem:[#allocation10 + $0x50] sm:$0xff] }
 0x293   : > { %v4363_v39 = vadd.f32 %v4362_v33, %v9650_v59 }
 0x294   : > { %4810 = vmatpush.bf16.msra.mxu1 %v7523_v50  ;;  %v7698_v50 = vld [vmem:[#allocation10 + $0x98] sm:$0xff] }
 0x295   : > { %v4364_v45 = vrot.slane %v4363_v39, 4 }
 0x297   : > { %v4365_v55 = vadd.f32 %v4364_v45, %v4363_v39  ;;  %4811 = vmatmul.bf16.vlgmr.msra.gmra.mxu1 %v501_v20  ;;  %v7702_v39 = vld [vmem:[#allocation10 + $0xb8] sm:$0xff]  ;;  %v7701_v45 = vld [vmem:[#allocation10 + $0xb0] sm:$0xff] }
 0x298   : > { %5213 = vmatpush.bf16.msrb.mxu3 %v7702_v39  ;;  %5591 = vmatpush.bf16.msrb.mxu1 %v7722_v37  ;;  %v7713_v39 = vld [vmem:[#allocation10 + $0xf0] sm:$0xff] }
 0x299   : > { %v4366_v60 = vrot.slane %v4365_v55, 2 }
 0x29b   : > { %v4367_v58 = vadd.f32 %v4366_v60, %v4365_v55  ;;  %v10228_v55 = vld [vmem:[#allocation22_spill] sm:$0xff] }
 0x29c   : > { %v503_v60 = vpack.c.bf16 %v10229_v47, %v10228_v55  ;;  %5214 = vmatpush.bf16.msrb.mxu3 %v7701_v45 }
 0x29d   : > { %v4368_v57 = vrot.slane %v4367_v58, 1 }
 0x29f   : > { %v4369_v48 = vadd.f32 %v4368_v57, %v4367_v58  ;;  %v7694_v58 = vld [vmem:[#allocation10 + $0x78] sm:$0xff]  ;;  %v7683_v57 = vld [vmem:[#allocation10 + $0x20] sm:$0xff] }
 0x2a0   : > { %5040 = vmatpush.bf16.msrb.mxu2 %v7694_v58  ;;  %4729 = vmatpush.bf16.msra.mxu0 %v7683_v57 }
 0x2a1   : > { %v9653_v10 = vmul.f32 %v4376_v6, %v4369_v48  ;;  %v7700_v48 = vld [vmem:[#allocation10 + $0xa8] sm:$0xff] }
 0x2a2   : > { %5215 = vmatpush.bf16.msrb.mxu3 %v7700_v48 }
 0x2a3   : > { %v4378_v21 = vsub.f32 %v9631_v62, %v9653_v10  ;;  %v4379_v5 = vsub.f32 %v9628_v29, %v9653_v10  ;;  %v4380_v24 = vsub.f32 %v9633_v30, %v9653_v10  ;;  %v4381_v18 = vsub.f32 %v9637_v17, %v9653_v10 }
 0x2a4   : > { %v4382_v25 = vsub.f32 %v9640_v46, %v9653_v10  ;;  %v4383_v12 = vsub.f32 %v9643_v32, %v9653_v10  ;;  %v4384_v23 = vsub.f32 %v9646_v3, %v9653_v10  ;;  %v4385_v53 = vsub.f32 %v9650_v59, %v9653_v10  ;;  %4730 = vmatpush.bf16.msra.mxu0 %v7682_v63 }
 0x2a5   : > { %v4386_v27 = vmul.f32 %v4378_v21, %v4378_v21  ;;  %v4387_v28 = vmul.f32 %v4379_v5, %v4379_v5  ;;  %v4388_v43 = vmul.f32 %v4380_v24, %v4380_v24  ;;  %v4389_v38 = vmul.f32 %v4381_v18, %v4381_v18  ;;  %v7693_v21 = vld [vmem:[#allocation10 + $0x70] sm:$0xff] }
 0x2a6   : > { %v4390_v2 = vmul.f32 %v4382_v25, %v4382_v25  ;;  %v4391_v0 = vmul.f32 %v4383_v12, %v4383_v12  ;;  %v4392_v4 = vmul.f32 %v4384_v23, %v4384_v23  ;;  %v4393_v19 = vmul.f32 %v4385_v53, %v4385_v53  ;;  %v7721_v5 = vld [vmem:[#allocation10 + $0x130] sm:$0xff]  ;;  %5041 = vmatpush.bf16.msrb.mxu2 %v7693_v21 }
 0x2a7   : > { %v4394_v52 = vadd.f32 %v4387_v28, %v4386_v27  ;;  %4816 = vmatmul.bf16.gmra.mxu1 %v502_v15  ;;  %v7692_v27 = vld [vmem:[#allocation10 + $0x68] sm:$0xff]  ;;  %v7681_v25 = vld [vmem:[#allocation10 + $0x10] sm:$0xff]  ;;  %5216 = vmatpush.bf16.msrb.mxu3 %v7699_v54 }
 0x2a8   : > { %5592 = vmatpush.bf16.msrb.mxu1 %v7721_v5  ;;  %v7720_v28 = vld [vmem:[#allocation10 + $0x128] sm:$0xff]  ;;  %4731 = vmatpush.bf16.msra.mxu0 %v7681_v25  ;;  %v10230_v53 = vld [vmem:[#allocation24_spill] sm:$0xff] }
 0x2a9   : > { %v4395_v13 = vadd.f32 %v4394_v52, %v4388_v43  ;;  %v4419_v52 = vld [vmem:[%s10148_s3] sm:$0x1]  ;;  %v7717_v15 = vld [vmem:[#allocation10 + $0x110] sm:$0xff] }
 0x2aa   : > { %5042 = vmatpush.bf16.msrb.mxu2 %v7692_v27  ;;  %v7687_v27 = vld [vmem:[#allocation10 + $0x40] sm:$0xff] }
 0x2ab   : > { %v4396_v49 = vadd.f32 %v4395_v13, %v4389_v38  ;;  %v7691_v38 = vld [vmem:[#allocation10 + $0x60] sm:$0xff]  ;;  %5217 = vmatpush.bf16.msrb.mxu3 %v7698_v50  ;;  %v4624_v50 = vld [vmem:[#allocation3 + $0x40] sm:$0xf] }
 0x2ac   : > { %5593 = vmatpush.bf16.msrb.mxu1 %v7720_v28  ;;  %v7719_v13 = vld [vmem:[#allocation10 + $0x120] sm:$0xff] }
 0x2ad   : > { %v4397_v22 = vadd.f32 %v4396_v49, %v4390_v2  ;;  %v7680_v2 = vld [vmem:[#allocation10 + $0x8] sm:$0xff]  ;;  %v7715_v28 = vld [vmem:[#allocation10 + $0x100] sm:$0xff] }
 0x2ae   : > { %v4421_v49 = vld [vmem:[%s10149_s4] sm:$0x1]  ;;  %5043 = vmatpush.bf16.msrb.mxu2 %v7691_v38  ;;  %4732 = vmatpush.bf16.msra.mxu0 %v7680_v2 }
 0x2af   : > { %v4398_v44 = vadd.f32 %v4397_v22, %v4391_v0  ;;  %v10231_v0 = vld [vmem:[#allocation25_spill] sm:$0xff]  ;;  %5218 = vmatpush.bf16.msrb.mxu3 %v7697_v9 }
 0x2b0   : > { %v504_v22 = vpack.c.bf16 %v10231_v0, %v10230_v53  ;;  %5594 = vmatpush.bf16.msrb.mxu1 %v7719_v13  ;;  %v4582_v9 = vld [vmem:[#allocation3 + $0x8] sm:$0xf] }
 0x2b1   : > { %v4399_v11 = vadd.f32 %v4398_v44, %v4392_v4  ;;  %v7690_v4 = vld [vmem:[#allocation10 + $0x58] sm:$0xff] }
 0x2b2   : > { %v7718_v44 = vld [vmem:[#allocation10 + $0x118] sm:$0xff]  ;;  %5044 = vmatpush.bf16.msrb.mxu2 %v7690_v4 }
 0x2b3   : > { %v4400_v16 = vadd.f32 %v4399_v11, %v4393_v19  ;;  %v7679_v11 = vld [vmem:[#allocation10] sm:$0xff] }
 0x2b4   : > { %5595 = vmatpush.bf16.msrb.mxu1 %v7718_v44  ;;  %4733 = vmatpush.bf16.msra.mxu0 %v7679_v11 }
 0x2b5   : > { %v4401_v61 = vrot.slane %v4400_v16, 4 }
 0x2b6   : > { %5045 = vmatpush.bf16.msrb.mxu2 %v7689_v40 }
 0x2b7   : > { %v4402_v8 = vadd.f32 %v4401_v61, %v4400_v16  ;;  %4821 = vmatmul.bf16.gmra.mxu1 %v503_v60  ;;  %v7696_v16 = vld [vmem:[#allocation10 + $0x88] sm:$0xff]  ;;  %v7714_v61 = vld [vmem:[#allocation10 + $0xf8] sm:$0xff] }
 0x2b8   : > { %5219 = vmatpush.bf16.msrb.mxu3 %v7696_v16  ;;  %5346 = vmatpush.bf16.msrb.mxu0 %v7714_v61  ;;  %v4585_v61 = vld [vmem:[#allocation3 + $0xc] sm:$0x1] }
 0x2b9   : > { %v4403_v42 = vrot.slane %v4402_v8, 2  ;;  %5596 = vmatpush.bf16.msrb.mxu1 %v7717_v15  ;;  %v4588_v15 = vld [vmem:[#allocation3 + $0x10] sm:$0xf] }
 0x2bb   : > { %v4404_v14 = vadd.f32 %v4403_v42, %v4402_v8 }
 0x2bc   : > { %5347 = vmatpush.bf16.msrb.mxu0 %v7713_v39  ;;  %v4591_v39 = vld [vmem:[#allocation3 + $0x14] sm:$0x1] }
 0x2bd   : > { %v4405_v1 = vrot.slane %v4404_v14, 1  ;;  %5597 = vmatpush.bf16.msrb.mxu1 %v7716_v7 }
 0x2bf   : > { %v4406_v31 = vadd.f32 %v4405_v1, %v4404_v14 }
 0x2c1   : > { %v4407_v36 = vmul.f32 %v4406_v31, %v4376_v6  ;;  %5598 = vmatpush.bf16.msrb.mxu1 %v7715_v28 }
 0x2c3   : > { %v4408_v33 = vadd.f32 1e-05, %v4407_v36  ;;  %v7695_v36 = vld [vmem:[#allocation10 + $0x80] sm:$0xff] }
 0x2c4   : > { %5220 = vmatpush.bf16.msrb.mxu3 %v7695_v36 }
 0x2c5   : > { %7877 = vrsqrt.f32 %v4408_v33  ;;  %vm4415_vm4 = vweird.f32 %v4408_v33 }
 0x2c7   : > { %4826 = vmatmul.bf16.gmra.mxu1 %v504_v22 }
 0x2cb   : > { %v7878_v56 = vpop.eup %7877 }
 0x2cc   : > { %v4410_v26 = vmul.f32 %v7878_v56, %v4408_v33  ;;  %vm4416_vm11 = vweird.f32 %v7878_v56  ;;  %v7688_v33 = vld [vmem:[#allocation10 + $0x48] sm:$0xff] }
 0x2cd   : > { %vm4417_vm5 = vmor %vm4415_vm4, %vm4416_vm11  ;;  %5046 = vmatpush.bf16.msrb.mxu2 %v7688_v33 }
 0x2ce   : > { %v4411_v6 = vmul.f32 %v7878_v56, %v4410_v26 }
 0x2d0   : > { %v4412_v24 = vmul.f32 0.5, %v4411_v6 }
 0x2d1   : > { %5047 = vmatpush.bf16.msrb.mxu2 %v7687_v27 }
 0x2d2   : > { %v4413_v18 = vsub.f32 1.5, %v4412_v24 }
 0x2d4   : > { %v4414_v43 = vmul.f32 %v7878_v56, %v4413_v18 }
 0x2d6   : > { %v4418_v12 = vsel %vm4417_vm5, %v7878_v56, %v4414_v43 }
 0x2d7   : > { %v4420_v23 = vmul.f32 %v4419_v52, %v4418_v12  ;;  %v4627_v12 = vld [vmem:[#allocation3 + $0x44] sm:$0x1] }
 0x2d9   : > { %v4422_v35 = vmul.f32 %v4420_v23, %v9653_v10  ;;  %v9684_v20 = vperm.slane %v4420_v23, 0 }
 0x2db   : > { %v4423_v19 = vsub.f32 %v4421_v49, %v4422_v35  ;;  %v4425_v8 = vmul.f32 %v9684_v20, %v9631_v62  ;;  %v4426_v10 = vmul.f32 %v9684_v20, %v9628_v29  ;;  %v4432_v42 = vmul.f32 %v9684_v20, %v9650_v59 }
 0x2dc   : > { %v4427_v1 = vmul.f32 %v9684_v20, %v9633_v30  ;;  %v4428_v62 = vmul.f32 %v9684_v20, %v9637_v17  ;;  %v9707_v51 = vmul.f32 %v9684_v20, %v9643_v32  ;;  %v7237_v30 = vrot.slane %v9696_v41, 9  ;;  %v4832_v17 = vld [vmem:[#allocation3] sm:$0xf]  ;;  %v9713_v32 = vld [vmem:[#allocation3 + $0x4] sm:$0x1] }
 0x2dd   : > { %v9694_v14 = vperm.slane %v4423_v19, 0  ;;  %v4429_v45 = vmul.f32 %v9684_v20, %v9640_v46  ;;  %v4849_v60 = vshrl.u32 %v4832_v17, 16  ;;  %v4852_v26 = vshll.u32 %v4832_v17, 16  ;;  %v7712_v19 = vld [vmem:[#allocation10 + $0xe8] sm:$0xff] }
 0x2de   : > { %v5103_v5 = vrot.slane %v9713_v32, 5  ;;  %v4858_v25 = vshll.u32 %v9713_v32, 16  ;;  %5348 = vmatpush.bf16.msrb.mxu0 %v7712_v19 }
 0x2df   : > { %v4437_v29 = vadd.f32 %v9694_v14, %v4426_v10  ;;  %v4443_v31 = vadd.f32 %v9694_v14, %v4432_v42  ;;  %v4436_v59 = vadd.f32 %v9694_v14, %v4425_v8  ;;  %v4438_v34 = vadd.f32 %v9694_v14, %v4427_v1 }
 0x2e0   : > { %v4439_v58 = vadd.f32 %v9694_v14, %v4428_v62  ;;  %v4851_v46 = vrot.slane %v4849_v60, 4  ;;  %v4854_v63 = vrot.slane %v4852_v26, 5  ;;  %v4440_v52 = vadd.f32 %v9694_v14, %v4429_v45  ;;  %v4597_v26 = vld [vmem:[#allocation3 + $0x1c] sm:$0x1] }
 0x2e1   : > { %vm4451_vm8 = vcmp.ge.f32.partialorder %v4443_v31, 0.0  ;;  %v4453_v56 = vmul.f32 0.2, %v4437_v29  ;;  %v4459_v55 = vmul.f32 0.2, %v4443_v31  ;;  %vm4444_vm10 = vcmp.ge.f32.partialorder %v4436_v59, 0.0 }
 0x2e2   : > { %v4452_v47 = vmul.f32 0.2, %v4436_v59  ;;  %vm4445_vm12 = vcmp.ge.f32.partialorder %v4437_v29, 0.0  ;;  %vm4446_vm13 = vcmp.ge.f32.partialorder %v4438_v34, 0.0  ;;  %v4454_v57 = vmul.f32 0.2, %v4438_v34 }
 0x2e3   : > { %v4467_v37 = vsel %vm4451_vm8, %v4443_v31, %v4459_v55  ;;  %v4461_v24 = vsel %vm4445_vm12, %v4437_v29, %v4453_v56  ;;  %vm4447_vm9 = vcmp.ge.f32.partialorder %v4439_v58, 0.0  ;;  %v4455_v23 = vmul.f32 0.2, %v4439_v58  ;;  %v4594_v55 = vld [vmem:[#allocation3 + $0x18] sm:$0xf] }
 0x2e4   : > { %v4500_v6 = vpack.c.bf16 %v4467_v37, %v4467_v37  ;;  %v4460_v48 = vsel %vm4444_vm10, %v4436_v59, %v4452_v47  ;;  %v4462_v54 = vsel %vm4446_vm13, %v4438_v34, %v4454_v57  ;;  %v4494_v43 = vpack.c.bf16 %v4461_v24, %v4461_v24  ;;  %v7750_v59 = vld [vmem:[#allocation10 + $0x1f8] sm:$0xff] }
 0x2e5   : > { %v4493_v21 = vpack.c.bf16 %v4460_v48, %v4460_v48  ;;  %v4495_v13 = vpack.c.bf16 %v4462_v54, %v4462_v54  ;;  %v4855_v35 = vor.u32 %v4854_v63, %v4851_v46  ;;  %v4463_v62 = vsel %vm4447_vm9, %v4439_v58, %v4455_v23 }
 0x2e6   : > { %v4558_v18 = vshrl.u32 %v4500_v6, 16  ;;  %v4561_v49 = vshll.u32 %v4500_v6, 16  ;;  %v4510_v53 = vshrl.u32 %v4494_v43, 16  ;;  %v4513_v4 = vshll.u32 %v4494_v43, 16  ;;  %v7711_v6 = vld [vmem:[#allocation10 + $0xe0] sm:$0xff] }
 0x2e7   : > { %v4502_v38 = vshrl.u32 %v4493_v21, 16  ;;  %v4505_v22 = vshll.u32 %v4493_v21, 16  ;;  %v4518_v44 = vshrl.u32 %v4495_v13, 16  ;;  %v4521_v10 = vshll.u32 %v4495_v13, 16  ;;  %5349 = vmatpush.bf16.msrb.mxu0 %v7711_v6  ;;  %v9755_v13 = vld [vmem:[#allocation3 + $0x20] sm:$0xf] }
 0x2e8   : > { %v4560_v2 = vrot.slane %v4558_v18, 7  ;;  %v4512_v8 = vrot.slane %v4510_v53, 7  ;;  %v4860_v47 = vrot.slane %v4858_v25, 5  ;;  %v4496_v58 = vpack.c.bf16 %v4463_v62, %v4463_v62 }
 0x2e9   : > { %v4504_v0 = vrot.slane %v4502_v38, 7  ;;  %v4520_v1 = vrot.slane %v4518_v44, 7  ;;  %vm4448_vm15 = vcmp.ge.f32.partialorder %v4440_v52, 0.0  ;;  %v4856_v37 = vrot.slane %v4855_v35, 4 }
 0x2ea   : > { %v4563_v11 = vor.u32 %v4561_v49, %v4560_v2  ;;  %v4564_v16 = vrot.slane %v4560_v2, 4  ;;  %v4515_v33 = vor.u32 %v4513_v4, %v4512_v8  ;;  %v4516_v7 = vrot.slane %v4512_v8, 4 }
 0x2eb   : > { %v4507_v42 = vor.u32 %v4505_v22, %v4504_v0  ;;  %v4508_v40 = vrot.slane %v4504_v0, 4  ;;  %v4523_v45 = vor.u32 %v4521_v10, %v4520_v1  ;;  %v4524_v56 = vrot.slane %v4520_v1, 4 }
 0x2ec   : > { %v4625_v31 = vsel %vm8638_vm1, %v4563_v11, %v4624_v50  ;;  %v4628_v36 = vsel %vm8653_vm3, %v4564_v16, %v4627_v12  ;;  %v4589_v60 = vsel %vm8638_vm1, %v4515_v33, %v4588_v15  ;;  %v4592_v57 = vsel %vm8653_vm3, %v4516_v7, %v4591_v39  ;;  %v7127_v50 = vld [vmem:[#allocation3] sm:$0xf]  ;;  %v4603_v33 = vld [vmem:[#allocation3 + $0x24] sm:$0x1]  ;;  %v7710_v7 = vld [vmem:[#allocation10 + $0xd8] sm:$0xff] }
 0x2ed   : > { %4626 = vst [vmem:[#allocation3 + $0x40] sm:$0xf] %v4625_v31  ;;  %v4583_v17 = vsel %vm8638_vm1, %v4507_v42, %v4582_v9  ;;  %v4586_v34 = vsel %vm8653_vm3, %v4508_v40, %v4585_v61  ;;  %v4456_v48 = vmul.f32 0.2, %v4440_v52  ;;  %v4595_v46 = vsel %vm8638_vm1, %v4523_v45, %v4594_v55  ;;  %5350 = vmatpush.bf16.msrb.mxu0 %v7710_v7 }
 0x2ee   : > { %4629 = vst [vmem:[#allocation3 + $0x44] sm:$0x1] %v4628_v36  ;;  %v4526_v63 = vshrl.u32 %v4496_v58, 16  ;;  %v4441_v21 = vadd.f32 %v9694_v14, %v9707_v51  ;;  %v4431_v24 = vmul.f32 %v9684_v20, %v9646_v3  ;;  %v4598_v54 = vsel %vm8653_vm3, %v4524_v56, %v4597_v26 }
 0x2ef   : > { %4584 = vst [vmem:[#allocation3 + $0x8] sm:$0xf] %v4583_v17  ;;  %v4464_v18 = vsel %vm4448_vm15, %v4440_v52, %v4456_v48  ;;  %v4529_v28 = vshll.u32 %v4496_v58, 16  ;;  %v5104_v20 = vsel %vm8840_vm6, %v7237_v30, %v5103_v5  ;;  %v4861_v12 = vsel %vm8703_vm14, %v4856_v37, %v4860_v47 }
 0x2f0   : > { %4587 = vst [vmem:[#allocation3 + $0xc] sm:$0x1] %v4586_v34  ;;  %v4528_v27 = vrot.slane %v4526_v63, 7  ;;  %v9740_v25 = vpack.c.bf16 %v4464_v18, %v4464_v18  ;;  %v9743_v43 = vadd.f32 %v9694_v14, %v4431_v24  ;;  %vm4449_vm0 = vcmp.ge.f32.partialorder %v4441_v21, 0.0 }
 0x2f1   : > { %4590 = vst [vmem:[#allocation3 + $0x10] sm:$0xf] %v4589_v60  ;;  %v4457_v14 = vmul.f32 0.2, %v4441_v21  ;;  %v5149_v4 = vunpack.c.l.b16 %v5104_v20  ;;  %v9761_v19 = vunpack.c.l.b16 %v4861_v12 }
 0x2f2   : > { %4593 = vst [vmem:[#allocation3 + $0x14] sm:$0x1] %v4592_v57  ;;  %v9753_v52 = vor.u32 %v4529_v28, %v4528_v27  ;;  %v4532_v38 = vrot.slane %v4528_v27, 4  ;;  %v4534_v23 = vshrl.u32 %v9740_v25, 16  ;;  %v4537_v32 = vshll.u32 %v9740_v25, 16  ;;  %v7730_v25 = vld [vmem:[#allocation10 + $0x178] sm:$0xff] }
 0x2f3   : > { %4596 = vst [vmem:[#allocation3 + $0x18] sm:$0xf] %v4595_v46  ;;  %vm4450_vm2 = vcmp.ge.f32.partialorder %v9743_v43, 0.0  ;;  %v4458_v41 = vmul.f32 0.2, %v9743_v43  ;;  %v4465_v15 = vsel %vm4449_vm0, %v4441_v21, %v4457_v14  ;;  %5764 = vmatpush.bf16.msra.mxu2 %v7730_v25 }
 0x2f4   : > { %4599 = vst [vmem:[#allocation3 + $0x1c] sm:$0x1] %v4598_v54  ;;  %v4601_v40 = vsel %vm8638_vm1, %v9753_v52, %v9755_v13  ;;  %v4604_v46 = vsel %vm8653_vm3, %v4532_v38, %v4603_v33  ;;  %v7742_v38 = vld [vmem:[#allocation10 + $0x1b8] sm:$0xff] }
 0x2f5   : > { %v4466_v28 = vsel %vm4450_vm2, %v9743_v43, %v4458_v41  ;;  %4602 = vst [vmem:[#allocation3 + $0x20] sm:$0xf] %v4601_v40  ;;  %5898 = vmatpush.bf16.msra.mxu3 %v7742_v38  ;;  %v7709_v43 = vld [vmem:[#allocation10 + $0xd0] sm:$0xff]  ;;  %v9789_v41 = vpack.c.bf16 %v4465_v15, %v4465_v15 }
 0x2f6   : > { %v7675_v30 = vld [vmem:[#allocation3 + $0x4] sm:$0xf0]  ;;  %4605 = vst [vmem:[#allocation3 + $0x24] sm:$0x1] %v4604_v46  ;;  %5351 = vmatpush.bf16.msrb.mxu0 %v7709_v43 }
 0x2f7   : > { %v5078_v5 = vld [vmem:[#allocation3 + $0x8] sm:$0xe]  ;;  %v7128_v49 = vor.u32 %v7675_v30, %v7127_v50  ;;  %v4835_v9 = vld [vmem:[#allocation3 + $0xc] sm:$0x1] }
 0x2f8   : > { %v4834_v2 = vld [vmem:[#allocation3 + $0x8] sm:$0xf]  ;;  %v7238_v35 = vrot.slane %v5078_v5, 9  ;;  %v5107_v22 = vrot.slane %v4835_v9, 5  ;;  %v4872_v44 = vshll.u32 %v4835_v9, 16 }
 0x2f9   : > { %v4863_v53 = vshrl.u32 %v4834_v2, 16  ;;  %v4866_v0 = vshll.u32 %v4834_v2, 16  ;;  %v5383_v11 = vld [vmem:[#allocation3 + $0x8] sm:$0xf]  ;;  %v9763_v16 = vld [vmem:[#allocation3 + $0xc] sm:$0x1]  ;;  %4734 = vmatmul.bf16.vlgmr.msra.gmra.mxu0 %v7128_v49 }
 0x2fa   : > { %v5385_v10 = vld [vmem:[#allocation3 + $0x10] sm:$0xf]  ;;  %v9765_v42 = vld [vmem:[#allocation3 + $0x14] sm:$0x1]  ;;  %v5108_v1 = vsel %vm8840_vm6, %v7238_v35, %v5107_v22  ;;  %v4874_v62 = vrot.slane %v4872_v44, 5  ;;  %v5400_v31 = vshrl.u32 %v5383_v11, 16 }
 0x2fb   : > { %v4865_v61 = vrot.slane %v4863_v53, 4  ;;  %v4868_v8 = vrot.slane %v4866_v0, 5  ;;  %v5403_v36 = vshll.u32 %v5383_v11, 16  ;;  %v5150_v39 = vunpack.c.l.b16 %v5108_v1  ;;  %v9776_v26 = vld [vmem:[#allocation3 + $0x14] sm:$0x1]  ;;  %v7741_v11 = vld [vmem:[#allocation10 + $0x1b0] sm:$0xff] }
 0x2fc   : > { %v5409_v34 = vshll.u32 %v9763_v16, 16  ;;  %v5414_v45 = vshrl.u32 %v5385_v10, 16  ;;  %v5402_v56 = vrot.slane %v5400_v31, 4  ;;  %v5417_v47 = vshll.u32 %v5385_v10, 16  ;;  %v9778_v6 = vld [vmem:[#allocation3 + $0x1c] sm:$0x1]  ;;  %5899 = vmatpush.bf16.msra.mxu3 %v7741_v11 }
 0x2fd   : > { %v4869_v17 = vor.u32 %v4868_v8, %v4865_v61  ;;  %v5405_v55 = vrot.slane %v5403_v36, 5  ;;  %v5423_v60 = vshll.u32 %v9765_v42, 16  ;;  %v5157_v58 = vpack.c.b16 %v5150_v39, %v5149_v4  ;;  %v5079_v48 = vld [vmem:[#allocation3 + $0x10] sm:$0xe]  ;;  %v5080_v18 = vld [vmem:[#allocation3 + $0x18] sm:$0xe] }
 0x2fe   : > { %v5416_v57 = vrot.slane %v5414_v45, 4  ;;  %v5411_v21 = vrot.slane %v5409_v34, 5  ;;  %v5419_v24 = vrot.slane %v5417_v47, 5  ;;  %v7131_v54 = vld [vmem:[#allocation3 + $0x10] sm:$0xf]  ;;  %v7239_v12 = vrot.slane %v5079_v48, 9 }
 0x2ff   : > { %v4870_v37 = vrot.slane %v4869_v17, 4  ;;  %v5406_v63 = vor.u32 %v5405_v55, %v5402_v56  ;;  %v4836_v27 = vld [vmem:[#allocation3 + $0x10] sm:$0xf]  ;;  %5221 = vmatmul.bf16.vlgmr.msrb.gmra.mxu3 %v5157_v58  ;;  %v7676_v20 = vld [vmem:[#allocation3 + $0x14] sm:$0xf0]  ;;  %v5111_v52 = vrot.slane %v9776_v26, 5  ;;  %v9791_v53 = vpack.c.bf16 %v4466_v28, %v4466_v28 }
 0x300   : > { %v7240_v13 = vrot.slane %v5080_v18, 9  ;;  %v5420_v5 = vor.u32 %v5419_v24, %v5416_v57  ;;  %v5115_v2 = vrot.slane %v9778_v6, 5  ;;  %v4838_v49 = vld [vmem:[#allocation3 + $0x18] sm:$0xf]  ;;  %v4877_v9 = vshrl.u32 %v4836_v27, 16 }
 0x301   : > { %v4875_v50 = vsel %vm8703_vm14, %v4870_v37, %v4874_v62  ;;  %v5407_v30 = vrot.slane %v5406_v63, 4  ;;  %v4880_v35 = vshll.u32 %v4836_v27, 16  ;;  %v5425_v44 = vrot.slane %v5423_v60, 5  ;;  %v5387_v1 = vld [vmem:[#allocation3 + $0x18] sm:$0xf] }
 0x302   : > { %v4977_v14 = vunpack.c.l.b16 %v4875_v50  ;;  %v5421_v4 = vrot.slane %v5420_v5, 4  ;;  %v7132_v8 = vor.u32 %v7676_v20, %v7131_v54  ;;  %v5112_v10 = vsel %vm8840_vm6, %v7239_v12, %v5111_v52  ;;  %v9804_v45 = vld [vmem:[#allocation3 + $0x1c] sm:$0x1]  ;;  %v5389_v57 = vld [vmem:[#allocation3 + $0x20] sm:$0xf] }
 0x303   : > { %v5412_v22 = vsel %vm8703_vm14, %v5407_v30, %v5411_v21  ;;  %v4879_v40 = vrot.slane %v4877_v9, 4  ;;  %v4882_v62 = vrot.slane %v4880_v35, 5  ;;  %v4891_v31 = vshrl.u32 %v4838_v49, 16  ;;  %v9806_v46 = vld [vmem:[#allocation3 + $0x24] sm:$0x1] }
 0x304   : > { %v4984_v0 = vpack.c.b16 %v4977_v14, %v9761_v19  ;;  %v5527_v61 = vunpack.c.l.b16 %v5412_v22  ;;  %v5426_v15 = vsel %vm8703_vm14, %v5421_v4, %v5425_v44  ;;  %v5116_v19 = vsel %vm8840_vm6, %v7240_v13, %v5115_v2  ;;  %v4606_v27 = vld [vmem:[#allocation3 + $0x28] sm:$0xf]  ;;  %v4609_v52 = vld [vmem:[#allocation3 + $0x2c] sm:$0x1]  ;;  %v4840_v5 = vld [vmem:[#allocation3 + $0x20] sm:$0xf] }
 0x305   : > { %v5528_v36 = vunpack.c.l.b16 %v5426_v15  ;;  %v4886_v33 = vshll.u32 %v9776_v26, 16  ;;  %v4894_v7 = vshll.u32 %v4838_v49, 16  ;;  %v4900_v39 = vshll.u32 %v9778_v6, 16  ;;  %v9816_v43 = vld [vmem:[#allocation3 + $0x20] sm:$0xe] }
 0x306   : > { %5048 = vmatmul.bf16.vlgmr.msrb.gmra.mxu2 %v4984_v0  ;;  %v4883_v17 = vor.u32 %v4882_v62, %v4879_v40  ;;  %v4893_v34 = vrot.slane %v4891_v31, 4  ;;  %v5428_v56 = vshrl.u32 %v5387_v1, 16  ;;  %v5431_v55 = vshll.u32 %v5387_v1, 16  ;;  %v4841_v4 = vld [vmem:[#allocation3 + $0x24] sm:$0x1]  ;;  %v7740_v40 = vld [vmem:[#allocation10 + $0x1a8] sm:$0xff] }
 0x307   : > { %v5535_v47 = vpack.c.b16 %v5528_v36, %v5527_v61  ;;  %v5151_v60 = vunpack.c.l.b16 %v5112_v10  ;;  %v5152_v58 = vunpack.c.l.b16 %v5116_v19  ;;  %v4896_v37 = vrot.slane %v4894_v7, 5  ;;  %v7708_v31 = vld [vmem:[#allocation10 + $0xc8] sm:$0xff]  ;;  %5900 = vmatpush.bf16.msra.mxu3 %v7740_v40  ;;  %v7755_v40 = vld [vmem:[#allocation10 + $0x220] sm:$0xff] }
 0x308   : > { %v4884_v48 = vrot.slane %v4883_v17, 4  ;;  %v5430_v63 = vrot.slane %v5428_v56, 4  ;;  %v5433_v26 = vrot.slane %v5431_v55, 5  ;;  %v5442_v21 = vshrl.u32 %v5389_v57, 16  ;;  %5352 = vmatpush.bf16.msrb.mxu0 %v7708_v31 }
 0x309   : > { %5599 = vmatmul.bf16.vlgmr.msrb.gmra.mxu1 %v5535_v47  ;;  %4739 = vmatmul.bf16.gmra.mxu0 %v7132_v8  ;;  %v4888_v6 = vrot.slane %v4886_v33, 5  ;;  %v4897_v24 = vor.u32 %v4896_v37, %v4893_v34  ;;  %v5437_v54 = vshll.u32 %v9804_v45, 16  ;;  %v5445_v18 = vshll.u32 %v5389_v57, 16  ;;  %v7729_v47 = vld [vmem:[#allocation10 + $0x170] sm:$0xff] }
 0x30a   : > { %v4902_v28 = vrot.slane %v4900_v39, 5  ;;  %v5434_v50 = vor.u32 %v5433_v26, %v5430_v63  ;;  %v5444_v20 = vrot.slane %v5442_v21, 4  ;;  %v4536_v12 = vrot.slane %v4534_v23, 7  ;;  %v7757_v39 = vld [vmem:[#allocation10 + $0x230] sm:$0xff]  ;;  %v7707_v63 = vld [vmem:[#allocation10 + $0xc0] sm:$0xff]  ;;  %5765 = vmatpush.bf16.msra.mxu2 %v7729_v47 }
 0x30b   : > { %v4889_v13 = vsel %vm8703_vm14, %v4884_v48, %v4888_v6  ;;  %v4898_v38 = vrot.slane %v4897_v24, 4  ;;  %v5447_v14 = vrot.slane %v5445_v18, 5  ;;  %v5451_v30 = vshll.u32 %v9806_v46, 16  ;;  %v9831_v26 = vld [vmem:[#allocation3 + $0x40] sm:$0xf] }
 0x30c   : > { %v5158_v2 = vpack.c.b16 %v5152_v58, %v5151_v60  ;;  %v5435_v49 = vrot.slane %v5434_v50, 4  ;;  %v4539_v9 = vor.u32 %v4537_v32, %v4536_v12  ;;  %v4540_v35 = vrot.slane %v4536_v12, 4  ;;  %v7758_v32 = vld [vmem:[#allocation10 + $0x238] sm:$0xff]  ;;  %v7739_v60 = vld [vmem:[#allocation10 + $0x1a0] sm:$0xff]  ;;  %v7135_v18 = vld [vmem:[#allocation3 + $0x20] sm:$0xf]  ;;  %5353 = vmatpush.bf16.msrb.mxu0 %v7707_v63 }
 0x30d   : > { %v4903_v23 = vsel %vm8703_vm14, %v4898_v38, %v4902_v28  ;;  %v5439_v0 = vrot.slane %v5437_v54, 5  ;;  %v5448_v22 = vor.u32 %v5447_v14, %v5444_v20  ;;  %v4905_v44 = vshrl.u32 %v4840_v5, 16  ;;  %6316 = vmatpush.bf16.msra.mxu1 %v7758_v32  ;;  %v4612_v24 = vld [vmem:[#allocation3 + $0x30] sm:$0xf]  ;;  %v4615_v28 = vld [vmem:[#allocation3 + $0x34] sm:$0x1]  ;;  %5901 = vmatpush.bf16.msra.mxu3 %v7739_v60 }
 0x30e   : > { %v4978_v11 = vunpack.c.l.b16 %v4889_v13  ;;  %v4979_v61 = vunpack.c.l.b16 %v4903_v23  ;;  %v4607_v8 = vsel %vm8638_vm1, %v4539_v9, %v4606_v27  ;;  %v4610_v10 = vsel %vm8653_vm3, %v4540_v35, %v4609_v52  ;;  %v7756_v20 = vld [vmem:[#allocation10 + $0x228] sm:$0xff]  ;;  %v7738_v14 = vld [vmem:[#allocation10 + $0x198] sm:$0xff]  ;;  %v7727_v32 = vld [vmem:[#allocation10 + $0x160] sm:$0xff] }
 0x30f   : > { %5226 = vmatmul.bf16.gmra.mxu3 %v5158_v2  ;;  %v5440_v1 = vsel %vm8703_vm14, %v5435_v49, %v5439_v0  ;;  %v5449_v15 = vrot.slane %v5448_v22, 4  ;;  %v5453_v19 = vrot.slane %v5451_v30, 5  ;;  %4608 = vst [vmem:[#allocation3 + $0x28] sm:$0xf] %v4607_v8  ;;  %v7241_v62 = vrot.slane %v9816_v43, 9  ;;  %v7728_v38 = vld [vmem:[#allocation10 + $0x168] sm:$0xff] }
 0x310   : > { %4611 = vst [vmem:[#allocation3 + $0x2c] sm:$0x1] %v4610_v10  ;;  %v5119_v36 = vrot.slane %v4841_v4, 5  ;;  %v4907_v33 = vrot.slane %v4905_v44, 4  ;;  %v4908_v7 = vshll.u32 %v4840_v5, 16  ;;  %v4914_v34 = vshll.u32 %v4841_v4, 16  ;;  %5766 = vmatpush.bf16.msra.mxu2 %v7728_v38  ;;  %6143 = vmatpush.bf16.msra.mxu0 %v7750_v59 }
 0x311   : > { %v5454_v17 = vsel %vm8703_vm14, %v5449_v15, %v5453_v19  ;;  %v4542_v56 = vshrl.u32 %v9789_v41, 16  ;;  %v4550_v55 = vshrl.u32 %v9791_v53, 16  ;;  %v4985_v58 = vpack.c.b16 %v4979_v61, %v4978_v11  ;;  %6317 = vmatpush.bf16.msra.mxu1 %v7757_v39  ;;  %v4618_v4 = vld [vmem:[#allocation3 + $0x38] sm:$0xf]  ;;  %v4621_v44 = vld [vmem:[#allocation3 + $0x3c] sm:$0x1]  ;;  %5902 = vmatpush.bf16.msra.mxu3 %v7738_v14 }
 0x312   : > { %v5529_v37 = vunpack.c.l.b16 %v5440_v1  ;;  %v5530_v57 = vunpack.c.l.b16 %v5454_v17  ;;  %v4910_v48 = vrot.slane %v4908_v7, 5  ;;  %v4545_v6 = vshll.u32 %v9789_v41, 16  ;;  %v7737_v39 = vld [vmem:[#allocation10 + $0x190] sm:$0xff] }
 0x313   : > { %v4544_v21 = vrot.slane %v4542_v56, 7  ;;  %v9834_v54 = vrot.slane %v4550_v55, 7  ;;  %v4553_v50 = vshll.u32 %v9791_v53, 16  ;;  %v9837_v12 = vrot.slane %v4914_v34, 5 }
 0x314   : > { %v4911_v27 = vor.u32 %v4910_v48, %v4907_v33  ;;  %v5498_v41 = vshrl.u32 %v9831_v26, 16  ;;  %v5536_v30 = vpack.c.b16 %v5530_v57, %v5529_v37  ;;  %v5120_v49 = vsel %vm8840_vm6, %v7241_v62, %v5119_v36  ;;  %5767 = vmatpush.bf16.msra.mxu2 %v7727_v32 }
 0x315   : > { %v4547_v52 = vor.u32 %v4545_v6, %v4544_v21  ;;  %v4548_v13 = vrot.slane %v4544_v21, 4  ;;  %v4555_v53 = vor.u32 %v4553_v50, %v9834_v54  ;;  %v4556_v22 = vrot.slane %v9834_v54, 4  ;;  %6318 = vmatpush.bf16.msra.mxu1 %v7756_v20  ;;  %5903 = vmatpush.bf16.msra.mxu3 %v7737_v39  ;;  %v7726_v6 = vld [vmem:[#allocation10 + $0x158] sm:$0xff] }
 0x316   : > { %5053 = vmatmul.bf16.gmra.mxu2 %v4985_v58  ;;  %v7677_v5 = vld [vmem:[#allocation3 + $0x24] sm:$0xf0]  ;;  %v4912_v61 = vrot.slane %v4911_v27, 4  ;;  %v5153_v1 = vunpack.c.l.b16 %v5120_v49  ;;  %v5501_v17 = vshll.u32 %v9831_v26, 16  ;;  %v9861_v29 = vrot.slane %v5498_v41, 4 }
 0x317   : > { %v5082_v2 = vld [vmem:[#allocation3 + $0x28] sm:$0xe]  ;;  %v7136_v35 = vor.u32 %v7677_v5, %v7135_v18  ;;  %v4843_v43 = vld [vmem:[#allocation3 + $0x2c] sm:$0x1]  ;;  %v4613_v10 = vsel %vm8638_vm1, %v4547_v52, %v4612_v24  ;;  %v4616_v19 = vsel %vm8653_vm3, %v4548_v13, %v4615_v28  ;;  %v4619_v37 = vsel %vm8638_vm1, %v4555_v53, %v4618_v4  ;;  %v7736_v28 = vld [vmem:[#allocation10 + $0x188] sm:$0xff] }
 0x318   : > { %v4842_v9 = vld [vmem:[#allocation3 + $0x28] sm:$0xf]  ;;  %v7242_v23 = vrot.slane %v5082_v2, 9  ;;  %v5123_v11 = vrot.slane %v4843_v43, 5  ;;  %4614 = vst [vmem:[#allocation3 + $0x30] sm:$0xf] %v4613_v10  ;;  %v4917_v60 = vsel %vm8703_vm14, %v4912_v61, %v9837_v12  ;;  %v4622_v57 = vsel %vm8653_vm3, %v4556_v22, %v4621_v44  ;;  %5768 = vmatpush.bf16.msra.mxu2 %v7726_v6 }
 0x319   : > { %v4919_v0 = vshrl.u32 %v4842_v9, 16  ;;  %v4922_v8 = vshll.u32 %v4842_v9, 16  ;;  %v5391_v25 = vld [vmem:[#allocation3 + $0x28] sm:$0xf]  ;;  %5604 = vmatmul.bf16.gmra.mxu1 %v5536_v30  ;;  %4744 = vmatmul.bf16.gmra.mxu0 %v7136_v35  ;;  %v9848_v62 = vld [vmem:[#allocation3 + $0x2c] sm:$0x1]  ;;  %v4980_v54 = vunpack.c.l.b16 %v4917_v60 }
 0x31a   : > { %v5456_v31 = vshrl.u32 %v5391_v25, 16  ;;  %v5124_v36 = vsel %vm8840_vm6, %v7242_v23, %v5123_v11  ;;  %v4928_v7 = vshll.u32 %v4843_v43, 16  ;;  %4617 = vst [vmem:[#allocation3 + $0x34] sm:$0x1] %v4616_v19  ;;  %v5459_v55 = vshll.u32 %v5391_v25, 16  ;;  %6319 = vmatpush.bf16.msra.mxu1 %v7755_v40  ;;  %v7754_v24 = vld [vmem:[#allocation10 + $0x218] sm:$0xff]  ;;  %5904 = vmatpush.bf16.msra.mxu3 %v7736_v28 }
 0x31b   : > { %v4921_v15 = vrot.slane %v4919_v0, 4  ;;  %v4924_v33 = vrot.slane %v4922_v8, 5  ;;  %v5154_v34 = vunpack.c.l.b16 %v5124_v36  ;;  %v5465_v47 = vshll.u32 %v9848_v62, 16  ;;  %4620 = vst [vmem:[#allocation3 + $0x38] sm:$0xf] %v4619_v37  ;;  %v7725_v13 = vld [vmem:[#allocation10 + $0x150] sm:$0xff] }
 0x31c   : > { %v5458_v56 = vrot.slane %v5456_v31, 4  ;;  %v5461_v63 = vrot.slane %v5459_v55, 5  ;;  %v4930_v21 = vrot.slane %v4928_v7, 5  ;;  %4623 = vst [vmem:[#allocation3 + $0x3c] sm:$0x1] %v4622_v57  ;;  %v9865_v52 = vrot.slane %v5501_v17, 5  ;;  %5769 = vmatpush.bf16.msra.mxu2 %v7725_v13 }
 0x31d   : > { %v4925_v58 = vor.u32 %v4924_v33, %v4921_v15  ;;  %v5159_v48 = vpack.c.b16 %v5154_v34, %v5153_v1  ;;  %v5467_v27 = vrot.slane %v5465_v47, 5  ;;  %v7753_v41 = vld [vmem:[#allocation10 + $0x210] sm:$0xff]  ;;  %v7735_v44 = vld [vmem:[#allocation10 + $0x180] sm:$0xff]  ;;  %v7752_v11 = vld [vmem:[#allocation10 + $0x208] sm:$0xff] }
 0x31e   : > { %v5462_v18 = vor.u32 %v5461_v63, %v5458_v56  ;;  %6320 = vmatpush.bf16.msra.mxu1 %v7754_v24  ;;  %5905 = vmatpush.bf16.msra.mxu3 %v7735_v44  ;;  %v7724_v17 = vld [vmem:[#allocation10 + $0x148] sm:$0xff] }
 0x31f   : > { %v4926_v26 = vrot.slane %v4925_v58, 4  ;;  %5231 = vmatmul.bf16.gmra.mxu3 %v5159_v48  ;;  %v5393_v20 = vld [vmem:[#allocation3 + $0x30] sm:$0xf]  ;;  %v7749_v58 = vld [vmem:[#allocation10 + $0x1f0] sm:$0xff] }
 0x320   : > { %v5083_v12 = vld [vmem:[#allocation3 + $0x30] sm:$0xe]  ;;  %v5463_v30 = vrot.slane %v5462_v18, 4  ;;  %v5470_v5 = vshrl.u32 %v5393_v20, 16  ;;  %v5473_v2 = vshll.u32 %v5393_v20, 16  ;;  %5770 = vmatpush.bf16.msra.mxu2 %v7724_v17  ;;  %6144 = vmatpush.bf16.msra.mxu0 %v7749_v58  ;;  %v5654_v17 = vrot.slane %v9763_v16, 5 }
 0x321   : > { %v4931_v50 = vsel %vm8703_vm14, %v4926_v26, %v4930_v21  ;;  %v9867_v14 = vld [vmem:[#allocation3 + $0x34] sm:$0x1]  ;;  %v7243_v53 = vrot.slane %v5083_v12, 9  ;;  %v4844_v35 = vld [vmem:[#allocation3 + $0x30] sm:$0xf] }
 0x322   : > { %v4981_v38 = vunpack.c.l.b16 %v4931_v50  ;;  %v5479_v49 = vshll.u32 %v9867_v14, 16  ;;  %v4845_v9 = vld [vmem:[#allocation3 + $0x34] sm:$0x1]  ;;  %v5468_v23 = vsel %vm8703_vm14, %v5463_v30, %v5467_v27  ;;  %v5472_v0 = vrot.slane %v5470_v5, 4  ;;  %v7139_v4 = vld [vmem:[#allocation3 + $0x30] sm:$0xf]  ;;  %6321 = vmatpush.bf16.msra.mxu1 %v7753_v41 }
 0x323   : > { %v5475_v22 = vrot.slane %v5473_v2, 5  ;;  %v7678_v8 = vld [vmem:[#allocation3 + $0x34] sm:$0xf0]  ;;  %v5127_v25 = vrot.slane %v4845_v9, 5  ;;  %v5531_v40 = vunpack.c.l.b16 %v5468_v23  ;;  %v4847_v1 = vld [vmem:[#allocation3 + $0x3c] sm:$0x1] }
 0x324   : > { %v4986_v43 = vpack.c.b16 %v4981_v38, %v4980_v54  ;;  %v5481_v61 = vrot.slane %v5479_v49, 5  ;;  %v5084_v10 = vld [vmem:[#allocation3 + $0x38] sm:$0xe]  ;;  %v4933_v31 = vshrl.u32 %v4844_v35, 16  ;;  %v5131_v33 = vrot.slane %v4847_v1, 5 }
 0x325   : > { %v5476_v32 = vor.u32 %v5475_v22, %v5472_v0  ;;  %v7244_v15 = vrot.slane %v5084_v10, 9  ;;  %v4846_v19 = vld [vmem:[#allocation3 + $0x38] sm:$0xf]  ;;  %v5128_v36 = vsel %vm8840_vm6, %v7243_v53, %v5127_v25  ;;  %v4936_v7 = vshll.u32 %v4844_v35, 16  ;;  %v9878_v5 = vld [vmem:[#allocation3 + $0x3c] sm:$0x1] }
 0x326   : > { %5058 = vmatmul.bf16.gmra.mxu2 %v4986_v43  ;;  %v4942_v39 = vshll.u32 %v4845_v9, 16  ;;  %v7140_v56 = vor.u32 %v7678_v8, %v7139_v4  ;;  %v4935_v55 = vrot.slane %v4933_v31, 4  ;;  %v4947_v47 = vshrl.u32 %v4846_v19, 16  ;;  %v5395_v60 = vld [vmem:[#allocation3 + $0x38] sm:$0xf]  ;;  %6322 = vmatpush.bf16.msra.mxu1 %v7752_v11 }
 0x327   : > { %v5477_v34 = vrot.slane %v5476_v32, 4  ;;  %v5132_v37 = vsel %vm8840_vm6, %v7244_v15, %v5131_v33  ;;  %v5155_v57 = vunpack.c.l.b16 %v5128_v36  ;;  %v4938_v48 = vrot.slane %v4936_v7, 5  ;;  %v7751_v26 = vld [vmem:[#allocation10 + $0x200] sm:$0xff]  ;;  %v9880_v2 = vld [vmem:[#allocation3 + $0x44] sm:$0x1]  ;;  %v7748_v0 = vld [vmem:[#allocation10 + $0x1e8] sm:$0xff] }
 0x328   : > { %v4950_v63 = vshll.u32 %v4846_v19, 16  ;;  %v5156_v6 = vunpack.c.l.b16 %v5132_v37  ;;  %v4949_v24 = vrot.slane %v4947_v47, 4  ;;  %v4956_v54 = vshll.u32 %v4847_v1, 16  ;;  %v7723_v50 = vld [vmem:[#allocation10 + $0x140] sm:$0xff]  ;;  %6145 = vmatpush.bf16.msra.mxu0 %v7748_v0  ;;  %v7279_v1 = vld [vmem:[#allocation3 + $0x8] sm:$0xf] }
 0x329   : > { %v5482_v21 = vsel %vm8703_vm14, %v5477_v34, %v5481_v61  ;;  %4749 = vmatmul.bf16.gmra.mxu0 %v7140_v56  ;;  %v4939_v27 = vor.u32 %v4938_v48, %v4935_v55  ;;  %v5484_v59 = vshrl.u32 %v5395_v60, 16  ;;  %v4944_v20 = vrot.slane %v4942_v39, 5  ;;  %5771 = vmatpush.bf16.msra.mxu2 %v7723_v50  ;;  %v7703_v15 = vld [vmem:[#allocation3 + $0xc] sm:$0xf0]  ;;  %v5628_v19 = vld [vmem:[#allocation3 + $0x8] sm:$0xe] }
 0x32a   : > { %v5532_v18 = vunpack.c.l.b16 %v5482_v21  ;;  %v4952_v28 = vrot.slane %v4950_v63, 5  ;;  %v5487_v12 = vshll.u32 %v5395_v60, 16  ;;  %6323 = vmatpush.bf16.msra.mxu1 %v7751_v26  ;;  %v5160_v49 = vpack.c.b16 %v5156_v6, %v5155_v57  ;;  %v5629_v33 = vld [vmem:[#allocation3 + $0x10] sm:$0xe]  ;;  %v7731_v58 = vld [vmem:[#allocation3 + $0x14] sm:$0xf0] }
 0x32b   : > { %v4940_v38 = vrot.slane %v4939_v27, 4  ;;  %v5486_v41 = vrot.slane %v5484_v59, 4  ;;  %v5504_v53 = vor.u32 %v9865_v52, %v9861_v29  ;;  %v4958_v23 = vrot.slane %v4956_v54, 5  ;;  %v7747_v29 = vld [vmem:[#allocation10 + $0x1e0] sm:$0xff]  ;;  %v9902_v16 = vld [vmem:[#allocation3 + $0x1c] sm:$0x1] }
 0x32c   : > { %v5537_v13 = vpack.c.b16 %v5532_v18, %v5531_v40  ;;  %v4953_v30 = vor.u32 %v4952_v28, %v4949_v24  ;;  %v5489_v9 = vrot.slane %v5487_v12, 5  ;;  %v5493_v44 = vshll.u32 %v9878_v5, 16  ;;  %6146 = vmatpush.bf16.msra.mxu0 %v7747_v29  ;;  %v7399_v60 = vld [vmem:[#allocation3 + $0x10] sm:$0xf]  ;;  %v9900_v26 = vld [vmem:[#allocation3 + $0x14] sm:$0x1] }
 0x32d   : > { %v4945_v35 = vsel %vm8703_vm14, %v4940_v38, %v4944_v20  ;;  %v5507_v11 = vshll.u32 %v9880_v2, 16  ;;  %v5505_v10 = vrot.slane %v5504_v53, 4  ;;  %v7280_v7 = vor.u32 %v7703_v15, %v7279_v1  ;;  %v6180_v21 = vld [vmem:[#allocation3 + $0x10] sm:$0xe]  ;;  %v6181_v6 = vld [vmem:[#allocation3 + $0x18] sm:$0xe] }
 0x32e   : > { %5609 = vmatmul.bf16.gmra.mxu1 %v5537_v13  ;;  %v4954_v43 = vrot.slane %v4953_v30, 4  ;;  %v4982_v22 = vunpack.c.l.b16 %v4945_v35  ;;  %v5490_v4 = vor.u32 %v5489_v9, %v5486_v41  ;;  %v5495_v32 = vrot.slane %v5493_v44, 5  ;;  %v7746_v24 = vld [vmem:[#allocation10 + $0x1d8] sm:$0xff]  ;;  %v7745_v28 = vld [vmem:[#allocation10 + $0x1d0] sm:$0xff]  ;;  %v7283_v13 = vld [vmem:[#allocation3 + $0x18] sm:$0xf] }
 0x32f   : > { %5236 = vmatmul.bf16.gmra.mxu3 %v5160_v49  ;;  %v5509_v40 = vrot.slane %v5507_v11, 5  ;;  %v7357_v39 = vrot.slane %v5628_v19, 9  ;;  %v7358_v55 = vrot.slane %v5629_v33, 9  ;;  %v5658_v47 = vrot.slane %v9765_v42, 5  ;;  %v7704_v38 = vld [vmem:[#allocation3 + $0x1c] sm:$0xf0] }
 0x330   : > { %v4959_v61 = vsel %vm8703_vm14, %v4954_v43, %v4958_v23  ;;  %v5491_v8 = vrot.slane %v5490_v4, 4  ;;  %v7400_v63 = vor.u32 %v7731_v58, %v7399_v60  ;;  %v7477_v18 = vrot.slane %v6180_v21, 9  ;;  %6147 = vmatpush.bf16.msra.mxu0 %v7746_v24  ;;  %v5630_v30 = vld [vmem:[#allocation3 + $0x18] sm:$0xe]  ;;  %v5631_v49 = vld [vmem:[#allocation3 + $0x20] sm:$0xe]  ;;  %v9912_v4 = vpop.f32.mrf.mxu1 }
 0x331   : > { %v4983_v52 = vunpack.c.l.b16 %v4959_v61  ;;  %v5510_v36 = vsel %vm8703_vm14, %v5505_v10, %v5509_v40  ;;  %v5655_v57 = vsel %vm8840_vm6, %v7357_v39, %v5654_v17  ;;  %v5659_v48 = vsel %vm8840_vm6, %v7358_v55, %v5658_v47  ;;  %v7403_v44 = vld [vmem:[#allocation3 + $0x20] sm:$0xf]  ;;  %v7732_v11 = vld [vmem:[#allocation3 + $0x24] sm:$0xf0]  ;;  %v7743_v33 = vld [vmem:[#allocation10 + $0x1c0] sm:$0xff] }
 0x332   : > { %v5496_v31 = vsel %vm8703_vm14, %v5491_v8, %v5495_v32  ;;  %v5534_v56 = vunpack.c.l.b16 %v5510_v36  ;;  %v5700_v42 = vunpack.c.l.b16 %v5655_v57  ;;  %v5701_v54 = vunpack.c.l.b16 %v5659_v48  ;;  %v9918_v8 = vld [vmem:[#allocation3 + $0x24] sm:$0x1]  ;;  %v6183_v32 = vld [vmem:[#allocation3 + $0x28] sm:$0xe]  ;;  %v7705_v55 = vld [vmem:[#allocation3 + $0x2c] sm:$0xf0] }
 0x333   : > { %v4987_v25 = vpack.c.b16 %v4983_v52, %v4982_v22  ;;  %v5533_v34 = vunpack.c.l.b16 %v5496_v31  ;;  %v6206_v27 = vrot.slane %v9900_v26, 5  ;;  %v7478_v59 = vrot.slane %v6181_v6, 9  ;;  %v5632_v47 = vld [vmem:[#allocation3 + $0x28] sm:$0xe]  ;;  %v5633_v60 = vld [vmem:[#allocation3 + $0x30] sm:$0xe] }
 0x334   : > { %v6210_v50 = vrot.slane %v9902_v16, 5  ;;  %v5708_v20 = vpack.c.b16 %v5701_v54, %v5700_v42  ;;  %6148 = vmatpush.bf16.msra.mxu0 %v7745_v28  ;;  %v7284_v53 = vor.u32 %v7704_v38, %v7283_v13  ;;  %v7359_v35 = vrot.slane %v5630_v30, 9  ;;  %v7407_v24 = vld [vmem:[#allocation3 + $0x30] sm:$0xf]  ;;  %v7733_v42 = vld [vmem:[#allocation3 + $0x34] sm:$0xf0] }
 0x335   : > { %v5538_v37 = vpack.c.b16 %v5534_v56, %v5533_v34  ;;  %v6207_v12 = vsel %vm8840_vm6, %v7477_v18, %v6206_v27  ;;  %v5662_v23 = vrot.slane %v9804_v45, 5  ;;  %v7360_v0 = vrot.slane %v5631_v49, 9  ;;  %v6182_v45 = vld [vmem:[#allocation3 + $0x20] sm:$0xe]  ;;  %v7287_v56 = vld [vmem:[#allocation3 + $0x28] sm:$0xf] }
 0x336   : > { %5063 = vmatmul.bf16.gmra.mxu2 %v4987_v25  ;;  %v6211_v41 = vsel %vm8840_vm6, %v7478_v59, %v6210_v50  ;;  %v6252_v9 = vunpack.c.l.b16 %v6207_v12  ;;  %v5666_v22 = vrot.slane %v9806_v46, 5  ;;  %v7404_v10 = vor.u32 %v7732_v11, %v7403_v44  ;;  %v9920_v25 = vld [vmem:[#allocation3 + $0x2c] sm:$0x1]  ;;  %v7744_v46 = vld [vmem:[#allocation10 + $0x1c8] sm:$0xff]  ;;  %v9932_v54 = vld [vmem:[#allocation3 + $0x34] sm:$0x1] }
 0x337   : > { %v6253_v43 = vunpack.c.l.b16 %v6211_v41  ;;  %v5663_v29 = vsel %vm8840_vm6, %v7359_v35, %v5662_v23  ;;  %v7479_v15 = vrot.slane %v6182_v45, 9  ;;  %v6214_v19 = vrot.slane %v9918_v8, 5  ;;  %v6184_v18 = vld [vmem:[#allocation3 + $0x30] sm:$0xe]  ;;  %v9938_v50 = vld [vmem:[#allocation3 + $0x3c] sm:$0x1] }
 0x338   : > { %v5667_v52 = vsel %vm8840_vm6, %v7360_v0, %v5666_v22  ;;  %v5702_v40 = vunpack.c.l.b16 %v5663_v29  ;;  %v7480_v31 = vrot.slane %v6183_v32, 9  ;;  %v6218_v36 = vrot.slane %v9920_v25, 5  ;;  %6149 = vmatpush.bf16.msra.mxu0 %v7744_v46  ;;  %v5937_v13 = vld [vmem:[#allocation3 + $0x18] sm:$0xf]  ;;  %v7706_v29 = vld [vmem:[#allocation3 + $0x3c] sm:$0xf0] }
 0x339   : > { %5354 = vmatmul.bf16.vlgmr.msrb.gmra.mxu0 %v7280_v7  ;;  %v6260_v61 = vpack.c.b16 %v6253_v43, %v6252_v9  ;;  %v5703_v1 = vunpack.c.l.b16 %v5667_v52  ;;  %v9924_v7 = vpop.f32.mrf.mxu1  ;;  %v6215_v17 = vsel %vm8840_vm6, %v7479_v15, %v6214_v19  ;;  %v7288_v57 = vor.u32 %v7705_v55, %v7287_v56  ;;  %v5634_v52 = vld [vmem:[#allocation3 + $0x38] sm:$0xe]  ;;  %v7411_v55 = vld [vmem:[#allocation3 + $0x40] sm:$0xf] }
 0x33a   : > { %v6219_v34 = vsel %vm8840_vm6, %v7480_v31, %v6218_v36  ;;  %v6254_v58 = vunpack.c.l.b16 %v6215_v17  ;;  %v7361_v48 = vrot.slane %v5632_v47, 9  ;;  %v7362_v21 = vrot.slane %v5633_v60, 9  ;;  %v7734_v47 = vld [vmem:[#allocation3 + $0x44] sm:$0xf0]  ;;  %v5945_v3 = vld [vmem:[#allocation3 + $0x38] sm:$0xf] }
 0x33b   : > { %v5709_v39 = vpack.c.b16 %v5703_v1, %v5702_v40  ;;  %v5674_v6 = vrot.slane %v9867_v14, 5  ;;  %v7408_v12 = vor.u32 %v7733_v42, %v7407_v24  ;;  %v5935_v14 = vld [vmem:[#allocation3 + $0x10] sm:$0xf]  ;;  %v7481_v38 = vrot.slane %v6184_v18, 9  ;;  %v5635_v40 = vld [vmem:[#allocation3 + $0x40] sm:$0xe] }
 0x33c   : > { %6150 = vmatpush.bf16.msra.mxu0 %v7743_v33  ;;  %v6222_v30 = vrot.slane %v9932_v54, 5  ;;  %v5952_v35 = vshrl.u32 %v5935_v14, 16  ;;  %v5955_v43 = vshll.u32 %v5935_v14, 16  ;;  %v5966_v23 = vshrl.u32 %v5937_v13, 16  ;;  %v9960_v24 = vld [vmem:[#allocation3 + $0x4c] sm:$0x1] }
 0x33d   : > { %v5675_v59 = vsel %vm8840_vm6, %v7362_v21, %v5674_v6  ;;  %v5969_v0 = vshll.u32 %v5937_v13, 16  ;;  %v7363_v36 = vrot.slane %v5634_v52, 9  ;;  %v5678_v33 = vrot.slane %v9878_v5, 5  ;;  %v5939_v21 = vld [vmem:[#allocation3 + $0x20] sm:$0xf] }
 0x33e   : > { %5614 = vmatmul.bf16.gmra.mxu1 %v5538_v37  ;;  %v6255_v37 = vunpack.c.l.b16 %v6219_v34  ;;  %v5705_v49 = vunpack.c.l.b16 %v5675_v59  ;;  %v6223_v44 = vsel %vm8840_vm6, %v7481_v38, %v6222_v30  ;;  %v5957_v45 = vrot.slane %v5955_v43, 5  ;;  %v9958_v6 = vld [vmem:[#allocation3 + $0x44] sm:$0x1]  ;;  %v5941_v42 = vld [vmem:[#allocation3 + $0x28] sm:$0xf] }
 0x33f   : > { %5906 = vmatmul.bf16.vlgmr.msra.gmra.mxu3 %v7400_v63  ;;  %v5670_v63 = vrot.slane %v9848_v62, 5  ;;  %v5968_v32 = vrot.slane %v5966_v23, 4  ;;  %v5971_v46 = vrot.slane %v5969_v0, 5  ;;  %v6256_v19 = vunpack.c.l.b16 %v6223_v44  ;;  %v6187_v18 = vld [vmem:[#allocation3 + $0x48] sm:$0xe] }
 0x340   : > { %v6261_v27 = vpack.c.b16 %v6255_v37, %v6254_v58  ;;  %v5682_v17 = vrot.slane %v9880_v2, 5  ;;  %v5961_v60 = vshll.u32 %v9900_v26, 16  ;;  %v5975_v58 = vshll.u32 %v9902_v16, 16  ;;  %v6186_v26 = vld [vmem:[#allocation3 + $0x40] sm:$0xe] }
 0x341   : > { %v5671_v28 = vsel %vm8840_vm6, %v7361_v48, %v5670_v63  ;;  %v9940_v62 = vpop.f32.mrf.mxu1  ;;  %v5972_v56 = vor.u32 %v5971_v46, %v5968_v32  ;;  %v7412_v2 = vor.u32 %v7734_v47, %v7411_v55  ;;  %v5994_v38 = vshrl.u32 %v5941_v42, 16 }
 0x342   : > { %v5704_v41 = vunpack.c.l.b16 %v5671_v28  ;;  %v5963_v16 = vrot.slane %v5961_v60, 5  ;;  %v5997_v30 = vshll.u32 %v5941_v42, 16 }
 0x343   : > { %v5973_v63 = vrot.slane %v5972_v56, 4 }
 0x344   : > { %v5710_v22 = vpack.c.b16 %v5705_v49, %v5704_v41  ;;  %v7483_v49 = vrot.slane %v6186_v26, 9 }
 0x346   : > { %5772 = vmatmul.bf16.vlgmr.msra.gmra.mxu2 %v5708_v20  ;;  %v6185_v20 = vld [vmem:[#allocation3 + $0x38] sm:$0xe] }
 0x347   : > { %v7482_v9 = vrot.slane %v6185_v20, 9  ;;  %v5980_v20 = vshrl.u32 %v5939_v21, 16 }
 0x349   : > { %5359 = vmatmul.bf16.gmra.mxu0 %v7284_v53  ;;  %v6226_v53 = vrot.slane %v9938_v50, 5  ;;  %v9948_v15 = vpop.f32.mrf.mxu1 }
 0x34b   : > { %v6227_v11 = vsel %vm8840_vm6, %v7482_v9, %v6226_v53  ;;  %v6230_v9 = vrot.slane %v9958_v6, 5  ;;  %v7484_v53 = vrot.slane %v6187_v18, 9 }
 0x34c   : > { %v6257_v31 = vunpack.c.l.b16 %v6227_v11  ;;  %v5996_v11 = vrot.slane %v5994_v38, 4  ;;  %v5949_v38 = vld [vmem:[#allocation3 + $0x48] sm:$0xf] }
 0x34e   : > { %6324 = vmatmul.bf16.vlgmr.msra.gmra.mxu1 %v6260_v61  ;;  %v7291_v61 = vld [vmem:[#allocation3 + $0x38] sm:$0xf]  ;;  %v6262_v37 = vpack.c.b16 %v6257_v31, %v6256_v19  ;;  %v5989_v19 = vshll.u32 %v9918_v8, 16  ;;  %v6003_v31 = vshll.u32 %v9920_v25, 16  ;;  %v6022_v25 = vshrl.u32 %v5945_v3, 16 }
 0x34f   : > { %5911 = vmatmul.bf16.gmra.mxu3 %v7404_v10  ;;  %v5954_v10 = vrot.slane %v5952_v35, 4  ;;  %v7292_v1 = vor.u32 %v7706_v29, %v7291_v61  ;;  %v6234_v35 = vrot.slane %v9960_v24, 5  ;;  %v5999_v61 = vrot.slane %v5997_v30, 5 }
 0x350   : > { %v6231_v29 = vsel %vm8840_vm6, %v7483_v49, %v6230_v9  ;;  %v5991_v55 = vrot.slane %v5989_v19, 5  ;;  %v6005_v47 = vrot.slane %v6003_v31, 5  ;;  %v6059_v31 = vshll.u32 %v9960_v24, 16 }
 0x351   : > { %v5958_v34 = vor.u32 %v5957_v45, %v5954_v10  ;;  %v9966_v41 = vpop.f32.mrf.mxu1  ;;  %v6235_v52 = vsel %vm8840_vm6, %v7484_v53, %v6234_v35  ;;  %v6258_v32 = vunpack.c.l.b16 %v6231_v29 }
 0x352   : > { %v6259_v46 = vunpack.c.l.b16 %v6235_v52 }
 0x353   : > { %v5959_v5 = vrot.slane %v5958_v34, 4  ;;  %v5943_v34 = vld [vmem:[#allocation3 + $0x30] sm:$0xf] }
 0x354   : > { %v6008_v60 = vshrl.u32 %v5943_v34, 16 }
 0x355   : > { %v5964_v14 = vsel %vm8703_vm14, %v5959_v5, %v5963_v16 }
 0x356   : > { %5777 = vmatmul.bf16.gmra.mxu2 %v5709_v39  ;;  %v7364_v39 = vrot.slane %v5635_v40, 9  ;;  %v6079_v23 = vunpack.c.l.b16 %v5964_v14 }
 0x358   : > { %v5683_v48 = vsel %vm8840_vm6, %v7364_v39, %v5682_v17 }
 0x359   : > { %5364 = vmatmul.bf16.gmra.mxu0 %v7288_v57  ;;  %v5679_v57 = vsel %vm8840_vm6, %v7363_v36, %v5678_v33  ;;  %v5707_v59 = vunpack.c.l.b16 %v5683_v48  ;;  %v9978_v36 = vpop.f32.mrf.mxu1  ;;  %v6263_v33 = vpack.c.b16 %v6259_v46, %v6258_v32 }
 0x35a   : > { %v5706_v28 = vunpack.c.l.b16 %v5679_v57  ;;  %v6025_v57 = vshll.u32 %v5945_v3, 16 }
 0x35c   : > { %v5711_v43 = vpack.c.b16 %v5707_v59, %v5706_v28  ;;  %v6027_v42 = vrot.slane %v6025_v57, 5  ;;  %v6017_v59 = vshll.u32 %v9932_v54, 16 }
 0x35e   : > { %6329 = vmatmul.bf16.gmra.mxu1 %v6261_v27  ;;  %v5977_v27 = vrot.slane %v5975_v58, 5  ;;  %v6011_v58 = vshll.u32 %v5943_v34, 16  ;;  %v6019_v49 = vrot.slane %v6017_v59, 5 }
 0x35f   : > { %5916 = vmatmul.bf16.gmra.mxu3 %v7408_v12  ;;  %v5983_v12 = vshll.u32 %v5939_v21, 16 }
 0x360   : > { %v5978_v13 = vsel %vm8703_vm14, %v5973_v63, %v5977_v27  ;;  %v6010_v63 = vrot.slane %v6008_v60, 4  ;;  %v6013_v21 = vrot.slane %v6011_v58, 5 }
 0x361   : > { %v6080_v0 = vunpack.c.l.b16 %v5978_v13  ;;  %v5985_v44 = vrot.slane %v5983_v12, 5  ;;  %v9986_v26 = vpop.f32.mrf.mxu1  ;;  %v5947_v13 = vld [vmem:[#allocation3 + $0x40] sm:$0xf] }
 0x362   : > { %v6014_v27 = vor.u32 %v6013_v21, %v6010_v63  ;;  %v6036_v35 = vshrl.u32 %v5947_v13, 16 }
 0x363   : > { %v6087_v45 = vpack.c.b16 %v6080_v0, %v6079_v23 }
 0x364   : > { %v6015_v12 = vrot.slane %v6014_v27, 4 }
 0x366   : > { %5782 = vmatmul.bf16.gmra.mxu2 %v5710_v22  ;;  %v5982_v22 = vrot.slane %v5980_v20, 4  ;;  %v6031_v20 = vshll.u32 %v9938_v50, 16  ;;  %v6020_v0 = vsel %vm8703_vm14, %v6015_v12, %v6019_v49  ;;  %v6050_v50 = vshrl.u32 %v5949_v38, 16 }
 0x368   : > { %v5986_v40 = vor.u32 %v5985_v44, %v5982_v22  ;;  %v6033_v9 = vrot.slane %v6031_v20, 5  ;;  %v6053_v22 = vshll.u32 %v5949_v38, 16  ;;  %v6083_v44 = vunpack.c.l.b16 %v6020_v0 }
 0x369   : > { %5369 = vmatmul.bf16.gmra.mxu0 %v7292_v1  ;;  %v6000_v1 = vor.u32 %v5999_v61, %v5996_v11  ;;  %v4829_v53 = vpop.f32.mrf.mxu1  ;;  %v6038_v61 = vrot.slane %v6036_v35, 4  ;;  %v6052_v52 = vrot.slane %v6050_v50, 4 }
 0x36a   : > { %v5987_v39 = vrot.slane %v5986_v40, 4 }
 0x36b   : > { %v6001_v17 = vrot.slane %v6000_v1, 4 }
 0x36d   : > { %v6006_v8 = vsel %vm8703_vm14, %v6001_v17, %v6005_v47  ;;  %v6045_v17 = vshll.u32 %v9958_v6, 16 }
 0x36e   : > { %6334 = vmatmul.bf16.gmra.mxu1 %v6262_v37  ;;  %v5992_v37 = vsel %vm8703_vm14, %v5987_v39, %v5991_v55  ;;  %v6082_v5 = vunpack.c.l.b16 %v6006_v8  ;;  %v6061_v55 = vrot.slane %v6059_v31, 5 }
 0x36f   : > { %5921 = vmatmul.bf16.gmra.mxu3 %v7412_v2  ;;  %v6081_v48 = vunpack.c.l.b16 %v5992_v37  ;;  %v6024_v2 = vrot.slane %v6022_v25, 4  ;;  %v6047_v60 = vrot.slane %v6045_v17, 5 }
 0x371   : > { %v6088_v16 = vpack.c.b16 %v6082_v5, %v6081_v48  ;;  %v6028_v28 = vor.u32 %v6027_v42, %v6024_v2 }
 0x373   : > { %v6029_v14 = vrot.slane %v6028_v28, 4 }
 0x375   : > { %v6034_v54 = vsel %vm8703_vm14, %v6029_v14, %v6033_v9 }
 0x376   : > { %5787 = vmatmul.bf16.gmra.mxu2 %v5711_v43  ;;  %v9974_v10 = vpop.f32.mrf.mxu0  ;;  %v6039_v43 = vshll.u32 %v5947_v13, 16  ;;  %v6084_v11 = vunpack.c.l.b16 %v6034_v54 }
 0x378   : > { %v6041_v29 = vrot.slane %v6039_v43, 5  ;;  %v6089_v40 = vpack.c.b16 %v6084_v11, %v6083_v44 }
 0x379   : > { %6151 = vmatmul.bf16.vlgmr.msra.gmra.mxu0 %v6087_v45  ;;  %v6055_v45 = vrot.slane %v6053_v22, 5 }
 0x37a   : > { %v6042_v1 = vor.u32 %v6041_v29, %v6038_v61  ;;  %v4813_v29 = vadd.f32 %v9912_v4, %v9974_v10 }
 0x37b   : > { %v6056_v19 = vor.u32 %v6055_v45, %v6052_v52 }
 0x37c   : > { %v6043_v34 = vrot.slane %v6042_v1, 4 }
 0x37d   : > { %v6057_v3 = vrot.slane %v6056_v19, 4 }
 0x37e   : > { %6339 = vmatmul.bf16.gmra.mxu1 %v6263_v33  ;;  %v9980_v56 = vpop.f32.mrf.mxu0  ;;  %v6048_v37 = vsel %vm8703_vm14, %v6043_v34, %v6047_v60 }
 0x37f   : > { %v6062_v8 = vsel %vm8703_vm14, %v6057_v3, %v6061_v55  ;;  %v6085_v24 = vunpack.c.l.b16 %v6048_v37  ;;  %v4815_v17 = vadd.f32 %v9924_v7, %v9980_v56  ;;  %v10063_v56 = vld [vmem:[%s10153_s8] ss:$0 sm:$0xff] }
 0x380   : > { %v6086_v57 = vunpack.c.l.b16 %v6062_v8 }
 0x382   : > { %v5222_v32 = vpop.f32.mrf.mxu3  ;;  %v6090_v6 = vpack.c.b16 %v6086_v57, %v6085_v24 }
 0x386   : > { %v9988_v18 = vpop.f32.mrf.mxu0  ;;  %v5600_v33 = vpop.f32.mrf.mxu1 }
 0x387   : > { %v4818_v10 = vadd.f32 %v9940_v62, %v9988_v18 }
 0x389   : > { %6156 = vmatmul.bf16.gmra.mxu0 %v6088_v16  ;;  %v9994_v23 = vpop.f32.mrf.mxu2 }
 0x38a   : > { %v5224_v58 = vpop.f32.mrf.mxu3  ;;  %v5069_v52 = vadd.f32 %v9994_v23, %v4813_v29 }
 0x38c   : > { %v5242_v1 = vadd.f32 %v5222_v32, %v5069_v52 }
 0x38e   : > { %v9992_v30 = vpop.f32.mrf.mxu0  ;;  %v5602_v25 = vpop.f32.mrf.mxu1 }
 0x38f   : > { %v4820_v62 = vadd.f32 %v9948_v15, %v9992_v30 }
 0x391   : > { %v5051_v39 = vpop.f32.mrf.mxu2 }
 0x392   : > { %v5227_v63 = vpop.f32.mrf.mxu3  ;;  %v5070_v3 = vadd.f32 %v5051_v39, %v4815_v17 }
 0x394   : > { %v5243_v8 = vadd.f32 %v5224_v58, %v5070_v3 }
 0x396   : > { %v10000_v46 = vpop.f32.mrf.mxu0  ;;  %v10012_v21 = vpop.f32.mrf.mxu1 }
 0x397   : > { %v4823_v30 = vadd.f32 %v9966_v41, %v10000_v46 }
 0x399   : > { %6161 = vmatmul.bf16.gmra.mxu0 %v6089_v40  ;;  %v5054_v48 = vpop.f32.mrf.mxu2 }
 0x39a   : > { %v10016_v27 = vpop.f32.mrf.mxu3  ;;  %v5071_v57 = vadd.f32 %v5054_v48, %v4818_v10 }
 0x39e   : > { %v10004_v47 = vpop.f32.mrf.mxu0  ;;  %v10018_v51 = vpop.f32.mrf.mxu1 }
 0x39f   : > { %v4825_v41 = vadd.f32 %v9978_v36, %v10004_v47 }
 0x3a1   : > { %v5056_v2 = vpop.f32.mrf.mxu2 }
 0x3a2   : > { %v10022_v20 = vpop.f32.mrf.mxu3 }
 0x3a6   : > { %v10010_v5 = vpop.f32.mrf.mxu0 }
 0x3a7   : > { %v4828_v47 = vadd.f32 %v9986_v26, %v10010_v5 }
 0x3a9   : > { %6166 = vmatmul.bf16.gmra.mxu0 %v6090_v6  ;;  %v10020_v59 = vpop.f32.mrf.mxu2 }
 0x3aa   : > { %v10028_v49 = vpop.f32.mrf.mxu3 }
 0x3ab   : > { %v10024_v14 = vpop.f32.mrf.mxu1 }
 0x3ae   : > { %v4752_v42 = vpop.f32.mrf.mxu0 }
 0x3af   : > { %v10014_v16 = vadd.f32 %v4829_v53, %v4752_v42 }
 0x3b1   : > { %v10026_v13 = vpop.f32.mrf.mxu2 }
 0x3b2   : > { %v10034_v43 = vpop.f32.mrf.mxu3 }
 0x3b3   : > { %v10030_v9 = vpop.f32.mrf.mxu1 }
 0x3b6   : > { %v5355_v28 = vpop.f32.mrf.mxu0 }
 0x3b7   : > { %v5375_v34 = vadd.f32 %v5355_v28, %v5242_v1 }
 0x3b9   : > { %v10032_v53 = vpop.f32.mrf.mxu2  ;;  %v5620_v60 = vadd.f32 %v5600_v33, %v5375_v34  ;;  %v5244_v33 = vadd.f32 %v5227_v63, %v5071_v57  ;;  %v5073_v34 = vadd.f32 %v10020_v59, %v4823_v30  ;;  %v5074_v59 = vadd.f32 %v10026_v13, %v4825_v41 }
 0x3ba   : > { %v10042_v22 = vpop.f32.mrf.mxu3 }
 0x3bb   : > { %v10036_v0 = vpop.f32.mrf.mxu1 }
 0x3be   : > { %v5357_v12 = vpop.f32.mrf.mxu0 }
 0x3bf   : > { %v5376_v23 = vadd.f32 %v5357_v12, %v5243_v8  ;;  %v5072_v12 = vadd.f32 %v5056_v2, %v4820_v62 }
 0x3c1   : > { %v10038_v54 = vpop.f32.mrf.mxu2  ;;  %v5621_v29 = vadd.f32 %v5602_v25, %v5376_v23 }
 0x3c2   : > { %v5907_v45 = vpop.f32.mrf.mxu3 }
 0x3c3   : > { %v10046_v11 = vpop.f32.mrf.mxu1 }
 0x3c6   : > { %v5360_v38 = vpop.f32.mrf.mxu0 }
 0x3c7   : > { %v5377_v18 = vadd.f32 %v5360_v38, %v5244_v33  ;;  %v5075_v33 = vadd.f32 %v10032_v53, %v4828_v47  ;;  %v5076_v53 = vadd.f32 %v10038_v54, %v10014_v16 }
 0x3c9   : > { %v5773_v61 = vpop.f32.mrf.mxu2  ;;  %v5622_v63 = vadd.f32 %v10012_v21, %v5377_v18  ;;  %v5248_v62 = vadd.f32 %v10034_v43, %v5075_v33  ;;  %v5249_v43 = vadd.f32 %v10042_v22, %v5076_v53 }
 0x3ca   : > { %v5909_v37 = vpop.f32.mrf.mxu3  ;;  %v5793_v4 = vadd.f32 %v5773_v61, %v5620_v60 }
 0x3cb   : > { %v6325_v19 = vpop.f32.mrf.mxu1 }
 0x3cc   : > { %v5927_v6 = vadd.f32 %v5907_v45, %v5793_v4  ;;  %v5246_v4 = vadd.f32 %v10022_v20, %v5073_v34  ;;  %v5247_v20 = vadd.f32 %v10028_v49, %v5074_v59 }
 0x3ce   : > { %v5362_v35 = vpop.f32.mrf.mxu0 }
 0x3d1   : > { %v5775_v31 = vpop.f32.mrf.mxu2 }
 0x3d2   : > { %v5794_v39 = vadd.f32 %v5775_v31, %v5621_v29  ;;  %v5912_v28 = vpop.f32.mrf.mxu3 }
 0x3d3   : > { %v6327_v24 = vpop.f32.mrf.mxu1 }
 0x3d4   : > { %v5928_v25 = vadd.f32 %v5909_v37, %v5794_v39 }
 0x3d6   : > { %v10040_v50 = vpop.f32.mrf.mxu0 }
 0x3d7   : > { %v5379_v46 = vadd.f32 %v10040_v50, %v5246_v4 }
 0x3d9   : > { %v5778_v32 = vpop.f32.mrf.mxu2  ;;  %v5624_v57 = vadd.f32 %v10024_v14, %v5379_v46 }
 0x3da   : > { %v5795_v31 = vadd.f32 %v5778_v32, %v5622_v63  ;;  %v5914_v17 = vpop.f32.mrf.mxu3 }
 0x3db   : > { %v6330_v61 = vpop.f32.mrf.mxu1 }
 0x3dc   : > { %v5929_v3 = vadd.f32 %v5912_v28, %v5795_v31 }
 0x3de   : > { %v10044_v44 = vpop.f32.mrf.mxu0 }
 0x3df   : > { %v5380_v50 = vadd.f32 %v10044_v44, %v5247_v20 }
 0x3e1   : > { %v5780_v52 = vpop.f32.mrf.mxu2 }
 0x3e2   : > { %v5917_v32 = vpop.f32.mrf.mxu3 }
 0x3e3   : > { %v6332_v37 = vpop.f32.mrf.mxu1 }
 0x3e6   : > { %v10051_v40 = vpop.f32.mrf.mxu0 }
 0x3e7   : > { %v5381_v26 = vadd.f32 %v10051_v40, %v5248_v62 }
 0x3ea   : > { %v5919_v28 = vpop.f32.mrf.mxu3 }
 0x3ee   : > { %v10055_v55 = vpop.f32.mrf.mxu0 }
 0x3f2   : > { %v5922_v40 = vpop.f32.mrf.mxu3 }
 0x3f6   : > { %v6152_v42 = vpop.f32.mrf.mxu0 }
 0x3f7   : > { %v6172_v7 = vadd.f32 %v6152_v42, %v5927_v6  ;;  %v6335_v42 = vpop.f32.mrf.mxu1 }
 0x3f9   : > { %v6345_v58 = vadd.f32 %v6325_v19, %v6172_v7  ;;  %v5245_v19 = vadd.f32 %v10016_v27, %v5072_v12  ;;  %v5783_v27 = vpop.f32.mrf.mxu2 }
 0x3fa   : > { %v5797_v29 = vadd.f32 %v5783_v27, %v5624_v57 }
 0x3fb   : > { %v6357_v48 = vadd.f32 %v10063_v56, %v6345_v58  ;;  %v5378_v2 = vadd.f32 %v5362_v35, %v5245_v19  ;;  %v5625_v58 = vadd.f32 %v10030_v9, %v5380_v50  ;;  %v5626_v9 = vadd.f32 %v10036_v0, %v5381_v26 }
 0x3fc   : > { %v5931_v39 = vadd.f32 %v5917_v32, %v5797_v29 }
 0x3fd   : > { %6365 = vst [vmem:[%s10068_s27] sm:$0xff] %v6357_v48  ;;  %v5623_v21 = vadd.f32 %v10018_v51, %v5378_v2 }
 0x3fe   : > { %v6154_v45 = vpop.f32.mrf.mxu0 }
 0x3ff   : > { %v6173_v1 = vadd.f32 %v6154_v45, %v5928_v25  ;;  %v5796_v10 = vadd.f32 %v5780_v52, %v5623_v21  ;;  %v6337_v5 = vpop.f32.mrf.mxu1 }
 0x401   : > { %v6346_v15 = vadd.f32 %v6327_v24, %v6173_v1  ;;  %v5930_v24 = vadd.f32 %v5914_v17, %v5796_v10  ;;  %v5785_v36 = vpop.f32.mrf.mxu2  ;;  %v5382_v1 = vadd.f32 %v10055_v55, %v5249_v43  ;;  %v5924_v17 = vpop.f32.mrf.mxu3 }
 0x402   : > { %v5798_v18 = vadd.f32 %v5785_v36, %v5625_v58 }
 0x403   : > { %v6358_v38 = vadd.f32 %v10063_v56, %v6346_v15  ;;  %v5627_v0 = vadd.f32 %v10046_v11, %v5382_v1 }
 0x405   : > { %6366 = vst [vmem:[%s10068_s27 + $0x8] sm:$0xff] %v6358_v38 }
 0x406   : > { %v6157_v60 = vpop.f32.mrf.mxu0 }
 0x407   : > { %v6174_v8 = vadd.f32 %v6157_v60, %v5929_v3  ;;  %v6340_v31 = vpop.f32.mrf.mxu1 }
 0x409   : > { %v6347_v23 = vadd.f32 %v6330_v61, %v6174_v8  ;;  %v5788_v12 = vpop.f32.mrf.mxu2  ;;  %v5932_v61 = vadd.f32 %v5919_v28, %v5798_v18 }
 0x40a   : > { %v5799_v45 = vadd.f32 %v5788_v12, %v5626_v9 }
 0x40b   : > { %v6359_v35 = vadd.f32 %v10063_v56, %v6347_v23 }
 0x40c   : > { %v5933_v16 = vadd.f32 %v5922_v40, %v5799_v45 }
 0x40d   : > { %6367 = vst [vmem:[%s10068_s27 + $0x10] sm:$0xff] %v6359_v35 }
 0x40e   : > { %v6159_v51 = vpop.f32.mrf.mxu0 }
 0x40f   : > { %v6175_v6 = vadd.f32 %v6159_v51, %v5930_v24  ;;  %v6342_v11 = vpop.f32.mrf.mxu1 }
 0x411   : > { %v6348_v7 = vadd.f32 %v6332_v37, %v6175_v6  ;;  %v5790_v54 = vpop.f32.mrf.mxu2 }
 0x412   : > { %v5800_v2 = vadd.f32 %v5790_v54, %v5627_v0 }
 0x413   : > { %v6360_v13 = vadd.f32 %v10063_v56, %v6348_v7 }
 0x414   : > { %v5934_v55 = vadd.f32 %v5924_v17, %v5800_v2 }
 0x415   : > { %6368 = vst [vmem:[%s10068_s27 + $0x18] sm:$0xff] %v6360_v13 }
 0x416   : > { %v6162_v14 = vpop.f32.mrf.mxu0 }
 0x417   : > { %v6176_v49 = vadd.f32 %v6162_v14, %v5931_v39 }
 0x419   : > { %v6349_v48 = vadd.f32 %v6335_v42, %v6176_v49 }
 0x41b   : > { %v6361_v44 = vadd.f32 %v10063_v56, %v6349_v48 }
 0x41d   : > { %6369 = vst [vmem:[%s10068_s27 + $0x20] sm:$0xff] %v6361_v44 }
 0x41e   : > { %v6164_v25 = vpop.f32.mrf.mxu0 }
 0x41f   : > { %v6177_v52 = vadd.f32 %v6164_v25, %v5932_v61 }
 0x421   : > { %v6350_v63 = vadd.f32 %v6337_v5, %v6177_v52 }
 0x423   : > { %v6362_v19 = vadd.f32 %v10063_v56, %v6350_v63 }
 0x425   : > { %6370 = vst [vmem:[%s10068_s27 + $0x28] sm:$0xff] %v6362_v19 }
 0x426   : > { %v6167_v15 = vpop.f32.mrf.mxu0 }
 0x427   : > { %v6178_v30 = vadd.f32 %v6167_v15, %v5933_v16 }
 0x429   : > { %v6351_v38 = vadd.f32 %v6340_v31, %v6178_v30 }
 0x42b   : > { %v6363_v22 = vadd.f32 %v10063_v56, %v6351_v38 }
 0x42d   : > { %6371 = vst [vmem:[%s10068_s27 + $0x30] sm:$0xff] %v6363_v22 }
 0x42e   : > { %v6169_v34 = vpop.f32.mrf.mxu0 }
 0x42f   : > { %v6179_v3 = vadd.f32 %v6169_v34, %v5934_v55 }
 0x431   : > { %v6352_v60 = vadd.f32 %v6342_v11, %v6179_v3 }
 0x433   : > { %v6364_v37 = vadd.f32 %v10063_v56, %v6352_v60 }
 0x435   : > { %6372 = vst [vmem:[%s10068_s27 + $0x38] sm:$0xff] %v6364_v37 }
 0x436   : > { %8074 = shalt.err (!%p8071_p11)
}
 0x437   : > { %s8133_s1 = smov 128   ;;  %s8134_s27 = smov 8  }
 0x438   : > { %7794 = dma.vmem_to_hbm [thread:$0]  (%p8274_p3), %s6387_s24, 1024, %s6389_s21, %s6374_s17, %s8133_s1, %s8133_s1, %s8134_s27  }
 0x439 PF: > { %s6403_s7 = sand.u32 1, %s8109_s13   ;;  %p10236_p12 = scmp.ge.s32.totalorder %s8121_s16, 2 }
 0x43a   : > { %s6404_s9 = scalar_lea.sflag [#allocation6], %s6403_s7 }
 0x43b   : > { %p7814_p13 = pnand %p10236_p12, %p8225_p6 }
 0x43d   : > { %p7815_p0 = pneg %p7814_p13 }
 0x43f   : > { %8104 = dma.done.wait (%p7815_p0), %s6404_s9, 1024  }
 0x440   : > { %8106 = vsyncadd (%p7815_p0), %s6404_s9, 4294966272  ;;  %p25_p5 = scmp.ge.s32.totalorder %s8264_s30, 4   ;;  %s10237_s13 = smov %s8113_s14 }
 0x441   : > { %s10238_s14 = smov %s8117_s15  ;;  %s10239_s15 = smov %s8280_s22 }
 0x442   : > { %s10240_s16 = smov %s8264_s30  ;;  %27 = sbr.rel (!%p25_p5) target bundleno = 12 (0xc), region = 127 }
 0x447   :  { %6410 = vsyncpa [#allocation5], 1 }
 0x448   :  { %6412 = vsyncpa [#allocation5 + $0x1], 1 }
 0x449   :  { %6413 = vsyncpa [#allocation8], 1 }
 0x44a   :  { %6414 = vsyncpa [#allocation11], 1 }
 0x44b   :  { %6415 = vsyncpa [#allocation6], 1 }
 0x44c   :  { %6417 = vsyncpa [#allocation6 + $0x1], 1 }

</bundles_post_ra>
